<compile_context>
chip_gen: v7x
topology: tpu7x:2x2x1
jax: 0.10.0
libtpu: 0.0.40
codegen_flags: <defaults>
</compile_context>

<pallas_src>
import jax
import jax.numpy as jnp
from jax import lax
from jax.experimental import pallas as pl
from jax.experimental.pallas import tpu as pltpu

EPS = 1e-5
LANE = 128


def _round_up(x, m):
    return ((x + m - 1) // m) * m


def _vmem_limit_bytes():
    """Scoped-VMEM limit derived from the actual part: 75% of physical per-core VMEM."""
    try:
        cap = int(pltpu.get_tpu_info().vmem_capacity_bytes)
        if cap <= 0:
            raise ValueError
    except Exception:
        cap = 64 * 1024 * 1024            # conservative fallback (v7x physical size)
    return (cap * 3) // 4


def _pick_row_block(N, H, W, Cin, Cout_p, Kdim_p, pad, vmem_budget):
    """Largest divisor TH of H whose per-step working set fits ~1/3 of the VMEM budget,
    shrunk (if possible) so the parallel grid has >= 2 steps (v7x has 2 TensorCores)."""

    def step_bytes(th):
        rows, thp, wp = th * W, th + 2 * pad, W + 2 * pad
        return (2 * thp * wp * Cin * 2          # double-buffered bf16 halo'd input block
                + 2 * Kdim_p * Cout_p * 2       # double-buffered bf16 resident weights
                + 2 * rows * Cout_p * 4         # double-buffered f32 output block
                + rows * Kdim_p * 2             # bf16 slab scratch
                + 3 * rows * Cout_p * 4)        # f32 y / centered / squared temporaries

    divisors = [d for d in range(1, H + 1) if H % d == 0]
    aligned = [d for d in divisors if (d * W) % 8 == 0] or divisors
    fits = [d for d in aligned if step_bytes(d) <= vmem_budget // 3]
    th = max(fits) if fits else min(aligned)
    while N * (H // th) < 2:                    # keep both v7x TensorCores busy
        smaller = [d for d in aligned if d < th]
        if not smaller:
            break
        th = max(smaller)
    return th


def _fill_slab(slab_ref, x_ref, K, TH, W, Cin):
    """Pack this tile's (TH*W, Kdim_p) bf16 im2col slab into VMEM scratch.

    Column order (kh, kw, cin) matches the host-packed weight matrix; the zero tail pads
    the MXU contraction up to Kdim_p (>= 128, so v5e's 4x128x128 MXU is fully fed)."""
    ROWS = TH * W
    Kdim = K * K * Cin
    Kdim_p = slab_ref.shape[1]
    if Kdim_p > Kdim:
        slab_ref[:, Kdim:] = jnp.zeros((ROWS, Kdim_p - Kdim), slab_ref.dtype)
    for kh in range(K):
        for kw in range(K):
            c0 = (kh * K + kw) * Cin
            slab_ref[:, c0:c0 + Cin] = (
                x_ref[0, kh:kh + TH, kw:kw + W, :].reshape(ROWS, Cin))


# ---------------------------------------------------------------------------
# Pass 1: stats-only — one fused matmul, per-tile centered channel statistics.
# ---------------------------------------------------------------------------
def _make_stats_kernel(K, Cin, TH, W, Cout_p):
    ROWS = TH * W
    inv_rows = 1.0 / float(ROWS)

    def kernel(x_ref, w_ref, b_ref, stat_ref, slab_ref):
        # x_ref   : (1, TH+K-1, W+K-1, Cin) bf16   halo'd NHWC row block
        # w_ref   : (Kdim_p, Cout_p)        bf16   resident (constant index_map)
        # b_ref   : (1, Cout_p)             f32
        # stat_ref: (1, 2, Cout_p)          f32    [tile sum, tile centered sum-of-squares]
        # slab_ref: (ROWS, Kdim_p)          bf16   VMEM scratch
        _fill_slab(slab_ref, x_ref, K, TH, W, Cin)
        y = jnp.dot(slab_ref[...], w_ref[...],
                    preferred_element_type=jnp.float32) + b_ref[...]
        ts = jnp.sum(y, axis=0, keepdims=True)               # (1, Cout_p)
        d = y - ts * inv_rows                                 # centered -> no cancellation
        tss = jnp.sum(d * d, axis=0, keepdims=True)
        stat_ref[:, 0:1, :] = ts.reshape(1, 1, Cout_p)
        stat_ref[:, 1:2, :] = tss.reshape(1, 1, Cout_p)

    return kernel


# ---------------------------------------------------------------------------
# Pass 2: recompute conv (cheaper than staging y through HBM for Cin << Cout_p),
#         then folded BN affine + ReLU:  out = max(y*scale + shift, 0).
# ---------------------------------------------------------------------------
def _make_out_kernel(K, Cin, TH, W):
    def kernel(x_ref, w_ref, b_ref, scale_ref, shift_ref, o_ref, slab_ref):
        _fill_slab(slab_ref, x_ref, K, TH, W, Cin)
        y = jnp.dot(slab_ref[...], w_ref[...],
                    preferred_element_type=jnp.float32) + b_ref[...]
        o_ref[...] = jnp.maximum(y * scale_ref[...] + shift_ref[...], 0.0).astype(o_ref.dtype)

    return kernel


def conv_block_forward(x_nchw, w_oihw, bias, gamma, beta, *, out_dtype=None):
    """ReLU(BatchNorm2d(Conv2d(x))) — odd k, stride 1, 'same' padding, training-mode
    batch statistics (matching the PyTorch module's forward)."""
    N, Cin, H, W = x_nchw.shape
    Cout, Cin_w, K, K2 = w_oihw.shape
    assert Cin_w == Cin and K2 == K and K % 2 == 1
    # TODO(synk): stride != 1 / non-'same'-padding conv_block variants are not covered.
    pad = K // 2
    out_dtype = x_nchw.dtype if out_dtype is None else out_dtype  # bf16 halves epilogue HBM

    Cout_p = _round_up(Cout, LANE)
    Kdim = K * K * Cin
    Kdim_p = _round_up(Kdim, LANE)              # MXU contraction >= 128

    vmem_limit = _vmem_limit_bytes()
    TH = _pick_row_block(N, H, W, Cin, Cout_p, Kdim_p, pad, vmem_limit)
    n_hb = H // TH
    ROWS = TH * W
    NB = N * n_hb
    M = NB * ROWS                               # == N*H*W output pixels
    THp, Wp = TH + 2 * pad, W + 2 * pad
    # TODO(synk): pad/mask the row tile instead of asserting for awkward H, W.
    assert NB == 1 or ROWS % 8 == 0, "row tile must be sublane-aligned"

    # ---- host-side layout prep (O(input); no HBM im2col) ---------------------
    x_nhwc = jnp.transpose(x_nchw, (0, 2, 3, 1))
    xpad = jnp.pad(x_nhwc, ((0, 0), (pad, pad), (pad, pad), (0, 0))).astype(jnp.bfloat16)
    # halo'd row blocks: only (TH+2*pad)/TH duplication.
    # TODO(synk): for very large inputs replace this stacked copy with memory_space=pl.ANY
    # plus an in-kernel make_async_copy of the overlapping window (double-buffered).
    xblocks = jnp.stack([xpad[:, hb * TH: hb * TH + THp] for hb in range(n_hb)], axis=1)
    xblocks = xblocks.reshape(NB, THp, Wp, Cin)

    # weights (Cout, Cin, K, K) -> rows ordered (kh, kw, cin); pad to (Kdim_p, Cout_p)
    w_mat = jnp.transpose(w_oihw, (2, 3, 1, 0)).reshape(Kdim, Cout)
    w_mat = jnp.pad(w_mat, ((0, Kdim_p - Kdim), (0, Cout_p - Cout))).astype(jnp.bfloat16)
    b_row = jnp.pad(bias.astype(jnp.float32), (0, Cout_p - Cout)).reshape(1, Cout_p)

    x_spec = pl.BlockSpec((1, THp, Wp, Cin), lambda i: (i, 0, 0, 0))
    # TODO(synk): pipeline_mode=pl.Buffered(1) would halve the resident weight footprint.
    w_spec = pl.BlockSpec((Kdim_p, Cout_p), lambda i: (0, 0))   # constant -> no re-DMA
    row_spec = pl.BlockSpec((1, Cout_p), lambda i: (0, 0))
    cparams = pltpu.CompilerParams(
        dimension_semantics=("parallel",),       # per-tile partials: no serial dependence
        vmem_limit_bytes=vmem_limit,
    )

    # ---- pass 1: per-tile centered BatchNorm statistics (no y staging) -------
    stats = pl.pallas_call(
        _make_stats_kernel(K, Cin, TH, W, Cout_p),
        out_shape=jax.ShapeDtypeStruct((NB, 2, Cout_p), jnp.float32),
        grid_spec=pltpu.PrefetchScalarGridSpec(
            num_scalar_prefetch=0,
            grid=(NB,),
            in_specs=[x_spec, w_spec, row_spec],
            out_specs=pl.BlockSpec((1, 2, Cout_p), lambda i: (i, 0, 0)),
            scratch_shapes=[pltpu.VMEM((ROWS, Kdim_p), jnp.bfloat16)],
        ),
        compiler_params=cparams,
    )(xblocks, w_mat, b_row)

    # ---- tiny XLA glue: merge per-tile stats (Chan), fold BN affine ----------
    ts, tss = stats[:, 0, :], stats[:, 1, :]                  # (NB, Cout_p)
    mean = jnp.sum(ts, axis=0) / M
    tile_mean = ts / ROWS
    var = (jnp.sum(tss, axis=0)
           + ROWS * jnp.sum((tile_mean - mean[None, :]) ** 2, axis=0)) / M   # biased, as BN
    inv_std = lax.rsqrt(jnp.maximum(var, 0.0) + EPS)
    gamma_p = jnp.pad(gamma.astype(jnp.float32), (0, Cout_p - Cout))
    beta_p = jnp.pad(beta.astype(jnp.float32), (0, Cout_p - Cout))
    scale = (gamma_p * inv_std).reshape(1, Cout_p)
    shift = (beta_p - mean * gamma_p * inv_std).reshape(1, Cout_p)

    # ---- pass 2: recompute conv, folded BN affine + ReLU (lane-dense output) --
    out_flat = pl.pallas_call(
        _make_out_kernel(K, Cin, TH, W),
        out_shape=jax.ShapeDtypeStruct((M, Cout_p), out_dtype),
        grid_spec=pltpu.PrefetchScalarGridSpec(
            num_scalar_prefetch=0,
            grid=(NB,),
            in_specs=[x_spec, w_spec, row_spec, row_spec, row_spec],
            out_specs=pl.BlockSpec((ROWS, Cout_p), lambda i: (i, 0)),
            scratch_shapes=[pltpu.VMEM((ROWS, Kdim_p), jnp.bfloat16)],
        ),
        compiler_params=cparams,
    )(xblocks, w_mat, b_row, scale, shift)

    out = out_flat.reshape(N, H, W, Cout_p)[..., :Cout]
    return jnp.transpose(out, (0, 3, 1, 2)).astype(x_nchw.dtype)


# ---------------------------------------------------------------------------
# References
# ---------------------------------------------------------------------------
def _reference_f32(x, w, b, gamma, beta):
    """Pure-f32 reference matching the PyTorch conv_block in training mode."""
    pad = w.shape[-1] // 2
    y = lax.conv_general_dilated(
        x, w, window_strides=(1, 1), padding=((pad, pad), (pad, pad)),
        dimension_numbers=("NCHW", "OIHW", "NCHW"),
        precision=lax.Precision.HIGHEST) + b[None, :, None, None]
    mean = y.mean(axis=(0, 2, 3), keepdims=True)
    var = y.var(axis=(0, 2, 3), keepdims=True)          # biased, as BatchNorm uses
    yhat = (y - mean) * lax.rsqrt(var + EPS)
    return jnp.maximum(gamma[None, :, None, None] * yhat + beta[None, :, None, None], 0.0)


def _reference_bf16_matched(x, w, b, gamma, beta):
    """Same math under the kernel's precision policy (bf16 MXU inputs, f32 everything else)."""
    xb = x.astype(jnp.bfloat16).astype(jnp.float32)
    wb = w.astype(jnp.bfloat16).astype(jnp.float32)
    pad = w.shape[-1] // 2
    y = lax.conv_general_dilated(
        xb, wb, window_strides=(1, 1), padding=((pad, pad), (pad, pad)),
        dimension_numbers=("NCHW", "OIHW", "NCHW"),
        precision=lax.Precision.HIGHEST) + b[None, :, None, None]
    mean = y.mean(axis=(0, 2, 3), keepdims=True)
    var = y.var(axis=(0, 2, 3), keepdims=True)
    return jnp.maximum(gamma[None, :, None, None] * (y - mean) * lax.rsqrt(var + EPS)
                       + beta[None, :, None, None], 0.0)


if __name__ == "__main__":
    # small shapes consistent with the module's forward
    N, Cin, H, W = 2, 4, 16, 16
    Cout, K = 8, 3

    key = jax.random.PRNGKey(0)
    kx, kw, kb, kg, kbt = jax.random.split(key, 5)

    x = jax.random.normal(kx, (N, Cin, H, W), dtype=jnp.float32)
    w = jax.random.normal(kw, (Cout, Cin, K, K), dtype=jnp.float32) * 0.1
    b = jax.random.normal(kb, (Cout,), dtype=jnp.float32) * 0.1
    gamma = 1.0 + 0.1 * jax.random.normal(kg, (Cout,), dtype=jnp.float32)
    beta = 0.1 * jax.random.normal(kbt, (Cout,), dtype=jnp.float32)

    out = jax.block_until_ready(conv_block_forward(x, w, b, gamma, beta))
    assert out.shape == (N, Cout, H, W)

    ref_match = _reference_bf16_matched(x, w, b, gamma, beta)
    ref_f32 = _reference_f32(x, w, b, gamma, beta)
    err_match = float(jnp.max(jnp.abs(out - ref_match)))
    err_f32 = float(jnp.max(jnp.abs(out - ref_f32)))

    # tight check vs. a precision-matched reference; looser check vs. the pure-f32
    # module semantics (slack accounts for bf16 MXU inputs)
    assert jnp.allclose(out, ref_match, atol=2e-2, rtol=1e-2), err_match
    assert jnp.allclose(out, ref_f32, atol=5e-2, rtol=5e-2), err_f32

    print("KERNEL_OK")
</pallas_src>

<mosaic_0001>
module attributes {stable_mosaic.version = 11 : i64} {
  func.func @kernel(%arg0: i32, %arg1: memref<1x18x18x4xbf16, #tpu.memory_space<vmem>>, %arg2: memref<128x128xbf16, #tpu.memory_space<vmem>>, %arg3: memref<1x128xf32, #tpu.memory_space<vmem>>, %arg4: memref<1x2x128xf32, #tpu.memory_space<vmem>>, %arg5: memref<256x128xbf16, #tpu.memory_space<vmem>>) attributes {dimension_semantics = [#tpu.dimension_semantics<parallel>], iteration_bounds = array<i64: 2>, scalar_prefetch = 0 : i64, scratch_operands = 1 : i64, tpu.core_type = #tpu.core_type<tc>, window_params = [{transform_indices = @transform_0, window_bounds = array<i64: 1, 18, 18, 4>}, {pipeline_mode = #tpu.pipeline_mode<synchronous>, transform_indices = @transform_1, window_bounds = array<i64: 128, 128>}, {pipeline_mode = #tpu.pipeline_mode<synchronous>, transform_indices = @transform_2, window_bounds = array<i64: 1, 128>}, {transform_indices = @transform_3, window_bounds = array<i64: 1, 2, 128>}]} {
    %cst = arith.constant 0.000000e+00 : bf16
    %0 = vector.broadcast %cst : bf16 to vector<256x92xbf16>
    %c0 = arith.constant 0 : index
    %c36 = arith.constant 36 : index
    %1 = vector.load %arg5[%c0, %c36] : memref<256x128xbf16, #tpu.memory_space<vmem>>, vector<256x92xbf16>
    tpu.vector_store %arg5[%c0, %c36], %0 {strides = array<i32>} : memref<256x128xbf16, #tpu.memory_space<vmem>>, vector<256x92xbf16>,
    %c0_0 = arith.constant 0 : index
    %c0_1 = arith.constant 0 : index
    %c0_2 = arith.constant 0 : index
    %c0_3 = arith.constant 0 : index
    %2 = vector.load %arg1[%c0_0, %c0_1, %c0_2, %c0_3] : memref<1x18x18x4xbf16, #tpu.memory_space<vmem>>, vector<1x16x16x4xbf16>
    %3 = vector.shape_cast %2 : vector<1x16x16x4xbf16> to vector<16x16x4xbf16>
    %4 = vector.shape_cast %3 : vector<16x16x4xbf16> to vector<256x4xbf16>
    %c0_4 = arith.constant 0 : index
    %c0_5 = arith.constant 0 : index
    %5 = vector.load %arg5[%c0_4, %c0_5] : memref<256x128xbf16, #tpu.memory_space<vmem>>, vector<256x4xbf16>
    tpu.vector_store %arg5[%c0_4, %c0_5], %4 {strides = array<i32>} : memref<256x128xbf16, #tpu.memory_space<vmem>>, vector<256x4xbf16>,
    %c0_6 = arith.constant 0 : index
    %c0_7 = arith.constant 0 : index
    %c1 = arith.constant 1 : index
    %c0_8 = arith.constant 0 : index
    %6 = vector.load %arg1[%c0_6, %c0_7, %c1, %c0_8] : memref<1x18x18x4xbf16, #tpu.memory_space<vmem>>, vector<1x16x16x4xbf16>
    %7 = vector.shape_cast %6 : vector<1x16x16x4xbf16> to vector<16x16x4xbf16>
    %8 = vector.shape_cast %7 : vector<16x16x4xbf16> to vector<256x4xbf16>
    %c0_9 = arith.constant 0 : index
    %c4 = arith.constant 4 : index
    %9 = vector.load %arg5[%c0_9, %c4] : memref<256x128xbf16, #tpu.memory_space<vmem>>, vector<256x4xbf16>
    tpu.vector_store %arg5[%c0_9, %c4], %8 {strides = array<i32>} : memref<256x128xbf16, #tpu.memory_space<vmem>>, vector<256x4xbf16>,
    %c0_10 = arith.constant 0 : index
    %c0_11 = arith.constant 0 : index
    %c2 = arith.constant 2 : index
    %c0_12 = arith.constant 0 : index
    %10 = vector.load %arg1[%c0_10, %c0_11, %c2, %c0_12] : memref<1x18x18x4xbf16, #tpu.memory_space<vmem>>, vector<1x16x16x4xbf16>
    %11 = vector.shape_cast %10 : vector<1x16x16x4xbf16> to vector<16x16x4xbf16>
    %12 = vector.shape_cast %11 : vector<16x16x4xbf16> to vector<256x4xbf16>
    %c0_13 = arith.constant 0 : index
    %c8 = arith.constant 8 : index
    %13 = vector.load %arg5[%c0_13, %c8] : memref<256x128xbf16, #tpu.memory_space<vmem>>, vector<256x4xbf16>
    tpu.vector_store %arg5[%c0_13, %c8], %12 {strides = array<i32>} : memref<256x128xbf16, #tpu.memory_space<vmem>>, vector<256x4xbf16>,
    %c0_14 = arith.constant 0 : index
    %c1_15 = arith.constant 1 : index
    %c0_16 = arith.constant 0 : index
    %c0_17 = arith.constant 0 : index
    %14 = vector.load %arg1[%c0_14, %c1_15, %c0_16, %c0_17] : memref<1x18x18x4xbf16, #tpu.memory_space<vmem>>, vector<1x16x16x4xbf16>
    %15 = vector.shape_cast %14 : vector<1x16x16x4xbf16> to vector<16x16x4xbf16>
    %16 = vector.shape_cast %15 : vector<16x16x4xbf16> to vector<256x4xbf16>
    %c0_18 = arith.constant 0 : index
    %c12 = arith.constant 12 : index
    %17 = vector.load %arg5[%c0_18, %c12] : memref<256x128xbf16, #tpu.memory_space<vmem>>, vector<256x4xbf16>
    tpu.vector_store %arg5[%c0_18, %c12], %16 {strides = array<i32>} : memref<256x128xbf16, #tpu.memory_space<vmem>>, vector<256x4xbf16>,
    %c0_19 = arith.constant 0 : index
    %c1_20 = arith.constant 1 : index
    %c1_21 = arith.constant 1 : index
    %c0_22 = arith.constant 0 : index
    %18 = vector.load %arg1[%c0_19, %c1_20, %c1_21, %c0_22] : memref<1x18x18x4xbf16, #tpu.memory_space<vmem>>, vector<1x16x16x4xbf16>
    %19 = vector.shape_cast %18 : vector<1x16x16x4xbf16> to vector<16x16x4xbf16>
    %20 = vector.shape_cast %19 : vector<16x16x4xbf16> to vector<256x4xbf16>
    %c0_23 = arith.constant 0 : index
    %c16 = arith.constant 16 : index
    %21 = vector.load %arg5[%c0_23, %c16] : memref<256x128xbf16, #tpu.memory_space<vmem>>, vector<256x4xbf16>
    tpu.vector_store %arg5[%c0_23, %c16], %20 {strides = array<i32>} : memref<256x128xbf16, #tpu.memory_space<vmem>>, vector<256x4xbf16>,
    %c0_24 = arith.constant 0 : index
    %c1_25 = arith.constant 1 : index
    %c2_26 = arith.constant 2 : index
    %c0_27 = arith.constant 0 : index
    %22 = vector.load %arg1[%c0_24, %c1_25, %c2_26, %c0_27] : memref<1x18x18x4xbf16, #tpu.memory_space<vmem>>, vector<1x16x16x4xbf16>
    %23 = vector.shape_cast %22 : vector<1x16x16x4xbf16> to vector<16x16x4xbf16>
    %24 = vector.shape_cast %23 : vector<16x16x4xbf16> to vector<256x4xbf16>
    %c0_28 = arith.constant 0 : index
    %c20 = arith.constant 20 : index
    %25 = vector.load %arg5[%c0_28, %c20] : memref<256x128xbf16, #tpu.memory_space<vmem>>, vector<256x4xbf16>
    tpu.vector_store %arg5[%c0_28, %c20], %24 {strides = array<i32>} : memref<256x128xbf16, #tpu.memory_space<vmem>>, vector<256x4xbf16>,
    %c0_29 = arith.constant 0 : index
    %c2_30 = arith.constant 2 : index
    %c0_31 = arith.constant 0 : index
    %c0_32 = arith.constant 0 : index
    %26 = vector.load %arg1[%c0_29, %c2_30, %c0_31, %c0_32] : memref<1x18x18x4xbf16, #tpu.memory_space<vmem>>, vector<1x16x16x4xbf16>
    %27 = vector.shape_cast %26 : vector<1x16x16x4xbf16> to vector<16x16x4xbf16>
    %28 = vector.shape_cast %27 : vector<16x16x4xbf16> to vector<256x4xbf16>
    %c0_33 = arith.constant 0 : index
    %c24 = arith.constant 24 : index
    %29 = vector.load %arg5[%c0_33, %c24] : memref<256x128xbf16, #tpu.memory_space<vmem>>, vector<256x4xbf16>
    tpu.vector_store %arg5[%c0_33, %c24], %28 {strides = array<i32>} : memref<256x128xbf16, #tpu.memory_space<vmem>>, vector<256x4xbf16>,
    %c0_34 = arith.constant 0 : index
    %c2_35 = arith.constant 2 : index
    %c1_36 = arith.constant 1 : index
    %c0_37 = arith.constant 0 : index
    %30 = vector.load %arg1[%c0_34, %c2_35, %c1_36, %c0_37] : memref<1x18x18x4xbf16, #tpu.memory_space<vmem>>, vector<1x16x16x4xbf16>
    %31 = vector.shape_cast %30 : vector<1x16x16x4xbf16> to vector<16x16x4xbf16>
    %32 = vector.shape_cast %31 : vector<16x16x4xbf16> to vector<256x4xbf16>
    %c0_38 = arith.constant 0 : index
    %c28 = arith.constant 28 : index
    %33 = vector.load %arg5[%c0_38, %c28] : memref<256x128xbf16, #tpu.memory_space<vmem>>, vector<256x4xbf16>
    tpu.vector_store %arg5[%c0_38, %c28], %32 {strides = array<i32>} : memref<256x128xbf16, #tpu.memory_space<vmem>>, vector<256x4xbf16>,
    %c0_39 = arith.constant 0 : index
    %c2_40 = arith.constant 2 : index
    %c2_41 = arith.constant 2 : index
    %c0_42 = arith.constant 0 : index
    %34 = vector.load %arg1[%c0_39, %c2_40, %c2_41, %c0_42] : memref<1x18x18x4xbf16, #tpu.memory_space<vmem>>, vector<1x16x16x4xbf16>
    %35 = vector.shape_cast %34 : vector<1x16x16x4xbf16> to vector<16x16x4xbf16>
    %36 = vector.shape_cast %35 : vector<16x16x4xbf16> to vector<256x4xbf16>
    %c0_43 = arith.constant 0 : index
    %c32 = arith.constant 32 : index
    %37 = vector.load %arg5[%c0_43, %c32] : memref<256x128xbf16, #tpu.memory_space<vmem>>, vector<256x4xbf16>
    tpu.vector_store %arg5[%c0_43, %c32], %36 {strides = array<i32>} : memref<256x128xbf16, #tpu.memory_space<vmem>>, vector<256x4xbf16>,
    %c0_44 = arith.constant 0 : index
    %c0_45 = arith.constant 0 : index
    %38 = vector.load %arg5[%c0_44, %c0_45] : memref<256x128xbf16, #tpu.memory_space<vmem>>, vector<256x128xbf16>
    %c0_46 = arith.constant 0 : index
    %c0_47 = arith.constant 0 : index
    %39 = vector.load %arg2[%c0_46, %c0_47] : memref<128x128xbf16, #tpu.memory_space<vmem>>, vector<128x128xbf16>
    %cst_48 = arith.constant dense<0.000000e+00> : vector<256x128xf32>
    %40 = tpu.matmul %38, %39, %cst_48 {dimension_numbers = #tpu.dot_dimension_numbers<[1], [0], [0], [1], [0, 0, 1, 1], [], []>} : vector<256x128xbf16>, vector<128x128xbf16>, vector<256x128xf32> -> vector<256x128xf32>
    %c0_49 = arith.constant 0 : index
    %c0_50 = arith.constant 0 : index
    %41 = vector.load %arg3[%c0_49, %c0_50] : memref<1x128xf32, #tpu.memory_space<vmem>>, vector<1x128xf32>
    %42 = vector.broadcast %41 : vector<1x128xf32> to vector<256x128xf32>
    %43 = arith.addf %40, %42 : vector<256x128xf32>
    %cst_51 = arith.constant dense<0.000000e+00> : vector<128xf32>
    %44 = vector.multi_reduction <add>, %43, %cst_51 [0] : vector<256x128xf32> to vector<128xf32>
    %45 = vector.shape_cast %44 : vector<128xf32> to vector<1x128xf32>
    %cst_52 = arith.constant 3.906250e-03 : f32
    %46 = vector.broadcast %cst_52 : f32 to vector<1x128xf32>
    %47 = arith.mulf %45, %46 : vector<1x128xf32>
    %48 = vector.broadcast %47 : vector<1x128xf32> to vector<256x128xf32>
    %49 = arith.subf %43, %48 : vector<256x128xf32>
    %50 = arith.mulf %49, %49 : vector<256x128xf32>
    %cst_53 = arith.constant dense<0.000000e+00> : vector<128xf32>
    %51 = vector.multi_reduction <add>, %50, %cst_53 [0] : vector<256x128xf32> to vector<128xf32>
    %52 = vector.shape_cast %51 : vector<128xf32> to vector<1x128xf32>
    %53 = vector.shape_cast %45 : vector<1x128xf32> to vector<1x1x128xf32>
    %c0_54 = arith.constant 0 : index
    %c0_55 = arith.constant 0 : index
    %c0_56 = arith.constant 0 : index
    %54 = vector.load %arg4[%c0_54, %c0_55, %c0_56] : memref<1x2x128xf32, #tpu.memory_space<vmem>>, vector<1x1x128xf32>
    tpu.vector_store %arg4[%c0_54, %c0_55, %c0_56], %53 {strides = array<i32>} : memref<1x2x128xf32, #tpu.memory_space<vmem>>, vector<1x1x128xf32>,
    %55 = vector.shape_cast %52 : vector<1x128xf32> to vector<1x1x128xf32>
    %c0_57 = arith.constant 0 : index
    %c1_58 = arith.constant 1 : index
    %c0_59 = arith.constant 0 : index
    %56 = vector.load %arg4[%c0_57, %c1_58, %c0_59] : memref<1x2x128xf32, #tpu.memory_space<vmem>>, vector<1x1x128xf32>
    tpu.vector_store %arg4[%c0_57, %c1_58, %c0_59], %55 {strides = array<i32>} : memref<1x2x128xf32, #tpu.memory_space<vmem>>, vector<1x1x128xf32>,
    return
  }
  func.func @transform_0(%arg0: i32) -> (i32, i32, i32, i32) {
    %c0_i32 = arith.constant 0 : i32
    %c0_i32_0 = arith.constant 0 : i32
    %c0_i32_1 = arith.constant 0 : i32
    %c0_i32_2 = arith.constant 0 : i32
    return %arg0, %c0_i32, %c0_i32_0, %c0_i32_1 : i32, i32, i32, i32
  }
  func.func @transform_1(%arg0: i32) -> (i32, i32) {
    %c0_i32 = arith.constant 0 : i32
    %c0_i32_0 = arith.constant 0 : i32
    %c0_i32_1 = arith.constant 0 : i32
    return %c0_i32, %c0_i32_0 : i32, i32
  }
  func.func @transform_2(%arg0: i32) -> (i32, i32) {
    %c0_i32 = arith.constant 0 : i32
    %c0_i32_0 = arith.constant 0 : i32
    %c0_i32_1 = arith.constant 0 : i32
    return %c0_i32, %c0_i32_0 : i32, i32
  }
  func.func @transform_3(%arg0: i32) -> (i32, i32, i32) {
    %c0_i32 = arith.constant 0 : i32
    %c0_i32_0 = arith.constant 0 : i32
    %c0_i32_1 = arith.constant 0 : i32
    return %arg0, %c0_i32, %c0_i32_0 : i32, i32, i32
  }
}

</mosaic_0001>

<bundles_post_ra>
// kernel: tpu_custom_call.1
= control target key start
LH: loop header
LB: loop body
LE: loop exit
PB: predicated region body
PF: predicated region fallthrough
CT: control target
= control target key end

     0   :  { %8 = vsyncpa [#allocation4], 0  ;;  %s5950_s0 = inlined_call_operand.vmem [shape: bf16[2,18,18,4], index: 0, kind: input, shape index: {}]   ;;  %s5951_s1 = inlined_call_operand.vmem [shape: bf16[128,128], index: 1, kind: input, shape index: {}]   ;;  %s5952_s2 = inlined_call_operand.vmem [shape: f32[1,128], index: 2, kind: input, shape index: {}]   ;;  %s5953_s3 = inlined_call_operand.hbm [shape: f32[2,2,128], index: 3, kind: output, shape index: {}]  }
   0x1   :  { %10 = vsyncpa [#allocation4 + $0x1], 0  ;;  %s4508_s12 = smov 0   ;;  %s4510_s13 = smov 0  }
   0x2   :  { %s4512_s14 = smov 0   ;;  %s4514_s15 = smov 0  }
   0x3 LB: > { %s4529_s16 = sadd.s32 4294967295, %s4476_s15   ;;  %s3754_s17 = sadd.s32 4294967294, %s4476_s15   ;;  %s4476_s15 = sphi %s4514_s15, %s5963_s15   ;;  %s4472_s14 = sphi %s4512_s14, %s5962_s14   ;;  %s4468_s13 = sphi %s4510_s13, %s5961_s13   ;;  %s4464_s12 = sphi %s4508_s12, %s5960_s12  }
   0x4   : > { %s4533_s18 = sadd.s32 1, %s4476_s15   ;;  %s91_s19 = sadd.s32 1, %s4472_s14 }
   0x5   : > { %s88_s20 = ssub.s32 %s4476_s15, %s4533_s18  ;;  %p101_p0 = scmp.ne.s32.totalorder %s4472_s14, %s4468_s13 }
   0x6   : > { %p89_p1 = scmp.eq.s32.totalorder %s88_s20, 0  ;;  %p102_p2 = scmp.eq.s32.totalorder %s4529_s16, 1 }
   0x7   : > { %p107_p3 = scmp.ne.s32.totalorder %s4468_s13, %s4464_s12  ;;  %p108_p4 = scmp.eq.s32.totalorder %s3754_s17, 1 }
   0x8   : > { %s4544_s21 = scalar_select %p89_p1, %s4472_s14, %s91_s19  }
   0x9   : > { %p4546_p5 = por %p102_p2, %p101_p0  ;;  %p4550_p6 = por %p108_p4, %p107_p3 }
   0xa   : > { %p3757_p7 = scmp.ge.s32.totalorder %s4476_s15, 1  ;;  %p140_p8 = scmp.lt.s32.totalorder %s4476_s15, 3 }
   0xc   : > { %p141_p9 = pnand %p3757_p7, %p140_p8 }
   0xd   : > { %p164_p10 = scmp.lt.s32.totalorder (!%p141_p9), %s4529_s16, 1  ;;  %vm976_vm0 = vcmask (!%p141_p9), 1042432   ;;  %vm977_vm1 = vcmask (!%p141_p9), 1046532   ;;  %s4478_s29 = smov (!%p141_p9), 12   ;;  %vm380_vm3 = vsmask.f32 (!%p141_p9), 3328 }
   0xe   : > { %144 = sbr.rel (%p141_p9) target bundleno = 783 (0x30f), region = 32  ;;  %vm4558_vm2 = vmor (!%p141_p9), %vm976_vm0, %vm977_vm1  ;;  %vm381_vm4 = vsmask.f32 (!%p141_p9), 7440  ;;  %s4479_s30 = smov (!%p141_p9), 20   ;;  %vm170_vm6 = vcmask (!%p141_p9), 1047840   ;;  %vm315_vm7 = vcmask (!%p141_p9), 31744  }
   0xf   : > { %s4480_s4 = smov (!%p141_p9), 8   ;;  %vm4604_vm5 = vmor (!%p141_p9), %vm380_vm3, %vm381_vm4  ;;  %s4481_s5 = smov (!%p141_p9), 4   ;;  %vm863_vm8 = vcmask (!%p141_p9), 64544   ;;  %vm1187_vm9 = vcmask (!%p141_p9), 97344   ;;  %vm1365_vm10 = vcmask (!%p141_p9), 130144   ;;  %vm1910_vm11 = vcmask (!%p141_p9), 162944  }
  0x10   : > { %s4482_s6 = smov (!%p141_p9), 16   ;;  %s4483_s9 = smov (!%p141_p9), 24   ;;  %vm2231_vm12 = vcmask (!%p141_p9), 195744   ;;  %vm2409_vm13 = vcmask (!%p141_p9), 228544   ;;  %vm2954_vm14 = vcmask (!%p141_p9), 261344   ;;  %vm3275_vm15 = vcmask (!%p141_p9), 294144  }
  0x11   : > { %s4484_s17 = smov (!%p141_p9), 28  }
  0x15   : > { %s165_s24 = scalar_select %p164_p10, %s4529_s16, 1 }
  0x17   : > { %s4309_s25 = smul.u32 216, %s165_s24  ;;  %s4485_s24 = smov 32  }
  0x19   : > { %s4565_s28 = scalar_lea.vmem %s5950_s0, %s4309_s25 }
  0x1a   : > { %v4358_v1 = vld [vmem:[%s4565_s28 + $0x18] sm:$0xff]   ;;  %v4359_v2 = vld [vmem:[%s4565_s28 + $0xc] sm:$0xff]   ;;  %v3938_v5 = vld [vmem:[%s4565_s28 + $0x14] sm:$0x1] }
  0x1b   : > { %1319 = vrot.lane.b32.xlu1 %v4358_v1, %s4478_s29  ;;  %v3936_v3 = vld [vmem:[%s4565_s28 + $0xc] sm:$0xe]  ;;  %v3937_v4 = vld [vmem:[%s4565_s28 + $0x10] sm:$0xf]  ;;  %1317 = vrot.lane.b32.xlu0 %v4359_v2, %s4478_s29  ;;  %v2028_v8 = vrot.slane %v3938_v5, 5 }
  0x1c   : > { %v3984_v6 = vrot.slane %v3936_v3, 9  ;;  %v2025_v7 = vrot.slane %v3937_v4, 5  ;;  %v880_v9 = vld [vmem:[%s4565_s28] sm:$0xe]  ;;  %v881_v10 = vld [vmem:[%s4565_s28 + $0x4] sm:$0xf] }
  0x1d   : > { %v882_v11 = vld [vmem:[%s4565_s28 + $0x8] sm:$0x1]  ;;  %v3792_v12 = vrot.slane %v880_v9, 9  ;;  %v981_v15 = vrot.slane %v881_v10, 5  ;;  %v883_v17 = vld [vmem:[%s4565_s28 + $0xc] sm:$0xe] }
  0x1e   : > { %v2026_v13 = vsel %vm4558_vm2, %v3984_v6, %v2025_v7  ;;  %v2027_v14 = vrot.slane %v2025_v7, 4  ;;  %v984_v16 = vrot.slane %v882_v11, 5  ;;  %v884_v18 = vld [vmem:[%s4565_s28 + $0x10] sm:$0xf]  ;;  %v885_v19 = vld [vmem:[%s4565_s28 + $0x14] sm:$0x1] }
  0x1f   : > { %v3793_v20 = vrot.slane %v883_v17, 9  ;;  %v982_v22 = vsel %vm4558_vm2, %v3792_v12, %v981_v15  ;;  %v983_v23 = vrot.slane %v981_v15, 4  ;;  %v988_v24 = vrot.slane %v884_v18, 5  ;;  %v332_v25 = vld [vmem:[%s4565_s28] sm:$0xf] }
  0x20   : > { %v2029_v21 = vsel %vm4558_vm2, %v2027_v14, %v2028_v8  ;;  %v333_v26 = vld [vmem:[%s4565_s28 + $0x4] sm:$0xf]  ;;  %v991_v28 = vrot.slane %v885_v19, 5  ;;  %v334_v29 = vld [vmem:[%s4565_s28 + $0x8] sm:$0x1]  ;;  %v384_v30 = vshrl.u32 %v332_v25, 16 }
  0x21   : > { %v4000_v27 = vcombine.low %v2026_v13, %v2029_v21  ;;  %v387_v31 = vshll.u32 %v332_v25, 16  ;;  %v985_v32 = vsel %vm4558_vm2, %v983_v23, %v984_v16  ;;  %v989_v33 = vsel %vm4558_vm2, %v3793_v20, %v988_v24  ;;  %v3939_v36 = vld [vmem:[%s4565_s28 + $0x18] sm:$0xe]  ;;  %v3940_v37 = vld [vmem:[%s4565_s28 + $0x1c] sm:$0xf] }
  0x22   : > { %v990_v34 = vrot.slane %v988_v24, 4  ;;  %v393_v35 = vshll.u32 %v333_v26, 16  ;;  %v3808_v38 = vcombine.low %v982_v22, %v985_v32  ;;  %v386_v39 = vrot.slane %v384_v30, 4  ;;  %v3941_v42 = vld [vmem:[%s4565_s28 + $0x20] sm:$0x1] }
  0x23   : > { %2183 = vrot.lane.b32.xlu0 %v4000_v27, %s4479_s30  ;;  %v389_v40 = vrot.slane %v387_v31, 5  ;;  %v397_v41 = vshrl.u32 %v333_v26, 16  ;;  %v403_v45 = vshll.u32 %v334_v29, 16  ;;  %v3985_v46 = vrot.slane %v3939_v36, 9  ;;  %v335_v47 = vld [vmem:[%s4565_s28 + $0xc] sm:$0xf] }
  0x24   : > { %v992_v43 = vsel %vm4558_vm2, %v990_v34, %v991_v28  ;;  %v395_v44 = vrot.slane %v393_v35, 5  ;;  %1139 = vrot.lane.b32.xlu1 %v3808_v38, %s4480_s4  ;;  %v2032_v51 = vrot.slane %v3940_v37, 5  ;;  %v336_v52 = vld [vmem:[%s4565_s28 + $0x10] sm:$0xf]  ;;  %v2035_v55 = vrot.slane %v3941_v42, 5 }
  0x25   : > { %v3809_v48 = vcombine.low %v989_v33, %v992_v43  ;;  %v390_v49 = vor.u32 %v389_v40, %v386_v39  ;;  %v399_v50 = vrot.slane %v397_v41, 4  ;;  %v405_v54 = vrot.slane %v403_v45, 5  ;;  %v337_v56 = vld [vmem:[%s4565_s28 + $0x14] sm:$0x1]  ;;  %v3875_v63 = vld [vmem:[%s4565_s28 + $0x18] sm:$0xf] }
  0x26   : > { %v408_v57 = vshrl.u32 %v335_v47, 16  ;;  %v411_v58 = vshll.u32 %v335_v47, 16  ;;  %v2033_v61 = vsel %vm4558_vm2, %v3985_v46, %v2032_v51  ;;  %v2034_v62 = vrot.slane %v2032_v51, 4  ;;  %v3876_v5 = vld [vmem:[%s4565_s28 + $0x1c] sm:$0xf] }
  0x27   : > { %v391_v59 = vrot.slane %v390_v49, 4  ;;  %v400_v60 = vor.u32 %v399_v50, %v395_v44  ;;  %v417_v3 = vshll.u32 %v336_v52, 16  ;;  %v421_v4 = vshrl.u32 %v336_v52, 16  ;;  %v3877_v10 = vld [vmem:[%s4565_s28 + $0x20] sm:$0x1] }
  0x28   : > { %v410_v1 = vrot.slane %v408_v57, 4  ;;  %v413_v2 = vrot.slane %v411_v58, 5  ;;  %1141 = vrot.lane.b32.xlu1 %v3809_v48, %s4480_s4  ;;  %v2036_v8 = vsel %vm4558_vm2, %v2034_v62, %v2035_v55  ;;  %v427_v9 = vshll.u32 %v337_v56, 16  ;;  %v3872_v11 = vld [vmem:[%s4565_s28 + $0xc] sm:$0xf] }
  0x29   : > { %v396_v6 = vsel %vm4604_vm5, %v391_v59, %v395_v44  ;;  %v401_v7 = vrot.slane %v400_v60, 4  ;;  %v4001_v12 = vcombine.low %v2033_v61, %v2036_v8  ;;  %v419_v14 = vrot.slane %v417_v3, 5  ;;  %v3873_v28 = vld [vmem:[%s4565_s28 + $0x10] sm:$0xf]  ;;  %v3874_v32 = vld [vmem:[%s4565_s28 + $0x14] sm:$0x1] }
  0x2a   : > { %v414_v13 = vor.u32 %v413_v2, %v410_v1  ;;  %v423_v15 = vrot.slane %v421_v4, 4  ;;  %v429_v17 = vrot.slane %v427_v9, 5  ;;  %v1455_v18 = vshrl.u32 %v3875_v63, 16  ;;  %v4064_v38 = vld [vmem:[%s4565_s28 + $0x18] sm:$0xf] }
  0x2b   : > { %v406_v16 = vsel %vm4604_vm5, %v401_v7, %v405_v54  ;;  %v1458_v19 = vshll.u32 %v3875_v63, 16  ;;  %v1464_v23 = vshll.u32 %v3876_v5, 16  ;;  %v1468_v26 = vshrl.u32 %v3876_v5, 16  ;;  %v4065_v47 = vld [vmem:[%s4565_s28 + $0x1c] sm:$0xf] }
  0x2c   : > { %v3776_v20 = vcombine.low %v396_v6, %v406_v16  ;;  %v415_v21 = vrot.slane %v414_v13, 4  ;;  %v424_v22 = vor.u32 %v423_v15, %v419_v14  ;;  %2185 = vrot.lane.b32.xlu1 %v4001_v12, %s4479_s30  ;;  %v1457_v24 = vrot.slane %v1455_v18, 4  ;;  %v4066_v56 = vld [vmem:[%s4565_s28 + $0x20] sm:$0x1]  ;;  %v4067_v62 = vld [vmem:[%s4565_s28 + $0x24] sm:$0xf] }
  0x2d   : > { %v1460_v25 = vrot.slane %v1458_v19, 5  ;;  %v1474_v27 = vshll.u32 %v3877_v10, 16  ;;  %v1466_v31 = vrot.slane %v1464_v23, 5  ;;  %v1431_v33 = vshrl.u32 %v3872_v11, 16  ;;  %v4068_v4 = vld [vmem:[%s4565_s28 + $0x28] sm:$0xf] }
  0x2e   : > { %815 = vrot.lane.b32.xlu0 %v3776_v20, %s4481_s5  ;;  %v420_v29 = vsel %vm4604_vm5, %v415_v21, %v419_v14  ;;  %v425_v30 = vrot.slane %v424_v22, 4  ;;  %v1470_v35 = vrot.slane %v1468_v26, 4  ;;  %v1434_v37 = vshll.u32 %v3872_v11, 16  ;;  %v4069_v12 = vld [vmem:[%s4565_s28 + $0x2c] sm:$0x1]  ;;  %v4361_v16 = vld [vmem:[%s4565_s28 + $0x24] sm:$0xff]  }
  0x2f   : > { %v1461_v34 = vor.u32 %v1460_v25, %v1457_v24  ;;  %v1476_v36 = vrot.slane %v1474_v27, 5  ;;  %v1433_v40 = vrot.slane %v1431_v33, 4  ;;  %v1440_v41 = vshll.u32 %v3873_v28, 16  ;;  %v4128_v14 = vld [vmem:[%s4565_s28 + $0x18] sm:$0xe] }
  0x30   : > { %v430_v39 = vsel %vm4604_vm5, %v425_v30, %v429_v17  ;;  %v1444_v42 = vshrl.u32 %v3873_v28, 16  ;;  %v1471_v45 = vor.u32 %v1470_v35, %v1466_v31  ;;  %v1436_v46 = vrot.slane %v1434_v37, 5  ;;  %v4129_v20 = vld [vmem:[%s4565_s28 + $0x1c] sm:$0xf]  ;;  %v4130_v26 = vld [vmem:[%s4565_s28 + $0x20] sm:$0x1] }
  0x31   : > { %v3777_v43 = vcombine.low %v420_v29, %v430_v39  ;;  %v1462_v44 = vrot.slane %v1461_v34, 4  ;;  %v1442_v48 = vrot.slane %v1440_v41, 5  ;;  %v1450_v50 = vshll.u32 %v3874_v32, 16  ;;  %v4360_v22 = vld [vmem:[%s4565_s28 + $0x18] sm:$0xff]   ;;  %v4375_v37 = vld [vmem:[%s5951_s1] sm:$0xff]  }
  0x32   : > { %v1446_v49 = vrot.slane %v1444_v42, 4  ;;  %v2475_v51 = vshrl.u32 %v4064_v38, 16  ;;  %v1472_v54 = vrot.slane %v1471_v45, 4  ;;  %v1437_v55 = vor.u32 %v1436_v46, %v1433_v40  ;;  %v340_v42 = vld [vmem:[%s4565_s28 + $0x20] sm:$0x1]  ;;  %4245 = vmatprep.subr.bf16.mxu0 %v4375_v37  ;;  %4293 = vmatprep.subr.bf16.mxu1 %v4375_v37 }
  0x33   : > { %817 = vrot.lane.b32.xlu0 %v3777_v43, %s4481_s5  ;;  %v1467_v52 = vsel %vm4604_vm5, %v1462_v44, %v1466_v31  ;;  %v2478_v57 = vshll.u32 %v4064_v38, 16  ;;  %v1452_v59 = vrot.slane %v1450_v50, 5  ;;  %v2484_v61 = vshll.u32 %v4065_v47, 16  ;;  %v338_v31 = vld [vmem:[%s4565_s28 + $0x18] sm:$0xf]  ;;  %4246 = vmatpush3.bf16.msra.mxu0 %v4375_v37 }
  0x34   : > { %v1447_v58 = vor.u32 %v1446_v49, %v1442_v48  ;;  %v2477_v60 = vrot.slane %v2475_v51, 4  ;;  %v1477_v63 = vsel %vm4604_vm5, %v1472_v54, %v1476_v36  ;;  %v1438_v1 = vrot.slane %v1437_v55, 4  ;;  %v339_v36 = vld [vmem:[%s4565_s28 + $0x1c] sm:$0xf]  ;;  %v4131_v43 = vld [vmem:[%s4565_s28 + $0x24] sm:$0xe]  ;;  %4301 = vmatpush3.bf16.msra.mxu1 %v4375_v37 }
  0x35   : > { %v2480_v2 = vrot.slane %v2478_v57, 5  ;;  %v2488_v3 = vshrl.u32 %v4065_v47, 16  ;;  %v3921_v5 = vcombine.low %v1467_v52, %v1477_v63  ;;  %v2486_v7 = vrot.slane %v2484_v61, 5  ;;  %v4133_v49 = vld [vmem:[%s4565_s28 + $0x2c] sm:$0x1] }
  0x36   : > { %v1448_v6 = vrot.slane %v1447_v58, 4  ;;  %v2494_v8 = vshll.u32 %v4066_v56, 16  ;;  %v1443_v9 = vsel %vm4604_vm5, %v1438_v1, %v1442_v48  ;;  %v2499_v13 = vshrl.u32 %v4067_v62, 16  ;;  %v4132_v48 = vld [vmem:[%s4565_s28 + $0x28] sm:$0xf] }
  0x37   : > { %v2481_v10 = vor.u32 %v2480_v2, %v2477_v60  ;;  %v2490_v11 = vrot.slane %v2488_v3, 4  ;;  %1864 = vrot.lane.b32.xlu1 %v3921_v5, %s4482_s6  ;;  %v2502_v18 = vshll.u32 %v4067_v62, 16  ;;  %v2508_v19 = vshll.u32 %v4068_v4, 16  ;;  %v341_v55 = vld [vmem:[%s4565_s28 + $0x24] sm:$0xf]  ;;  %v4377_v60 = vld [vmem:[%s5951_s1 + $0x8] sm:$0xff]  }
  0x38   : > { %v1453_v15 = vsel %vm4604_vm5, %v1448_v6, %v1452_v59  ;;  %v2496_v17 = vrot.slane %v2494_v8, 5  ;;  %v2501_v25 = vrot.slane %v2499_v13, 4  ;;  %v2512_v29 = vshrl.u32 %v4068_v4, 16  ;;  %4247 = vmatprep.subr.bf16.mxu0 %v4377_v60  ;;  %4294 = vmatprep.subr.bf16.mxu1 %v4377_v60 }
  0x39   : > { %v3920_v21 = vcombine.low %v1443_v9, %v1453_v15  ;;  %v2482_v23 = vrot.slane %v2481_v10, 4  ;;  %v2491_v24 = vor.u32 %v2490_v11, %v2486_v7  ;;  %v2504_v27 = vrot.slane %v2502_v18, 5  ;;  %v342_v10 = vld [vmem:[%s4565_s28 + $0x28] sm:$0xf]  ;;  %4248 = vmatpush3.bf16.msra.mxu0 %v4377_v60  ;;  %4302 = vmatpush3.bf16.msra.mxu1 %v4377_v60 }
  0x3a   : > { %v2510_v28 = vrot.slane %v2508_v19, 5  ;;  %v2518_v30 = vshll.u32 %v4069_v12, 16  ;;  %v4176_v34 = vrot.slane %v4128_v14, 9  ;;  %v3069_v35 = vrot.slane %v4129_v20, 5  ;;  %v343_v14 = vld [vmem:[%s4565_s28 + $0x2c] sm:$0x1] }
  0x3b   : > { %1862 = vrot.lane.b32.xlu0 %v3920_v21, %s4482_s6  ;;  %v2487_v32 = vsel %vm4604_vm5, %v2482_v23, %v2486_v7  ;;  %v2492_v33 = vrot.slane %v2491_v24, 4  ;;  %2363 = vrot.lane.b32.xlu1 %v4361_v16, %s4483_s9  ;;  %v2505_v38 = vor.u32 %v2504_v27, %v2501_v25  ;;  %v2514_v39 = vrot.slane %v2512_v29, 4  ;;  %v886_v16 = vld [vmem:[%s4565_s28 + $0x18] sm:$0xe]  ;;  %v887_v21 = vld [vmem:[%s4565_s28 + $0x1c] sm:$0xf] }
  0x3c   : > { %v2520_v40 = vrot.slane %v2518_v30, 5  ;;  %v3072_v41 = vrot.slane %v4130_v26, 5  ;;  %v4666_v45 = vsel %vm4558_vm2, %v4176_v34, %v3069_v35  ;;  %v3071_v46 = vrot.slane %v3069_v35, 4  ;;  %v888_v27 = vld [vmem:[%s4565_s28 + $0x20] sm:$0x1] }
  0x3d   : > { %v2497_v44 = vsel %vm4604_vm5, %v2492_v33, %v2496_v17  ;;  %v432_v47 = vshrl.u32 %v338_v31, 16  ;;  %v2506_v51 = vrot.slane %v2505_v38, 4  ;;  %v2515_v52 = vor.u32 %v2514_v39, %v2510_v28  ;;  %v890_v33 = vld [vmem:[%s4565_s28 + $0x28] sm:$0xf]  ;;  %v891_v38 = vld [vmem:[%s4565_s28 + $0x2c] sm:$0x1] }
  0x3e   : > { %v4112_v50 = vcombine.low %v2487_v32, %v2497_v44  ;;  %v435_v54 = vshll.u32 %v338_v31, 16  ;;  %v3073_v56 = vsel %vm4558_vm2, %v3071_v46, %v3072_v41  ;;  %v441_v58 = vshll.u32 %v339_v36, 16  ;;  %v889_v32 = vld [vmem:[%s4565_s28 + $0x24] sm:$0xe]  ;;  %v3879_v44 = vld [vmem:[%s4565_s28 + $0x28] sm:$0xf] }
  0x3f   : > { %2361 = vrot.lane.b32.xlu0 %v4360_v22, %s4483_s9  ;;  %v434_v57 = vrot.slane %v432_v47, 4  ;;  %v445_v59 = vshrl.u32 %v339_v36, 16  ;;  %v2511_v61 = vsel %vm4604_vm5, %v2506_v51, %v2510_v28  ;;  %v2516_v62 = vrot.slane %v2515_v52, 4  ;;  %v4378_v22 = vld [vmem:[%s5951_s1 + $0x10] sm:$0xff]   ;;  %v3878_v39 = vld [vmem:[%s4565_s28 + $0x24] sm:$0xf] }
  0x40   : > { %v4192_v63 = vcombine.low %v4666_v45, %v3073_v56  ;;  %v437_v1 = vrot.slane %v435_v54, 5  ;;  %v443_v2 = vrot.slane %v441_v58, 5  ;;  %v451_v4 = vshll.u32 %v340_v42, 16  ;;  %4249 = vmatprep.subr.bf16.mxu0 %v4378_v22  ;;  %4295 = vmatprep.subr.bf16.mxu1 %v4378_v22 }
  0x41   : > { %v447_v3 = vrot.slane %v445_v59, 4  ;;  %v4177_v5 = vrot.slane %v4131_v43, 9  ;;  %v2521_v6 = vsel %vm4604_vm5, %v2516_v62, %v2520_v40  ;;  %v3076_v8 = vrot.slane %v4132_v48, 5  ;;  %4250 = vmatpush3.bf16.msra.mxu0 %v4378_v22  ;;  %4303 = vmatpush3.bf16.msra.mxu1 %v4378_v22  ;;  %v3880_v62 = vld [vmem:[%s4565_s28 + $0x2c] sm:$0x1] }
  0x42   : > { %v438_v7 = vor.u32 %v437_v1, %v434_v57  ;;  %v3079_v9 = vrot.slane %v4133_v49, 5  ;;  %v4113_v11 = vcombine.low %v2511_v61, %v2521_v6  ;;  %v453_v13 = vrot.slane %v451_v4, 5  ;;  %v4379_v49 = vld [vmem:[%s5951_s1 + $0x18] sm:$0xff]   ;;  %v3882_v6 = vld [vmem:[%s4565_s28 + $0x34] sm:$0xf] }
  0x43   : > { %2906 = vrot.lane.b32.xlu0 %v4112_v50, %s4484_s17  ;;  %v448_v12 = vor.u32 %v447_v3, %v443_v2  ;;  %v456_v15 = vshrl.u32 %v341_v55, 16  ;;  %v3077_v18 = vsel %vm4558_vm2, %v4177_v5, %v3076_v8  ;;  %v3078_v19 = vrot.slane %v3076_v8, 4  ;;  %4251 = vmatprep.subr.bf16.mxu0 %v4379_v49  ;;  %v3881_v5 = vld [vmem:[%s4565_s28 + $0x30] sm:$0xf] }
  0x44   : > { %v439_v17 = vrot.slane %v438_v7, 4  ;;  %v459_v20 = vshll.u32 %v341_v55, 16  ;;  %2908 = vrot.lane.b32.xlu1 %v4113_v11, %s4484_s17  ;;  %v465_v25 = vshll.u32 %v342_v10, 16  ;;  %v469_v26 = vshrl.u32 %v342_v10, 16  ;;  %4296 = vmatprep.subr.bf16.mxu1 %v4379_v49  ;;  %v4362_v10 = vld [vmem:[%s4565_s28 + $0x24] sm:$0xff]  }
  0x45   : > { %v449_v23 = vrot.slane %v448_v12, 4  ;;  %v458_v24 = vrot.slane %v456_v15, 4  ;;  %v3080_v29 = vsel %vm4558_vm2, %v3078_v19, %v3079_v9  ;;  %v475_v31 = vshll.u32 %v343_v14, 16  ;;  %4252 = vmatpush3.bf16.msra.mxu0 %v4379_v49  ;;  %4304 = vmatpush3.bf16.msra.mxu1 %v4379_v49  ;;  %v3883_v12 = vld [vmem:[%s4565_s28 + $0x38] sm:$0x1] }
  0x46   : > { %v444_v28 = vsel %vm4604_vm5, %v439_v17, %v443_v2  ;;  %v461_v30 = vrot.slane %v459_v20, 5  ;;  %v4193_v35 = vcombine.low %v3077_v18, %v3080_v29  ;;  %v467_v36 = vrot.slane %v465_v25, 5  ;;  %v3943_v18 = vld [vmem:[%s4565_s28 + $0x28] sm:$0xf]  ;;  %v3944_v19 = vld [vmem:[%s4565_s28 + $0x2c] sm:$0x1] }
  0x47   : > { %3227 = vrot.lane.b32.xlu0 %v4192_v63, %s4485_s24  ;;  %v454_v34 = vsel %vm4604_vm5, %v449_v23, %v453_v13  ;;  %v471_v37 = vrot.slane %v469_v26, 4  ;;  %v477_v42 = vrot.slane %v475_v31, 5  ;;  %v3794_v43 = vrot.slane %v886_v16, 9  ;;  %v3942_v13 = vld [vmem:[%s4565_s28 + $0x24] sm:$0xe] }
  0x48   : > { %v3778_v40 = vcombine.low %v444_v28, %v454_v34  ;;  %v462_v41 = vor.u32 %v461_v30, %v458_v24  ;;  %v995_v46 = vrot.slane %v887_v21, 5  ;;  %v998_v47 = vrot.slane %v888_v27, 5  ;;  %v3945_v24 = vld [vmem:[%s4565_s28 + $0x30] sm:$0xe]  ;;  %v3946_v29 = vld [vmem:[%s4565_s28 + $0x34] sm:$0xf] }
  0x49   : > { %v472_v45 = vor.u32 %v471_v37, %v467_v36  ;;  %v3795_v48 = vrot.slane %v889_v32, 9  ;;  %v1002_v51 = vrot.slane %v890_v33, 5  ;;  %v1005_v52 = vrot.slane %v891_v38, 5  ;;  %v3947_v34 = vld [vmem:[%s4565_s28 + $0x38] sm:$0x1] }
  0x4a   : > { %819 = vrot.lane.b32.xlu1 %v3778_v40, %s4481_s5  ;;  %v463_v50 = vrot.slane %v462_v41, 4  ;;  %v1479_v54 = vshrl.u32 %v3878_v39, 16  ;;  %v996_v56 = vsel %vm4558_vm2, %v3794_v43, %v995_v46  ;;  %v997_v57 = vrot.slane %v995_v46, 4  ;;  %v4383_v40 = vld [vmem:[%s5951_s1 + $0x28] sm:$0xff]   ;;  %v4363_v41 = vld [vmem:[%s4565_s28 + $0x30] sm:$0xff]  }
  0x4b   : > { %3229 = vrot.lane.b32.xlu0 %v4193_v35, %s4485_s24  ;;  %v473_v55 = vrot.slane %v472_v45, 4  ;;  %v1482_v58 = vshll.u32 %v3878_v39, 16  ;;  %v1003_v60 = vsel %vm4558_vm2, %v3795_v48, %v1002_v51  ;;  %v1004_v61 = vrot.slane %v1002_v51, 4  ;;  %v4382_v35 = vld [vmem:[%s5951_s1 + $0x20] sm:$0xff]  }
  0x4c   : > { %v468_v59 = vsel %vm4604_vm5, %v463_v50, %v467_v36  ;;  %v1481_v63 = vrot.slane %v1479_v54, 4  ;;  %v999_v2 = vsel %vm4558_vm2, %v997_v57, %v998_v47  ;;  %v1488_v4 = vshll.u32 %v3879_v44, 16  ;;  %v4070_v50 = vld [vmem:[%s4565_s28 + $0x30] sm:$0xf]  ;;  %4253 = vmatprep.subr.bf16.mxu0 %v4382_v35  ;;  %4297 = vmatprep.subr.bf16.mxu1 %v4382_v35 }
  0x4d   : > { %v478_v1 = vsel %vm4604_vm5, %v473_v55, %v477_v42  ;;  %v1484_v3 = vrot.slane %v1482_v58, 5  ;;  %v3810_v8 = vcombine.low %v996_v56, %v999_v2  ;;  %v1006_v9 = vsel %vm4558_vm2, %v1004_v61, %v1005_v52  ;;  %v4071_v56 = vld [vmem:[%s4565_s28 + $0x34] sm:$0xf]  ;;  %4254 = vmatpush3.bf16.msra.mxu0 %v4382_v35  ;;  %4305 = vmatpush3.bf16.msra.mxu1 %v4382_v35 }
  0x4e   : > { %v3779_v7 = vcombine.low %v468_v59, %v478_v1  ;;  %v1492_v11 = vshrl.u32 %v3879_v44, 16  ;;  %v3811_v14 = vcombine.low %v1003_v60, %v1006_v9  ;;  %v1490_v16 = vrot.slane %v1488_v4, 5  ;;  %4255 = vmatprep.subr.bf16.mxu0 %v4383_v40  ;;  %v4385_v61 = vld [vmem:[%s5951_s1 + $0x30] sm:$0xff]   ;;  %4298 = vmatprep.subr.bf16.mxu1 %v4383_v40  ;;  %v4072_v1 = vld [vmem:[%s4565_s28 + $0x38] sm:$0x1] }
  0x4f   : > { %v1485_v15 = vor.u32 %v1484_v3, %v1481_v63  ;;  %v1498_v17 = vshll.u32 %v3880_v62, 16  ;;  %1143 = vrot.lane.b32.xlu0 %v3810_v8, %s4480_s4  ;;  %v1503_v21 = vshrl.u32 %v3881_v5, 16  ;;  %v1506_v22 = vshll.u32 %v3881_v5, 16  ;;  %v4073_v4 = vld [vmem:[%s4565_s28 + $0x3c] sm:$0xf] }
  0x50   : > { %821 = vrot.lane.b32.xlu1 %v3779_v7, %s4481_s5  ;;  %v1494_v20 = vrot.slane %v1492_v11, 4  ;;  %v1512_v23 = vshll.u32 %v3882_v6, 16  ;;  %v1516_v27 = vshrl.u32 %v3882_v6, 16  ;;  %v1522_v28 = vshll.u32 %v3883_v12, 16  ;;  %v4074_v9 = vld [vmem:[%s4565_s28 + $0x40] sm:$0xf] }
  0x51   : > { %v1486_v25 = vrot.slane %v1485_v15, 4  ;;  %v1500_v26 = vrot.slane %v1498_v17, 5  ;;  %v1505_v31 = vrot.slane %v1503_v21, 4  ;;  %v1508_v32 = vrot.slane %v1506_v22, 5  ;;  %v4134_v15 = vld [vmem:[%s4565_s28 + $0x30] sm:$0xe]  ;;  %4256 = vmatpush3.bf16.msra.mxu0 %v4383_v40  ;;  %4306 = vmatpush3.bf16.msra.mxu1 %v4383_v40 }
  0x52   : > { %v1495_v30 = vor.u32 %v1494_v20, %v1490_v16  ;;  %v1514_v33 = vrot.slane %v1512_v23, 5  ;;  %v1518_v37 = vrot.slane %v1516_v27, 4  ;;  %v1524_v38 = vrot.slane %v1522_v28, 5  ;;  %v4136_v21 = vld [vmem:[%s4565_s28 + $0x38] sm:$0x1]  ;;  %4257 = vmatprep.subr.bf16.mxu0 %v4385_v61  ;;  %4299 = vmatprep.subr.bf16.mxu1 %v4385_v61  ;;  %v4364_v22 = vld [vmem:[%s4565_s28 + $0x30] sm:$0xff]  }
  0x53   : > { %v1491_v36 = vsel %vm4604_vm5, %v1486_v25, %v1490_v16  ;;  %v3986_v39 = vrot.slane %v3942_v13, 9  ;;  %1321 = vrot.lane.b32.xlu0 %v4362_v10, %s4478_s29  ;;  %v1509_v43 = vor.u32 %v1508_v32, %v1505_v31  ;;  %v2039_v44 = vrot.slane %v3943_v18, 5  ;;  %v4075_v10 = vld [vmem:[%s4565_s28 + $0x44] sm:$0x1]  ;;  %v4135_v16 = vld [vmem:[%s4565_s28 + $0x34] sm:$0xf] }
  0x54   : > { %1145 = vrot.lane.b32.xlu1 %v3811_v14, %s4480_s4  ;;  %v1496_v42 = vrot.slane %v1495_v30, 4  ;;  %v2042_v45 = vrot.slane %v3944_v19, 5  ;;  %v1519_v46 = vor.u32 %v1518_v37, %v1514_v33  ;;  %v3987_v47 = vrot.slane %v3945_v24, 9  ;;  %v344_v27 = vld [vmem:[%s4565_s28 + $0x30] sm:$0xf] }
  0x55   : > { %v2046_v48 = vrot.slane %v3946_v29, 5  ;;  %v2049_v49 = vrot.slane %v3947_v34, 5  ;;  %v1510_v52 = vrot.slane %v1509_v43, 4  ;;  %v2040_v54 = vsel %vm4558_vm2, %v3986_v39, %v2039_v44  ;;  %4258 = vmatpush3.bf16.msra.mxu0 %v4385_v61  ;;  %4307 = vmatpush3.bf16.msra.mxu1 %v4385_v61  ;;  %v345_v40 = vld [vmem:[%s4565_s28 + $0x34] sm:$0xf] }
  0x56   : > { %v1501_v51 = vsel %vm4604_vm5, %v1496_v42, %v1500_v26  ;;  %v2041_v55 = vrot.slane %v2039_v44, 4  ;;  %v1520_v58 = vrot.slane %v1519_v46, 4  ;;  %v2523_v2 = vshrl.u32 %v4070_v50, 16  ;;  %v4389_v46 = vld [vmem:[%s5951_s1 + $0x38] sm:$0xff]  }
  0x57   : > { %v3922_v57 = vcombine.low %v1491_v36, %v1501_v51  ;;  %v2047_v59 = vsel %vm4558_vm2, %v3987_v47, %v2046_v48  ;;  %v2048_v60 = vrot.slane %v2046_v48, 4  ;;  %v1515_v62 = vsel %vm4604_vm5, %v1510_v52, %v1514_v33  ;;  %4259 = vmatprep.subr.bf16.mxu0 %v4389_v46  ;;  %4300 = vmatprep.subr.bf16.mxu1 %v4389_v46 }
  0x58   : > { %1323 = vrot.lane.b32.xlu1 %v4363_v41, %s4478_s29  ;;  %v2043_v63 = vsel %vm4558_vm2, %v2041_v55, %v2042_v45  ;;  %v2526_v3 = vshll.u32 %v4070_v50, 16  ;;  %v1525_v5 = vsel %vm4604_vm5, %v1520_v58, %v1524_v38  ;;  %v2532_v8 = vshll.u32 %v4071_v56, 16  ;;  %v4365_v41 = vld [vmem:[%s4565_s28 + $0x3c] sm:$0xff]   ;;  %v346_v50 = vld [vmem:[%s4565_s28 + $0x38] sm:$0x1] }
  0x59   : > { %1866 = vrot.lane.b32.xlu0 %v3922_v57, %s4482_s6  ;;  %v4002_v6 = vcombine.low %v2040_v54, %v2043_v63  ;;  %v2050_v7 = vsel %vm4558_vm2, %v2048_v60, %v2049_v49  ;;  %v3923_v11 = vcombine.low %v1515_v62, %v1525_v5  ;;  %v2525_v13 = vrot.slane %v2523_v2, 4  ;;  %v4137_v57 = vld [vmem:[%s4565_s28 + $0x3c] sm:$0xe]  ;;  %v4138_v62 = vld [vmem:[%s4565_s28 + $0x40] sm:$0xf]  ;;  %4260 = vmatpush3.bf16.msra.mxu0 %v4389_v46 }
  0x5a   : > { %v4003_v12 = vcombine.low %v2047_v59, %v2050_v7  ;;  %v2528_v14 = vrot.slane %v2526_v3, 5  ;;  %v2534_v17 = vrot.slane %v2532_v8, 5  ;;  %v2536_v18 = vshrl.u32 %v4071_v56, 16  ;;  %v4139_v63 = vld [vmem:[%s4565_s28 + $0x44] sm:$0x1]  ;;  %4308 = vmatpush3.bf16.msra.mxu1 %v4389_v46 }
  0x5b   : > { %v2542_v19 = vshll.u32 %v4072_v1, 16  ;;  %v2547_v20 = vshrl.u32 %v4073_v4, 16  ;;  %v2550_v24 = vshll.u32 %v4073_v4, 16  ;;  %v2556_v25 = vshll.u32 %v4074_v9, 16  ;;  %v347_v5 = vld [vmem:[%s4565_s28 + $0x3c] sm:$0xf] }
  0x5c   : > { %1868 = vrot.lane.b32.xlu1 %v3923_v11, %s4482_s6  ;;  %v2529_v23 = vor.u32 %v2528_v14, %v2525_v13  ;;  %v2560_v26 = vshrl.u32 %v4074_v9, 16  ;;  %v2538_v28 = vrot.slane %v2536_v18, 4  ;;  %v2566_v31 = vshll.u32 %v4075_v10, 16  ;;  %v348_v10 = vld [vmem:[%s4565_s28 + $0x40] sm:$0xf] }
  0x5d   : > { %2187 = vrot.lane.b32.xlu0 %v4002_v6, %s4479_s30  ;;  %v2544_v29 = vrot.slane %v2542_v19, 5  ;;  %v2549_v30 = vrot.slane %v2547_v20, 4  ;;  %v2552_v33 = vrot.slane %v2550_v24, 5  ;;  %v2558_v34 = vrot.slane %v2556_v25, 5  ;;  %v892_v20 = vld [vmem:[%s4565_s28 + $0x30] sm:$0xe] }
  0x5e   : > { %v2530_v32 = vrot.slane %v2529_v23, 4  ;;  %v2562_v35 = vrot.slane %v2560_v26, 4  ;;  %v2539_v36 = vor.u32 %v2538_v28, %v2534_v17  ;;  %v2568_v37 = vrot.slane %v2566_v31, 5  ;;  %v893_v25 = vld [vmem:[%s4565_s28 + $0x34] sm:$0xf] }
  0x5f   : > { %v4178_v38 = vrot.slane %v4134_v15, 9  ;;  %v3083_v39 = vrot.slane %v4135_v16, 5  ;;  %v2553_v43 = vor.u32 %v2552_v33, %v2549_v30  ;;  %v3086_v45 = vrot.slane %v4136_v21, 5  ;;  %v349_v15 = vld [vmem:[%s4565_s28 + $0x44] sm:$0x1] }
  0x60   : > { %2189 = vrot.lane.b32.xlu1 %v4003_v12, %s4479_s30  ;;  %v2535_v42 = vsel %vm4604_vm5, %v2530_v32, %v2534_v17  ;;  %v2563_v44 = vor.u32 %v2562_v35, %v2558_v34  ;;  %v2540_v47 = vrot.slane %v2539_v36, 4  ;;  %v480_v51 = vshrl.u32 %v344_v27, 16  ;;  %v894_v26 = vld [vmem:[%s4565_s28 + $0x38] sm:$0x1]  ;;  %v895_v35 = vld [vmem:[%s4565_s28 + $0x3c] sm:$0xe] }
  0x61   : > { %2365 = vrot.lane.b32.xlu0 %v4364_v22, %s4483_s9  ;;  %v3084_v48 = vsel %vm4558_vm2, %v4178_v38, %v3083_v39  ;;  %v3085_v49 = vrot.slane %v3083_v39, 4  ;;  %v2554_v52 = vrot.slane %v2553_v43, 4  ;;  %v483_v55 = vshll.u32 %v344_v27, 16 }
  0x62   : > { %v2564_v54 = vrot.slane %v2563_v44, 4  ;;  %v489_v56 = vshll.u32 %v345_v40, 16  ;;  %v2545_v58 = vsel %vm4604_vm5, %v2540_v47, %v2544_v29  ;;  %v482_v60 = vrot.slane %v480_v51, 4 }
  0x63   : > { %v3087_v59 = vsel %vm4558_vm2, %v3085_v49, %v3086_v45  ;;  %v493_v61 = vshrl.u32 %v345_v40, 16  ;;  %v4114_v1 = vcombine.low %v2535_v42, %v2545_v58  ;;  %v2559_v2 = vsel %vm4604_vm5, %v2554_v52, %v2558_v34  ;;  %v896_v40 = vld [vmem:[%s4565_s28 + $0x40] sm:$0xf]  ;;  %v3884_v42 = vld [vmem:[%s4565_s28 + $0x3c] sm:$0xf] }
  0x64   : > { %2367 = vrot.lane.b32.xlu1 %v4365_v41, %s4483_s9  ;;  %v2569_v3 = vsel %vm4604_vm5, %v2564_v54, %v2568_v37  ;;  %v4194_v4 = vcombine.low %v3084_v48, %v3087_v59  ;;  %v485_v7 = vrot.slane %v483_v55, 5  ;;  %v491_v8 = vrot.slane %v489_v56, 5  ;;  %v897_v41 = vld [vmem:[%s4565_s28 + $0x44] sm:$0x1]  ;;  %v3885_v55 = vld [vmem:[%s4565_s28 + $0x40] sm:$0xf] }
  0x65   : > { %v4115_v6 = vcombine.low %v2559_v2, %v2569_v3  ;;  %v495_v9 = vrot.slane %v493_v61, 4  ;;  %2910 = vrot.lane.b32.xlu0 %v4114_v1, %s4484_s17  ;;  %v499_v11 = vshll.u32 %v346_v50, 16  ;;  %v4179_v12 = vrot.slane %v4137_v57, 9  ;;  %v3887_v3 = vld [vmem:[%s4565_s28 + $0x48] sm:$0xf] }
  0x66   : > { %v3090_v13 = vrot.slane %v4138_v62, 5  ;;  %v3093_v14 = vrot.slane %v4139_v63, 5  ;;  %v486_v16 = vor.u32 %v485_v7, %v482_v60  ;;  %v504_v18 = vshrl.u32 %v347_v5, 16  ;;  %v3886_v60 = vld [vmem:[%s4565_s28 + $0x44] sm:$0x1] }
  0x67   : > { %v496_v17 = vor.u32 %v495_v9, %v491_v8  ;;  %v507_v19 = vshll.u32 %v347_v5, 16  ;;  %v501_v21 = vrot.slane %v499_v11, 5  ;;  %v513_v24 = vshll.u32 %v348_v10, 16 }
  0x68   : > { %2912 = vrot.lane.b32.xlu1 %v4115_v6, %s4484_s17  ;;  %v3091_v22 = vsel %vm4558_vm2, %v4179_v12, %v3090_v13  ;;  %v3092_v23 = vrot.slane %v3090_v13, 4  ;;  %v487_v27 = vrot.slane %v486_v16, 4  ;;  %v506_v29 = vrot.slane %v504_v18, 4  ;;  %v3889_v13 = vld [vmem:[%s4565_s28 + $0x50] sm:$0x1] }
  0x69   : > { %v497_v28 = vrot.slane %v496_v17, 4  ;;  %v509_v30 = vrot.slane %v507_v19, 5  ;;  %3231 = vrot.lane.b32.xlu0 %v4194_v4, %s4485_s24  ;;  %v515_v32 = vrot.slane %v513_v24, 5  ;;  %v517_v33 = vshrl.u32 %v348_v10, 16  ;;  %v4366_v17 = vld [vmem:[%s4565_s28 + $0x3c] sm:$0xff]  }
  0x6a   : > { %v3094_v31 = vsel %vm4558_vm2, %v3092_v23, %v3093_v14  ;;  %v523_v34 = vshll.u32 %v349_v15, 16  ;;  %v492_v36 = vsel %vm4604_vm5, %v487_v27, %v491_v8  ;;  %v3796_v46 = vrot.slane %v892_v20, 9  ;;  %v3888_v8 = vld [vmem:[%s4565_s28 + $0x4c] sm:$0xf]  ;;  %v3948_v14 = vld [vmem:[%s4565_s28 + $0x3c] sm:$0xe] }
  0x6b   : > { %v502_v37 = vsel %vm4604_vm5, %v497_v28, %v501_v21  ;;  %v4195_v38 = vcombine.low %v3091_v22, %v3094_v31  ;;  %v510_v39 = vor.u32 %v509_v30, %v506_v29  ;;  %v519_v44 = vrot.slane %v517_v33, 4  ;;  %v3949_v20 = vld [vmem:[%s4565_s28 + $0x40] sm:$0xf]  ;;  %v3950_v21 = vld [vmem:[%s4565_s28 + $0x44] sm:$0x1] }
  0x6c   : > { %v3780_v43 = vcombine.low %v492_v36, %v502_v37  ;;  %v525_v45 = vrot.slane %v523_v34, 5  ;;  %v1009_v48 = vrot.slane %v893_v25, 5  ;;  %v1012_v49 = vrot.slane %v894_v26, 5  ;;  %v3951_v26 = vld [vmem:[%s4565_s28 + $0x48] sm:$0xe] }
  0x6d   : > { %v511_v47 = vrot.slane %v510_v39, 4  ;;  %v3797_v50 = vrot.slane %v895_v35, 9  ;;  %3233 = vrot.lane.b32.xlu0 %v4195_v38, %s4485_s24  ;;  %v520_v51 = vor.u32 %v519_v44, %v515_v32  ;;  %v1016_v52 = vrot.slane %v896_v40, 5  ;;  %v3952_v31 = vld [vmem:[%s4565_s28 + $0x4c] sm:$0xf] }
  0x6e   : > { %823 = vrot.lane.b32.xlu1 %v3780_v43, %s4481_s5  ;;  %v1019_v54 = vrot.slane %v897_v41, 5  ;;  %v1527_v56 = vshrl.u32 %v3884_v42, 16  ;;  %v1010_v58 = vsel %vm4558_vm2, %v3796_v46, %v1009_v48  ;;  %v1011_v59 = vrot.slane %v1009_v48, 4  ;;  %v3953_v36 = vld [vmem:[%s4565_s28 + $0x50] sm:$0x1] }
  0x6f   : > { %v516_v57 = vsel %vm4604_vm5, %v511_v47, %v515_v32  ;;  %v1530_v61 = vshll.u32 %v3884_v42, 16  ;;  %v521_v62 = vrot.slane %v520_v51, 4  ;;  %v1017_v63 = vsel %vm4558_vm2, %v3797_v50, %v1016_v52  ;;  %v4076_v50 = vld [vmem:[%s4565_s28 + $0x48] sm:$0xf] }
  0x70   : > { %v1018_v1 = vrot.slane %v1016_v52, 4  ;;  %v1529_v2 = vrot.slane %v1527_v56, 4  ;;  %v1013_v4 = vsel %vm4558_vm2, %v1011_v59, %v1012_v49  ;;  %v1536_v6 = vshll.u32 %v3885_v55, 16  ;;  %v4077_v56 = vld [vmem:[%s4565_s28 + $0x4c] sm:$0xf] }
  0x71   : > { %v1532_v5 = vrot.slane %v1530_v61, 5  ;;  %v1540_v7 = vshrl.u32 %v3885_v55, 16  ;;  %v526_v9 = vsel %vm4604_vm5, %v521_v62, %v525_v45  ;;  %v3812_v10 = vcombine.low %v1010_v58, %v1013_v4  ;;  %v4367_v45 = vld [vmem:[%s4565_s28 + $0x48] sm:$0xff]   ;;  %v4079_v62 = vld [vmem:[%s4565_s28 + $0x54] sm:$0xf] }
  0x72   : > { %v1020_v11 = vsel %vm4558_vm2, %v1018_v1, %v1019_v54  ;;  %v1546_v12 = vshll.u32 %v3886_v60, 16  ;;  %v3781_v15 = vcombine.low %v516_v57, %v526_v9  ;;  %v1538_v19 = vrot.slane %v1536_v6, 5  ;;  %v4078_v57 = vld [vmem:[%s4565_s28 + $0x50] sm:$0x1] }
  0x73   : > { %v3813_v16 = vcombine.low %v1017_v63, %v1020_v11  ;;  %v1533_v18 = vor.u32 %v1532_v5, %v1529_v2  ;;  %1147 = vrot.lane.b32.xlu0 %v3812_v10, %s4480_s4  ;;  %v1542_v22 = vrot.slane %v1540_v7, 4  ;;  %v1551_v24 = vshrl.u32 %v3887_v3, 16 }
  0x74   : > { %v1548_v23 = vrot.slane %v1546_v12, 5  ;;  %v1554_v25 = vshll.u32 %v3887_v3, 16  ;;  %825 = vrot.lane.b32.xlu1 %v3781_v15, %s4481_s5  ;;  %v1560_v28 = vshll.u32 %v3888_v8, 16  ;;  %v1564_v29 = vshrl.u32 %v3888_v8, 16  ;;  %v4080_v8 = vld [vmem:[%s4565_s28 + $0x58] sm:$0xf] }
  0x75   : > { %v1534_v27 = vrot.slane %v1533_v18, 4  ;;  %v1570_v30 = vshll.u32 %v3889_v13, 16  ;;  %v1543_v32 = vor.u32 %v1542_v22, %v1538_v19  ;;  %v1553_v33 = vrot.slane %v1551_v24, 4  ;;  %v4081_v13 = vld [vmem:[%s4565_s28 + $0x5c] sm:$0x1] }
  0x76   : > { %v1556_v34 = vrot.slane %v1554_v25, 5  ;;  %v3988_v35 = vrot.slane %v3948_v14, 9  ;;  %v1562_v38 = vrot.slane %v1560_v28, 5  ;;  %v1566_v39 = vrot.slane %v1564_v29, 4  ;;  %v4140_v18 = vld [vmem:[%s4565_s28 + $0x48] sm:$0xe] }
  0x77   : > { %v1539_v37 = vsel %vm4604_vm5, %v1534_v27, %v1538_v19  ;;  %v1572_v40 = vrot.slane %v1570_v30, 5  ;;  %1325 = vrot.lane.b32.xlu0 %v4366_v17, %s4478_s29  ;;  %v1544_v41 = vrot.slane %v1543_v32, 4  ;;  %v2053_v43 = vrot.slane %v3949_v20, 5  ;;  %v4368_v19 = vld [vmem:[%s4565_s28 + $0x48] sm:$0xff]   ;;  %v4142_v29 = vld [vmem:[%s4565_s28 + $0x50] sm:$0x1] }
  0x78   : > { %v1557_v42 = vor.u32 %v1556_v34, %v1553_v33  ;;  %v2056_v44 = vrot.slane %v3950_v21, 5  ;;  %1149 = vrot.lane.b32.xlu1 %v3813_v16, %s4480_s4  ;;  %v1567_v46 = vor.u32 %v1566_v39, %v1562_v38  ;;  %v3989_v47 = vrot.slane %v3951_v26, 9  ;;  %v4141_v24 = vld [vmem:[%s4565_s28 + $0x4c] sm:$0xf]  ;;  %v350_v34 = vld [vmem:[%s4565_s28 + $0x48] sm:$0xf] }
  0x79   : > { %v2060_v48 = vrot.slane %v3952_v31, 5  ;;  %v2063_v49 = vrot.slane %v3953_v36, 5  ;;  %v1549_v51 = vsel %vm4604_vm5, %v1544_v41, %v1548_v23  ;;  %v2054_v54 = vsel %vm4558_vm2, %v3988_v35, %v2053_v43  ;;  %v351_v39 = vld [vmem:[%s4565_s28 + $0x4c] sm:$0xf] }
  0x7a   : > { %v1558_v52 = vrot.slane %v1557_v42, 4  ;;  %v2055_v55 = vrot.slane %v2053_v43, 4  ;;  %v3924_v58 = vcombine.low %v1539_v37, %v1549_v51  ;;  %v1568_v59 = vrot.slane %v1567_v46, 4  ;;  %v4144_v51 = vld [vmem:[%s4565_s28 + $0x58] sm:$0xf] }
  0x7b   : > { %v2061_v60 = vsel %vm4558_vm2, %v3989_v47, %v2060_v48  ;;  %v2062_v61 = vrot.slane %v2060_v48, 4  ;;  %v2571_v2 = vshrl.u32 %v4076_v50, 16  ;;  %v2574_v3 = vshll.u32 %v4076_v50, 16  ;;  %v352_v48 = vld [vmem:[%s4565_s28 + $0x50] sm:$0x1] }
  0x7c   : > { %v1563_v63 = vsel %vm4604_vm5, %v1558_v52, %v1562_v38  ;;  %v2057_v1 = vsel %vm4558_vm2, %v2055_v55, %v2056_v44  ;;  %1327 = vrot.lane.b32.xlu1 %v4367_v45, %s4478_s29  ;;  %1870 = vrot.lane.b32.xlu0 %v3924_v58, %s4482_s6  ;;  %v1573_v4 = vsel %vm4604_vm5, %v1568_v59, %v1572_v40  ;;  %v2580_v7 = vshll.u32 %v4077_v56, 16  ;;  %v4369_v44 = vld [vmem:[%s4565_s28 + $0x54] sm:$0xff]  }
  0x7d   : > { %v4004_v5 = vcombine.low %v2054_v54, %v2057_v1  ;;  %v2064_v6 = vsel %vm4558_vm2, %v2062_v61, %v2063_v49  ;;  %v3925_v9 = vcombine.low %v1563_v63, %v1573_v4  ;;  %v2573_v11 = vrot.slane %v2571_v2, 4  ;;  %v4143_v50 = vld [vmem:[%s4565_s28 + $0x54] sm:$0xe] }
  0x7e   : > { %v4005_v10 = vcombine.low %v2061_v60, %v2064_v6  ;;  %v2576_v12 = vrot.slane %v2574_v3, 5  ;;  %v2582_v14 = vrot.slane %v2580_v7, 5  ;;  %v2584_v15 = vshrl.u32 %v4077_v56, 16  ;;  %v353_v3 = vld [vmem:[%s4565_s28 + $0x54] sm:$0xf] }
  0x7f   : > { %v2590_v16 = vshll.u32 %v4078_v57, 16  ;;  %v2595_v17 = vshrl.u32 %v4079_v62, 16  ;;  %v2598_v21 = vshll.u32 %v4079_v62, 16  ;;  %v2604_v22 = vshll.u32 %v4080_v8, 16  ;;  %v4145_v57 = vld [vmem:[%s4565_s28 + $0x5c] sm:$0x1] }
  0x80   : > { %v2577_v20 = vor.u32 %v2576_v12, %v2573_v11  ;;  %v2608_v23 = vshrl.u32 %v4080_v8, 16  ;;  %1872 = vrot.lane.b32.xlu1 %v3925_v9, %s4482_s6  ;;  %2191 = vrot.lane.b32.xlu0 %v4004_v5, %s4479_s30  ;;  %v2586_v25 = vrot.slane %v2584_v15, 4  ;;  %v2614_v28 = vshll.u32 %v4081_v13, 16  ;;  %v354_v8 = vld [vmem:[%s4565_s28 + $0x58] sm:$0xf] }
  0x81   : > { %v2592_v26 = vrot.slane %v2590_v16, 5  ;;  %v2597_v27 = vrot.slane %v2595_v17, 4  ;;  %v2600_v31 = vrot.slane %v2598_v21, 5  ;;  %v2606_v32 = vrot.slane %v2604_v22, 5  ;;  %v355_v15 = vld [vmem:[%s4565_s28 + $0x5c] sm:$0x1] }
  0x82   : > { %v2578_v30 = vrot.slane %v2577_v20, 4  ;;  %v2610_v33 = vrot.slane %v2608_v23, 4  ;;  %v2587_v35 = vor.u32 %v2586_v25, %v2582_v14  ;;  %v2616_v36 = vrot.slane %v2614_v28, 5  ;;  %v899_v23 = vld [vmem:[%s4565_s28 + $0x4c] sm:$0xf] }
  0x83   : > { %v4180_v37 = vrot.slane %v4140_v18, 9  ;;  %v3097_v38 = vrot.slane %v4141_v24, 5  ;;  %v2601_v41 = vor.u32 %v2600_v31, %v2597_v27  ;;  %v3100_v43 = vrot.slane %v4142_v29, 5  ;;  %v898_v18 = vld [vmem:[%s4565_s28 + $0x48] sm:$0xe] }
  0x84   : > { %v2583_v40 = vsel %vm4604_vm5, %v2578_v30, %v2582_v14  ;;  %v2611_v42 = vor.u32 %v2610_v33, %v2606_v32  ;;  %2193 = vrot.lane.b32.xlu1 %v4005_v10, %s4479_s30  ;;  %2369 = vrot.lane.b32.xlu0 %v4368_v19, %s4483_s9  ;;  %v2588_v45 = vrot.slane %v2587_v35, 4  ;;  %v528_v49 = vshrl.u32 %v350_v34, 16  ;;  %v900_v24 = vld [vmem:[%s4565_s28 + $0x50] sm:$0x1]  ;;  %v901_v25 = vld [vmem:[%s4565_s28 + $0x54] sm:$0xe] }
  0x85   : > { %v3098_v46 = vsel %vm4558_vm2, %v4180_v37, %v3097_v38  ;;  %v3099_v47 = vrot.slane %v3097_v38, 4  ;;  %v2602_v52 = vrot.slane %v2601_v41, 4  ;;  %v531_v55 = vshll.u32 %v350_v34, 16  ;;  %v902_v38 = vld [vmem:[%s4565_s28 + $0x58] sm:$0xf] }
  0x86   : > { %v2612_v54 = vrot.slane %v2611_v42, 4  ;;  %v537_v56 = vshll.u32 %v351_v39, 16  ;;  %v2593_v58 = vsel %vm4604_vm5, %v2588_v45, %v2592_v26  ;;  %v530_v60 = vrot.slane %v528_v49, 4  ;;  %v3891_v49 = vld [vmem:[%s4565_s28 + $0x58] sm:$0xf] }
  0x87   : > { %v3101_v59 = vsel %vm4558_vm2, %v3099_v47, %v3100_v43  ;;  %v541_v61 = vshrl.u32 %v351_v39, 16  ;;  %v4116_v62 = vcombine.low %v2583_v40, %v2593_v58  ;;  %v2607_v63 = vsel %vm4604_vm5, %v2602_v52, %v2606_v32  ;;  %v903_v39 = vld [vmem:[%s4565_s28 + $0x5c] sm:$0x1]  ;;  %v3890_v40 = vld [vmem:[%s4565_s28 + $0x54] sm:$0xf] }
  0x88   : > { %v2617_v1 = vsel %vm4604_vm5, %v2612_v54, %v2616_v36  ;;  %v4196_v2 = vcombine.low %v3098_v46, %v3101_v59  ;;  %2371 = vrot.lane.b32.xlu1 %v4369_v44, %s4483_s9  ;;  %v533_v5 = vrot.slane %v531_v55, 5  ;;  %v539_v6 = vrot.slane %v537_v56, 5  ;;  %v3892_v54 = vld [vmem:[%s4565_s28 + $0x5c] sm:$0x1] }
  0x89   : > { %v4117_v4 = vcombine.low %v2607_v63, %v2617_v1  ;;  %v543_v7 = vrot.slane %v541_v61, 4  ;;  %2914 = vrot.lane.b32.xlu0 %v4116_v62, %s4484_s17  ;;  %v547_v9 = vshll.u32 %v352_v48, 16  ;;  %v4181_v10 = vrot.slane %v4143_v50, 9 }
  0x8a   : > { %v3104_v11 = vrot.slane %v4144_v51, 5  ;;  %v3107_v12 = vrot.slane %v4145_v57, 5  ;;  %v534_v13 = vor.u32 %v533_v5, %v530_v60  ;;  %v552_v16 = vshrl.u32 %v353_v3, 16 }
  0x8b   : > { %v544_v14 = vor.u32 %v543_v7, %v539_v6  ;;  %v555_v17 = vshll.u32 %v353_v3, 16  ;;  %v549_v19 = vrot.slane %v547_v9, 5  ;;  %v561_v22 = vshll.u32 %v354_v8, 16  ;;  %v3894_v7 = vld [vmem:[%s4565_s28 + $0x64] sm:$0xf] }
  0x8c   : > { %v3105_v20 = vsel %vm4558_vm2, %v4181_v10, %v3104_v11  ;;  %v3106_v21 = vrot.slane %v3104_v11, 4  ;;  %2916 = vrot.lane.b32.xlu1 %v4117_v4, %s4484_s17  ;;  %v535_v26 = vrot.slane %v534_v13, 4  ;;  %v554_v28 = vrot.slane %v552_v16, 4  ;;  %v3895_v13 = vld [vmem:[%s4565_s28 + $0x68] sm:$0x1] }
  0x8d   : > { %v545_v27 = vrot.slane %v544_v14, 4  ;;  %v557_v29 = vrot.slane %v555_v17, 5  ;;  %3235 = vrot.lane.b32.xlu0 %v4196_v2, %s4485_s24  ;;  %v563_v31 = vrot.slane %v561_v22, 5  ;;  %v565_v32 = vshrl.u32 %v354_v8, 16  ;;  %v4936_v60 = vpop.permute.xlu1 %1319  ;;  %v3893_v2 = vld [vmem:[%s4565_s28 + $0x60] sm:$0xf]  ;;  %v4944_v8 = vpop.permute.xlu0 %1317 }
  0x8e   : > { %v3108_v30 = vsel %vm4558_vm2, %v3106_v21, %v3107_v12  ;;  %v571_v33 = vshll.u32 %v355_v15, 16  ;;  %v540_v34 = vsel %vm4604_vm5, %v535_v26, %v539_v6  ;;  %v3798_v44 = vrot.slane %v898_v18, 9  ;;  %v3954_v14 = vld [vmem:[%s4565_s28 + $0x54] sm:$0xe]  ;;  %v3956_v21 = vld [vmem:[%s4565_s28 + $0x5c] sm:$0x1] }
  0x8f   : > { %v550_v35 = vsel %vm4604_vm5, %v545_v27, %v549_v19  ;;  %v4197_v36 = vcombine.low %v3105_v20, %v3108_v30  ;;  %v558_v37 = vor.u32 %v557_v29, %v554_v28  ;;  %v567_v42 = vrot.slane %v565_v32, 4  ;;  %v4370_v17 = vld [vmem:[%s4565_s28 + $0x54] sm:$0xff]   ;;  %v3957_v26 = vld [vmem:[%s4565_s28 + $0x60] sm:$0xe] }
  0x90   : > { %v3782_v41 = vcombine.low %v540_v34, %v550_v35  ;;  %v573_v43 = vrot.slane %v571_v33, 5  ;;  %v1023_v46 = vrot.slane %v899_v23, 5  ;;  %v1026_v47 = vrot.slane %v900_v24, 5  ;;  %v3955_v20 = vld [vmem:[%s4565_s28 + $0x58] sm:$0xf] }
  0x91   : > { %v559_v45 = vrot.slane %v558_v37, 4  ;;  %v3799_v48 = vrot.slane %v901_v25, 9  ;;  %3237 = vrot.lane.b32.xlu0 %v4197_v36, %s4485_s24  ;;  %v568_v50 = vor.u32 %v567_v42, %v563_v31  ;;  %v1030_v51 = vrot.slane %v902_v38, 5  ;;  %v3959_v37 = vld [vmem:[%s4565_s28 + $0x68] sm:$0x1] }
  0x92   : > { %827 = vrot.lane.b32.xlu1 %v3782_v41, %s4481_s5  ;;  %v1033_v52 = vrot.slane %v903_v39, 5  ;;  %v1575_v55 = vshrl.u32 %v3890_v40, 16  ;;  %v1024_v57 = vsel %vm4558_vm2, %v3798_v44, %v1023_v46  ;;  %v1025_v58 = vrot.slane %v1023_v46, 4 }
  0x93   : > { %v564_v56 = vsel %vm4604_vm5, %v559_v45, %v563_v31  ;;  %v1578_v59 = vshll.u32 %v3890_v40, 16  ;;  %v569_v61 = vrot.slane %v568_v50, 4  ;;  %v1031_v62 = vsel %vm4558_vm2, %v3799_v48, %v1030_v51  ;;  %v3958_v31 = vld [vmem:[%s4565_s28 + $0x64] sm:$0xf] }
  0x94   : > { %v1032_v63 = vrot.slane %v1030_v51, 4  ;;  %v1577_v1 = vrot.slane %v1575_v55, 4  ;;  %v1027_v3 = vsel %vm4558_vm2, %v1025_v58, %v1026_v47  ;;  %v1584_v5 = vshll.u32 %v3891_v49, 16  ;;  %v4082_v47 = vld [vmem:[%s4565_s28 + $0x60] sm:$0xf] }
  0x95   : > { %v1580_v4 = vrot.slane %v1578_v59, 5  ;;  %v1588_v6 = vshrl.u32 %v3891_v49, 16  ;;  %v574_v9 = vsel %vm4604_vm5, %v569_v61, %v573_v43  ;;  %v3814_v10 = vcombine.low %v1024_v57, %v1027_v3  ;;  %v4964_v42 = vpop.permute.xlu0 %2183  ;;  %v4371_v48 = vld [vmem:[%s4565_s28 + $0x60] sm:$0xff]  }
  0x96   : > { %v1034_v11 = vsel %vm4558_vm2, %v1032_v63, %v1033_v52  ;;  %v1594_v12 = vshll.u32 %v3892_v54, 16  ;;  %v3783_v15 = vcombine.low %v564_v56, %v574_v9  ;;  %v1586_v19 = vrot.slane %v1584_v5, 5  ;;  %v4959_v32 = vpop.permute.xlu1 %1139  ;;  %v4083_v54 = vld [vmem:[%s4565_s28 + $0x64] sm:$0xf] }
  0x97   : > { %v3815_v16 = vcombine.low %v1031_v62, %v1034_v11  ;;  %v1581_v18 = vor.u32 %v1580_v4, %v1577_v1  ;;  %1151 = vrot.lane.b32.xlu0 %v3814_v10, %s4480_s4  ;;  %v1590_v22 = vrot.slane %v1588_v6, 4  ;;  %v1599_v24 = vshrl.u32 %v3893_v2, 16  ;;  %v4084_v4 = vld [vmem:[%s4565_s28 + $0x68] sm:$0x1] }
  0x98   : > { %v1596_v23 = vrot.slane %v1594_v12, 5  ;;  %v1602_v25 = vshll.u32 %v3893_v2, 16  ;;  %829 = vrot.lane.b32.xlu1 %v3783_v15, %s4481_s5  ;;  %v1608_v28 = vshll.u32 %v3894_v7, 16  ;;  %v1612_v29 = vshrl.u32 %v3894_v7, 16  ;;  %v4085_v7 = vld [vmem:[%s4565_s28 + $0x6c] sm:$0xf] }
  0x99   : > { %v1582_v27 = vrot.slane %v1581_v18, 4  ;;  %v1618_v30 = vshll.u32 %v3895_v13, 16  ;;  %v1591_v33 = vor.u32 %v1590_v22, %v1586_v19  ;;  %v1601_v34 = vrot.slane %v1599_v24, 4  ;;  %v4086_v13 = vld [vmem:[%s4565_s28 + $0x70] sm:$0xf] }
  0x9a   : > { %v1604_v35 = vrot.slane %v1602_v25, 5  ;;  %v3990_v36 = vrot.slane %v3954_v14, 9  ;;  %v1610_v39 = vrot.slane %v1608_v28, 5  ;;  %v1614_v40 = vrot.slane %v1612_v29, 4  ;;  %v4979_v1 = vpop.permute.xlu1 %1141  ;;  %v4374_v25 = vld [vmem:[%s4565_s28] sm:$0xff]   ;;  %v4392_v29 = vld [vmem:[%s4565_s28 + $0x30] sm:$0xff]  }
  0x9b   : > { %v1587_v38 = vsel %vm4604_vm5, %v1582_v27, %v1586_v19  ;;  %v1620_v41 = vrot.slane %v1618_v30, 5  ;;  %1329 = vrot.lane.b32.xlu0 %v4370_v17, %s4478_s29  ;;  %v1592_v43 = vrot.slane %v1591_v33, 4  ;;  %v2067_v45 = vrot.slane %v3955_v20, 5  ;;  %v4087_v19 = vld [vmem:[%s4565_s28 + $0x74] sm:$0x1]  ;;  %v4372_v20 = vld [vmem:[%s4565_s28 + $0x60] sm:$0xff]  }
  0x9c   : > { %v1605_v44 = vor.u32 %v1604_v35, %v1601_v34  ;;  %v2070_v46 = vrot.slane %v3956_v21, 5  ;;  %1153 = vrot.lane.b32.xlu1 %v3815_v16, %s4480_s4  ;;  %v1615_v49 = vor.u32 %v1614_v40, %v1610_v39  ;;  %v3991_v50 = vrot.slane %v3957_v26, 9  ;;  %v4376_v26 = vld [vmem:[%s4565_s28 + $0xc] sm:$0xff]   ;;  %v4384_v27 = vld [vmem:[%s4565_s28 + $0x18] sm:$0xff]   ;;  %v4386_v28 = vld [vmem:[%s4565_s28 + $0x24] sm:$0xff]  }
  0x9d   : > { %v2074_v51 = vrot.slane %v3958_v31, 5  ;;  %v2077_v52 = vrot.slane %v3959_v37, 5  ;;  %v1597_v55 = vsel %vm4604_vm5, %v1592_v43, %v1596_v23  ;;  %v2068_v57 = vsel %vm4558_vm2, %v3990_v36, %v2067_v45  ;;  %v5010_v35 = vld [vmem:[%s4565_s28 + $0x60] sm:$0xe]  ;;  %v4398_v43 = vld [vmem:[%s4565_s28 + $0x48] sm:$0xff]  }
  0x9e   : > { %v1606_v56 = vrot.slane %v1605_v44, 4  ;;  %v2069_v58 = vrot.slane %v2067_v45, 4  ;;  %v3926_v59 = vcombine.low %v1587_v38, %v1597_v55  ;;  %v1616_v61 = vrot.slane %v1615_v49, 4  ;;  %v4393_v36 = vld [vmem:[%s4565_s28 + $0x3c] sm:$0xff]   ;;  %v4399_v44 = vld [vmem:[%s4565_s28 + $0x54] sm:$0xff]   ;;  %v4373_v55 = vld [vmem:[%s4565_s28 + $0x6c] sm:$0xff]  }
  0x9f   : > { %v4977_v62 = vsel %vm4558_vm2, %v3991_v50, %v2074_v51  ;;  %v2076_v63 = vrot.slane %v2074_v51, 4  ;;  %v2619_v5 = vshrl.u32 %v4082_v47, 16  ;;  %v2622_v6 = vshll.u32 %v4082_v47, 16  ;;  %v5026_v49 = vld [vmem:[%s4565_s28 + $0x64] sm:$0xf] }
  0xa0   : > { %v1611_v2 = vsel %vm4604_vm5, %v1606_v56, %v1610_v39  ;;  %v2071_v3 = vsel %vm4558_vm2, %v2069_v58, %v2070_v46  ;;  %1331 = vrot.lane.b32.xlu1 %v4371_v48, %s4478_s29  ;;  %1874 = vrot.lane.b32.xlu0 %v3926_v59, %s4482_s6  ;;  %v1621_v9 = vsel %vm4604_vm5, %v1616_v61, %v1620_v41  ;;  %v2628_v12 = vshll.u32 %v4083_v54, 16  ;;  %v4996_v14 = vpop.permute.xlu0 %815  ;;  %v5017_v41 = vpop.permute.xlu1 %2185  ;;  %v356_v61 = vld [vmem:[%s4565_s28 + $0x60] sm:$0xf] }
  0xa1   : > { %v4006_v10 = vcombine.low %v2068_v57, %v2071_v3  ;;  %v4993_v11 = vsel %vm4558_vm2, %v2076_v63, %v2077_v52  ;;  %v3927_v15 = vcombine.low %v1611_v2, %v1621_v9  ;;  %v2621_v17 = vrot.slane %v2619_v5, 4  ;;  %v5032_v52 = vld [vmem:[%s4565_s28 + $0x68] sm:$0x1] }
  0xa2   : > { %v4007_v16 = vcombine.low %v4977_v62, %v4993_v11  ;;  %v2624_v18 = vrot.slane %v2622_v6, 5  ;;  %v5002_v21 = vrot.slane %v2628_v12, 5  ;;  %v2632_v22 = vshrl.u32 %v4083_v54, 16  ;;  %v357_v62 = vld [vmem:[%s4565_s28 + $0x64] sm:$0xf] }
  0xa3   : > { %v2638_v23 = vshll.u32 %v4084_v4, 16  ;;  %v2643_v24 = vshrl.u32 %v4085_v7, 16  ;;  %v2646_v31 = vshll.u32 %v4085_v7, 16  ;;  %v2652_v33 = vshll.u32 %v4086_v13, 16  ;;  %v358_v3 = vld [vmem:[%s4565_s28 + $0x68] sm:$0x1] }
  0xa4   : > { %v2625_v30 = vor.u32 %v2624_v18, %v2621_v17  ;;  %v2656_v34 = vshrl.u32 %v4086_v13, 16  ;;  %1876 = vrot.lane.b32.xlu1 %v3927_v15, %s4482_s6  ;;  %2195 = vrot.lane.b32.xlu0 %v4006_v10, %s4479_s30  ;;  %v2634_v37 = vrot.slane %v2632_v22, 4  ;;  %v2662_v40 = vshll.u32 %v4087_v19, 16  ;;  %v4149_v4 = vld [vmem:[%s4565_s28 + $0x6c] sm:$0xe] }
  0xa5   : > { %v5015_v38 = vrot.slane %v2638_v23, 5  ;;  %v2645_v39 = vrot.slane %v2643_v24, 4  ;;  %v2648_v46 = vrot.slane %v2646_v31, 5  ;;  %v5023_v47 = vrot.slane %v2652_v33, 5  ;;  %v818_v54 = vpop.permute.xlu0 %817  ;;  %v4150_v10 = vld [vmem:[%s4565_s28 + $0x70] sm:$0xf] }
  0xa6   : > { %v5021_v45 = vrot.slane %v2625_v30, 4  ;;  %v2658_v48 = vrot.slane %v2656_v34, 4  ;;  %v2635_v50 = vor.u32 %v2634_v37, %v5002_v21  ;;  %v5029_v51 = vrot.slane %v2662_v40, 5  ;;  %v4151_v11 = vld [vmem:[%s4565_s28 + $0x74] sm:$0x1] }
  0xa7   : > { %v2649_v57 = vor.u32 %v2648_v46, %v2645_v39  ;;  %v4486_v59 = vmov 0   ;;  %v4182_v2 = vrot.slane %v5010_v35, 9  ;;  %v3111_v7 = vrot.slane %v5026_v49, 5  ;;  %v360_v24 = vld [vmem:[%s4565_s28 + $0x70] sm:$0xf] }
  0xa8   : > { %v2631_v56 = vsel %vm4604_vm5, %v5021_v45, %v5002_v21  ;;  %v2659_v58 = vor.u32 %v2658_v48, %v5023_v47  ;;  %171 = vst.msk [vmem:[#allocation2] sm:$0xff] %vm170_vm6, %v4486_v59  ;;  %172 = vst.msk [vmem:[#allocation2 + $0x8] sm:$0xff] %vm170_vm6, %v4486_v59  ;;  %2197 = vrot.lane.b32.xlu1 %v4007_v16, %s4479_s30  ;;  %2373 = vrot.lane.b32.xlu0 %v4372_v20, %s4483_s9  ;;  %v2636_v63 = vrot.slane %v2635_v50, 4  ;;  %v361_v30 = vld [vmem:[%s4565_s28 + $0x74] sm:$0x1] }
  0xa9   : > { %173 = vst.msk [vmem:[#allocation2 + $0x10] sm:$0xff] %vm170_vm6, %v4486_v59  ;;  %174 = vst.msk [vmem:[#allocation2 + $0x18] sm:$0xff] %vm170_vm6, %v4486_v59  ;;  %v2650_v5 = vrot.slane %v2649_v57, 4  ;;  %v3114_v9 = vrot.slane %v5032_v52, 5  ;;  %v576_v13 = vshrl.u32 %v356_v61, 16  ;;  %v579_v15 = vshll.u32 %v356_v61, 16  ;;  %v5086_v17 = vpop.permute.xlu1 %1864 }
  0xaa   : > { %175 = vst.msk [vmem:[#allocation2 + $0x20] sm:$0xff] %vm170_vm6, %v4486_v59  ;;  %176 = vst.msk [vmem:[#allocation2 + $0x28] sm:$0xff] %vm170_vm6, %v4486_v59  ;;  %v2660_v6 = vrot.slane %v2659_v58, 4  ;;  %v2641_v12 = vsel %vm4604_vm5, %v2636_v63, %v5015_v38  ;;  %v585_v16 = vshll.u32 %v357_v62, 16  ;;  %v3112_v20 = vsel %vm4558_vm2, %v4182_v2, %v3111_v7  ;;  %v904_v52 = vld [vmem:[%s4565_s28 + $0x60] sm:$0xe] }
  0xab   : > { %177 = vst.msk [vmem:[#allocation2 + $0x30] sm:$0xff] %vm170_vm6, %v4486_v59  ;;  %178 = vst.msk [vmem:[#allocation2 + $0x38] sm:$0xff] %vm170_vm6, %v4486_v59  ;;  %v4118_v18 = vcombine.low %v2631_v56, %v2641_v12  ;;  %v2655_v19 = vsel %vm4604_vm5, %v2650_v5, %v5023_v47  ;;  %v578_v22 = vrot.slane %v576_v13, 4  ;;  %v581_v23 = vrot.slane %v579_v15, 5  ;;  %v905_v58 = vld [vmem:[%s4565_s28 + $0x64] sm:$0xf] }
  0xac   : > { %179 = vst.msk [vmem:[#allocation2 + $0x40] sm:$0xff] %vm170_vm6, %v4486_v59  ;;  %180 = vst.msk [vmem:[#allocation2 + $0x48] sm:$0xff] %vm170_vm6, %v4486_v59  ;;  %2375 = vrot.lane.b32.xlu1 %v4373_v55, %s4483_s9  ;;  %v3118_v34 = vrot.slane %v4150_v10, 5  ;;  %v3121_v35 = vrot.slane %v4151_v11, 5  ;;  %v609_v50 = vshll.u32 %v360_v24, 16  ;;  %v619_v57 = vshll.u32 %v361_v30, 16 }
  0xad   : > { %181 = vst.msk [vmem:[#allocation2 + $0x50] sm:$0xff] %vm170_vm6, %v4486_v59  ;;  %182 = vst.msk [vmem:[#allocation2 + $0x58] sm:$0xff] %vm170_vm6, %v4486_v59  ;;  %2918 = vrot.lane.b32.xlu0 %v4118_v18, %s4484_s17  ;;  %v582_v33 = vor.u32 %v581_v23, %v578_v22  ;;  %v5107_v47 = vpop.permute.xlu1 %2363  ;;  %v3800_v11 = vrot.slane %v904_v52, 9  ;;  %v1037_v12 = vrot.slane %v905_v58, 5  ;;  %v909_v13 = vld [vmem:[%s4565_s28 + $0x74] sm:$0x1] }
  0xae   : > { %183 = vst.msk [vmem:[#allocation2 + $0x60] sm:$0xff] %vm170_vm6, %v4486_v59  ;;  %184 = vst.msk [vmem:[#allocation2 + $0x68] sm:$0xff] %vm170_vm6, %v4486_v59  ;;  %v611_v63 = vrot.slane %v609_v50, 5  ;;  %v621_v5 = vrot.slane %v619_v57, 5  ;;  %v1047_v22 = vrot.slane %v909_v13, 5 }
  0xaf   : > { %185 = vst.msk [vmem:[#allocation2 + $0x70] sm:$0xff] %vm170_vm6, %v4486_v59  ;;  %186 = vst.msk [vmem:[#allocation2 + $0x78] sm:$0xff] %vm170_vm6, %v4486_v59  ;;  %v583_v40 = vrot.slane %v582_v33, 4  ;;  %v906_v59 = vld [vmem:[%s4565_s28 + $0x68] sm:$0x1] }
  0xb0   : > { %316 = vst.msk [vmem:[#allocation2] sm:$0xff] %vm315_vm7, %v4374_v25  ;;  %317 = vst.msk [vmem:[#allocation2 + $0x8] sm:$0xff] %vm315_vm7, %v4376_v26  ;;  %v1863_v25 = vpop.permute.xlu0 %1862  ;;  %v587_v26 = vrot.slane %v585_v16, 5  ;;  %v3897_v23 = vld [vmem:[%s4565_s28 + $0x70] sm:$0xf] }
  0xb1   : > { %318 = vst.msk [vmem:[#allocation2 + $0x10] sm:$0xff] %vm315_vm7, %v4384_v27  ;;  %319 = vst.msk [vmem:[#allocation2 + $0x18] sm:$0xff] %vm315_vm7, %v4386_v28  ;;  %v589_v27 = vshrl.u32 %v357_v62, 16  ;;  %v595_v28 = vshll.u32 %v358_v3, 16  ;;  %v907_v3 = vld [vmem:[%s4565_s28 + $0x6c] sm:$0xe] }
  0xb2   : > { %320 = vst.msk [vmem:[#allocation2 + $0x20] sm:$0xff] %vm315_vm7, %v4392_v29  ;;  %321 = vst.msk [vmem:[#allocation2 + $0x28] sm:$0xff] %vm315_vm7, %v4393_v36  ;;  %v4183_v29 = vrot.slane %v4149_v4, 9  ;;  %v3801_v18 = vrot.slane %v907_v3, 9  ;;  %v3899_v30 = vld [vmem:[%s4565_s28 + $0x78] sm:$0xf] }
  0xb3   : > { %322 = vst.msk [vmem:[#allocation2 + $0x30] sm:$0xff] %vm315_vm7, %v4398_v43  ;;  %323 = vst.msk [vmem:[#allocation2 + $0x38] sm:$0xff] %vm315_vm7, %v4399_v44  ;;  %v591_v37 = vrot.slane %v589_v27, 4  ;;  %v597_v38 = vrot.slane %v595_v28, 5  ;;  %v3120_v44 = vrot.slane %v3118_v34, 4 }
  0xb4   : > { %864 = vst.msk [vmem:[#allocation2] sm:$0xff] %vm863_vm8, %v4996_v14  ;;  %865 = vst.msk [vmem:[#allocation2 + $0x8] sm:$0xff] %vm863_vm8, %v818_v54  ;;  %v359_v14 = vld [vmem:[%s4565_s28 + $0x6c] sm:$0xf]  ;;  %v3119_v43 = vsel %vm4558_vm2, %v4183_v29, %v3118_v34  ;;  %v5105_v46 = vpop.permute.xlu0 %2361  ;;  %v588_v54 = vsel %vm4604_vm5, %v583_v40, %v587_v26  ;;  %v3898_v29 = vld [vmem:[%s4565_s28 + $0x74] sm:$0x1] }
  0xb5   : > { %1188 = vst.msk [vmem:[#allocation2] sm:$0xff] %vm1187_vm9, %v4959_v32  ;;  %1189 = vst.msk [vmem:[#allocation2 + $0x8] sm:$0xff] %vm1187_vm9, %v4979_v1  ;;  %v2665_v32 = vsel %vm4604_vm5, %v2660_v6, %v5029_v51  ;;  %v3113_v1 = vrot.slane %v3111_v7, 4  ;;  %v600_v39 = vshrl.u32 %v359_v14, 16  ;;  %v603_v45 = vshll.u32 %v359_v14, 16  ;;  %v4405_v40 = vld [vmem:[%s4565_s28 + $0x6c] sm:$0xff]  }
  0xb6   : > { %v4119_v21 = vcombine.low %v2655_v19, %v2665_v32  ;;  %v592_v48 = vor.u32 %v591_v37, %v587_v26  ;;  %v613_v51 = vshrl.u32 %v360_v24, 16  ;;  %v3122_v55 = vsel %vm4558_vm2, %v3120_v44, %v3121_v35  ;;  %v908_v6 = vld [vmem:[%s4565_s28 + $0x70] sm:$0xf]  ;;  %1367 = vst.msk [vmem:[#allocation2 + $0x8] sm:$0xff] %vm1365_vm10, %v4936_v60  ;;  %1366 = vst.msk [vmem:[#allocation2] sm:$0xff] %vm1365_vm10, %v4944_v8  ;;  %v2909_v19 = vpop.permute.xlu1 %2908  ;;  %v4404_v32 = vld [vmem:[%s4565_s28 + $0x60] sm:$0xff]  }
  0xb7   : > { %v3115_v31 = vsel %vm4558_vm2, %v3113_v1, %v3114_v9  ;;  %v602_v49 = vrot.slane %v600_v39, 4  ;;  %v605_v56 = vrot.slane %v603_v45, 5  ;;  %v4199_v62 = vcombine.low %v3119_v43, %v3122_v55  ;;  %1912 = vst.msk [vmem:[#allocation2 + $0x8] sm:$0xff] %vm1910_vm11, %v5086_v17  ;;  %1911 = vst.msk [vmem:[#allocation2] sm:$0xff] %vm1910_vm11, %v1863_v25  ;;  %v3896_v1 = vld [vmem:[%s4565_s28 + $0x6c] sm:$0xf] }
  0xb8   : > { %v4198_v36 = vcombine.low %v3112_v20, %v3115_v31  ;;  %2920 = vrot.lane.b32.xlu1 %v4119_v21, %s4484_s17  ;;  %v593_v61 = vrot.slane %v592_v48, 4  ;;  %v615_v2 = vrot.slane %v613_v51, 4  ;;  %v2907_v7 = vpop.permute.xlu0 %2906  ;;  %v1040_v14 = vrot.slane %v906_v59, 5  ;;  %324 = vst.msk [vmem:[#allocation2 + $0x40] sm:$0xff] %vm315_vm7, %v4404_v32  ;;  %v3900_v35 = vld [vmem:[%s4565_s28 + $0x7c] sm:$0xf] }
  0xb9   : > { %v606_v4 = vor.u32 %v605_v56, %v602_v49  ;;  %v1038_v8 = vsel %vm4558_vm2, %v3800_v11, %v1037_v12  ;;  %v1039_v20 = vrot.slane %v1037_v12, 4  ;;  %v1044_v21 = vrot.slane %v908_v6, 5  ;;  %2232 = vst.msk [vmem:[#allocation2] sm:$0xff] %vm2231_vm12, %v4964_v42  ;;  %2233 = vst.msk [vmem:[#allocation2 + $0x8] sm:$0xff] %vm2231_vm12, %v5017_v41  ;;  %v4380_v44 = vld [vmem:[%s4565_s28 + $0x6c] sm:$0xff]   ;;  %v4381_v56 = vld [vmem:[%s4565_s28 + $0x78] sm:$0xff]  }
  0xba   : > { %3239 = vrot.lane.b32.xlu0 %v4198_v36, %s4485_s24  ;;  %v598_v9 = vsel %vm4604_vm5, %v593_v61, %v597_v38  ;;  %v616_v10 = vor.u32 %v615_v2, %v611_v63  ;;  %2410 = vst.msk [vmem:[#allocation2] sm:$0xff] %vm2409_vm13, %v5105_v46  ;;  %2411 = vst.msk [vmem:[#allocation2 + $0x8] sm:$0xff] %vm2409_vm13, %v5107_v47  ;;  %v1623_v34 = vshrl.u32 %v3896_v1, 16  ;;  %v1626_v41 = vshll.u32 %v3896_v1, 16  ;;  %v3901_v38 = vld [vmem:[%s4565_s28 + $0x80] sm:$0x1] }
  0xbb   : > { %v3784_v15 = vcombine.low %v588_v54, %v598_v9  ;;  %v607_v16 = vrot.slane %v606_v4, 4  ;;  %v1041_v26 = vsel %vm4558_vm2, %v1039_v20, %v1040_v14  ;;  %v1045_v27 = vsel %vm4558_vm2, %v3801_v18, %v1044_v21  ;;  %2955 = vst.msk [vmem:[#allocation2] sm:$0xff] %vm2954_vm14, %v2907_v7  ;;  %2956 = vst.msk [vmem:[#allocation2 + $0x8] sm:$0xff] %vm2954_vm14, %v2909_v19  ;;  %v3960_v48 = vld [vmem:[%s4565_s28 + $0x6c] sm:$0xe] }
  0xbc   : > { %v617_v60 = vrot.slane %v616_v10, 4  ;;  %v5138_v24 = vpop.permute.xlu0 %3227  ;;  %v1046_v28 = vrot.slane %v1044_v21, 4  ;;  %v3816_v33 = vcombine.low %v1038_v8, %v1041_v26  ;;  %v1632_v36 = vshll.u32 %v3897_v23, 16  ;;  %v820_v39 = vpop.permute.xlu1 %819  ;;  %v3961_v55 = vld [vmem:[%s4565_s28 + $0x70] sm:$0xf]  ;;  %325 = vst.msk [vmem:[#allocation2 + $0x48] sm:$0xff] %vm315_vm7, %v4405_v40 }
  0xbd   : > { %831 = vrot.lane.b32.xlu1 %v3784_v15, %s4481_s5  ;;  %v612_v17 = vsel %vm4604_vm5, %v607_v16, %v611_v63  ;;  %v1636_v37 = vshrl.u32 %v3897_v23, 16  ;;  %v1625_v45 = vrot.slane %v1623_v34, 4  ;;  %v1642_v46 = vshll.u32 %v3898_v29, 16  ;;  %866 = vst.msk [vmem:[#allocation2 + $0x10] sm:$0xff] %vm863_vm8, %v820_v39  ;;  %v3964_v6 = vld [vmem:[%s4565_s28 + $0x7c] sm:$0xf] }
  0xbe   : > { %3241 = vrot.lane.b32.xlu0 %v4199_v62, %s4485_s24  ;;  %v622_v25 = vsel %vm4604_vm5, %v617_v60, %v621_v5  ;;  %v1048_v42 = vsel %vm4558_vm2, %v1046_v28, %v1047_v22  ;;  %v1647_v47 = vshrl.u32 %v3899_v30, 16  ;;  %v1628_v50 = vrot.slane %v1626_v41, 5  ;;  %v3962_v62 = vld [vmem:[%s4565_s28 + $0x74] sm:$0x1]  ;;  %v3963_v5 = vld [vmem:[%s4565_s28 + $0x78] sm:$0xe] }
  0xbf   : > { %v3785_v31 = vcombine.low %v612_v17, %v622_v25  ;;  %v3817_v43 = vcombine.low %v1045_v27, %v1048_v42  ;;  %v1634_v51 = vrot.slane %v1632_v36, 5  ;;  %v1638_v52 = vrot.slane %v1636_v37, 4  ;;  %v3965_v11 = vld [vmem:[%s4565_s28 + $0x80] sm:$0x1]  ;;  %3276 = vst.msk [vmem:[#allocation2] sm:$0xff] %vm3275_vm15, %v5138_v24 }
  0xc0   : > { %v3230_v49 = vpop.permute.xlu0 %3229  ;;  %v1650_v54 = vshll.u32 %v3899_v30, 16  ;;  %v1644_v57 = vrot.slane %v1642_v46, 5  ;;  %v1649_v58 = vrot.slane %v1647_v47, 4  ;;  %v1656_v59 = vshll.u32 %v3900_v35, 16  ;;  %v4088_v19 = vld [vmem:[%s4565_s28 + $0x78] sm:$0xf] }
  0xc1   : > { %833 = vrot.lane.b32.xlu1 %v3785_v31, %s4481_s5  ;;  %v1660_v61 = vshrl.u32 %v3900_v35, 16  ;;  %v1629_v63 = vor.u32 %v1628_v50, %v1625_v45  ;;  %v1639_v2 = vor.u32 %v1638_v52, %v1634_v51  ;;  %v1666_v4 = vshll.u32 %v3901_v38, 16  ;;  %3277 = vst.msk [vmem:[#allocation2 + $0x8] sm:$0xff] %vm3275_vm15, %v3230_v49  ;;  %v4089_v21 = vld [vmem:[%s4565_s28 + $0x7c] sm:$0xf] }
  0xc2   : > { %1155 = vrot.lane.b32.xlu0 %v3816_v33, %s4480_s4  ;;  %v1652_v3 = vrot.slane %v1650_v54, 5  ;;  %v1658_v7 = vrot.slane %v1656_v59, 5  ;;  %v3992_v10 = vrot.slane %v3960_v48, 9  ;;  %v822_v14 = vpop.permute.xlu1 %821  ;;  %v2081_v60 = vrot.slane %v3961_v55, 5  ;;  %v4090_v41 = vld [vmem:[%s4565_s28 + $0x80] sm:$0x1] }
  0xc3   : > { %v1662_v9 = vrot.slane %v1660_v61, 4  ;;  %v1630_v12 = vrot.slane %v1629_v63, 4  ;;  %v1640_v13 = vrot.slane %v1639_v2, 4  ;;  %v1668_v16 = vrot.slane %v1666_v4, 5  ;;  %867 = vst.msk [vmem:[#allocation2 + $0x18] sm:$0xff] %vm863_vm8, %v822_v14 }
  0xc4   : > { %v1653_v15 = vor.u32 %v1652_v3, %v1649_v58  ;;  %v1144_v18 = vpop.permute.xlu0 %1143  ;;  %v2084_v8 = vrot.slane %v3962_v62, 5  ;;  %v3993_v20 = vrot.slane %v3963_v5, 9  ;;  %v2088_v23 = vrot.slane %v3964_v6, 5  ;;  %v4091_v38 = vld [vmem:[%s4565_s28 + $0x84] sm:$0xf]  ;;  %v4387_v62 = vld [vmem:[%s4565_s28 + $0x78] sm:$0xff]  }
  0xc5   : > { %1157 = vrot.lane.b32.xlu1 %v3817_v43, %s4480_s4  ;;  %v1663_v32 = vor.u32 %v1662_v9, %v1658_v7  ;;  %1190 = vst.msk [vmem:[#allocation2 + $0x10] sm:$0xff] %vm1187_vm9, %v1144_v18  ;;  %v1635_v1 = vsel %vm4604_vm5, %v1630_v12, %v1634_v51  ;;  %v1645_v17 = vsel %vm4604_vm5, %v1640_v13, %v1644_v57  ;;  %v2083_v27 = vrot.slane %v2081_v60, 4  ;;  %v4092_v45 = vld [vmem:[%s4565_s28 + $0x88] sm:$0xf]  ;;  %v4093_v46 = vld [vmem:[%s4565_s28 + $0x8c] sm:$0x1] }
  0xc6   : > { %1333 = vrot.lane.b32.xlu0 %v4380_v44, %s4478_s29  ;;  %v1654_v22 = vrot.slane %v1653_v15, 4  ;;  %v3928_v24 = vcombine.low %v1635_v1, %v1645_v17  ;;  %v2082_v26 = vsel %vm4558_vm2, %v3992_v10, %v2081_v60  ;;  %v2089_v29 = vsel %vm4558_vm2, %v3993_v20, %v2088_v23  ;;  %v1146_v33 = vpop.permute.xlu1 %1145  ;;  %v3292_v48 = vld [vmem:[#allocation2] sm:$0xff]  ;;  %v4152_v54 = vld [vmem:[%s4565_s28 + $0x78] sm:$0xe]  ;;  %v4153_v55 = vld [vmem:[%s4565_s28 + $0x7c] sm:$0xf] }
  0xc7   : > { %v1664_v25 = vrot.slane %v1663_v32, 4  ;;  %v2090_v30 = vrot.slane %v2088_v23, 4  ;;  %v2091_v31 = vrot.slane %v3965_v11, 5  ;;  %v2085_v42 = vsel %vm4558_vm2, %v2083_v27, %v2084_v8  ;;  %1191 = vst.msk [vmem:[#allocation2 + $0x18] sm:$0xff] %vm1187_vm9, %v1146_v33  ;;  %4261 = vmatprep.mubr.bf16.mxu0 %v3292_v48  ;;  %v4154_v11 = vld [vmem:[%s4565_s28 + $0x80] sm:$0x1] }
  0xc8   : > { %v1659_v28 = vsel %vm4604_vm5, %v1654_v22, %v1658_v7  ;;  %v1322_v34 = vpop.permute.xlu0 %1321  ;;  %v2667_v36 = vshrl.u32 %v4088_v19, 16  ;;  %v2670_v37 = vshll.u32 %v4088_v19, 16  ;;  %v4008_v40 = vcombine.low %v2082_v26, %v2085_v42  ;;  %v3293_v52 = vld [vmem:[#allocation2 + $0x8] sm:$0xff]  ;;  %v4388_v18 = vld [vmem:[%s4565_s28 + $0x84] sm:$0xff]   ;;  %v4157_v33 = vld [vmem:[%s4565_s28 + $0x8c] sm:$0x1] }
  0xc9   : > { %1335 = vrot.lane.b32.xlu1 %v4381_v56, %s4478_s29  ;;  %v1669_v35 = vsel %vm4604_vm5, %v1664_v25, %v1668_v16  ;;  %1368 = vst.msk [vmem:[#allocation2 + $0x10] sm:$0xff] %vm1365_vm10, %v1322_v34  ;;  %v2092_v43 = vsel %vm4558_vm2, %v2090_v30, %v2091_v31  ;;  %v2676_v44 = vshll.u32 %v4089_v21, 16  ;;  %v2680_v51 = vshrl.u32 %v4089_v21, 16  ;;  %4262 = vmatmul.mubr.bf16.vlgmr.msra.gmra.mrb[0].mxu0 %v3293_v52  ;;  %v362_v14 = vld [vmem:[%s4565_s28 + $0x78] sm:$0xf] }
  0xca   : > { %1878 = vrot.lane.b32.xlu0 %v3928_v24, %s4482_s6  ;;  %v3929_v39 = vcombine.low %v1659_v28, %v1669_v35  ;;  %v4009_v47 = vcombine.low %v2089_v29, %v2092_v43  ;;  %v2669_v49 = vrot.slane %v2667_v36, 4  ;;  %v2672_v50 = vrot.slane %v2670_v37, 5  ;;  %v1324_v61 = vpop.permute.xlu1 %1323  ;;  %v363_v20 = vld [vmem:[%s4565_s28 + $0x7c] sm:$0xf]  ;;  %v364_v24 = vld [vmem:[%s4565_s28 + $0x80] sm:$0x1] }
  0xcb   : > { %v2678_v56 = vrot.slane %v2676_v44, 5  ;;  %v2686_v57 = vshll.u32 %v4090_v41, 16  ;;  %v2691_v58 = vshrl.u32 %v4091_v38, 16  ;;  %v2694_v59 = vshll.u32 %v4091_v38, 16  ;;  %1369 = vst.msk [vmem:[#allocation2 + $0x18] sm:$0xff] %vm1365_vm10, %v1324_v61  ;;  %v4408_v38 = vld [vmem:[%s4565_s28 + $0x78] sm:$0xff]  }
  0xcc   : > { %v2673_v63 = vor.u32 %v2672_v50, %v2669_v49  ;;  %v2682_v2 = vrot.slane %v2680_v51, 4  ;;  %v2700_v3 = vshll.u32 %v4092_v45, 16  ;;  %v2704_v4 = vshrl.u32 %v4092_v45, 16  ;;  %v1867_v5 = vpop.permute.xlu0 %1866  ;;  %v4155_v25 = vld [vmem:[%s4565_s28 + $0x84] sm:$0xe]  ;;  %326 = vst.msk [vmem:[#allocation2 + $0x50] sm:$0xff] %vm315_vm7, %v4408_v38 }
  0xcd   : > { %1880 = vrot.lane.b32.xlu1 %v3929_v39, %s4482_s6  ;;  %v2688_v6 = vrot.slane %v2686_v57, 5  ;;  %v2693_v7 = vrot.slane %v2691_v58, 4  ;;  %v2696_v9 = vrot.slane %v2694_v59, 5  ;;  %v2710_v10 = vshll.u32 %v4093_v46, 16  ;;  %1913 = vst.msk [vmem:[#allocation2 + $0x10] sm:$0xff] %vm1910_vm11, %v1867_v5 }
  0xce   : > { %2199 = vrot.lane.b32.xlu0 %v4008_v40, %s4479_s30  ;;  %v2674_v12 = vrot.slane %v2673_v63, 4  ;;  %v2683_v13 = vor.u32 %v2682_v2, %v2678_v56  ;;  %v2702_v15 = vrot.slane %v2700_v3, 5  ;;  %v2706_v16 = vrot.slane %v2704_v4, 4  ;;  %v1869_v21 = vpop.permute.xlu1 %1868  ;;  %v4156_v31 = vld [vmem:[%s4565_s28 + $0x88] sm:$0xf] }
  0xcf   : > { %v2697_v19 = vor.u32 %v2696_v9, %v2693_v7  ;;  %v2712_v32 = vrot.slane %v2710_v10, 5  ;;  %v4184_v60 = vrot.slane %v4152_v54, 9  ;;  %v3125_v8 = vrot.slane %v4153_v55, 5  ;;  %1914 = vst.msk [vmem:[#allocation2 + $0x18] sm:$0xff] %vm1910_vm11, %v1869_v21  ;;  %v365_v34 = vld [vmem:[%s4565_s28 + $0x84] sm:$0xf] }
  0xd0   : > { %v2679_v1 = vsel %vm4604_vm5, %v2674_v12, %v2678_v56  ;;  %v2684_v17 = vrot.slane %v2683_v13, 4  ;;  %v2707_v22 = vor.u32 %v2706_v16, %v2702_v15  ;;  %v3128_v23 = vrot.slane %v4154_v11, 5  ;;  %v2188_v26 = vpop.permute.xlu0 %2187  ;;  %v366_v37 = vld [vmem:[%s4565_s28 + $0x88] sm:$0xf]  ;;  %v367_v56 = vld [vmem:[%s4565_s28 + $0x8c] sm:$0x1] }
  0xd1   : > { %2201 = vrot.lane.b32.xlu1 %v4009_v47, %s4479_s30  ;;  %v2698_v27 = vrot.slane %v2697_v19, 4  ;;  %v3126_v28 = vsel %vm4558_vm2, %v4184_v60, %v3125_v8  ;;  %v3127_v29 = vrot.slane %v3125_v8, 4  ;;  %v624_v30 = vshrl.u32 %v362_v14, 16  ;;  %2234 = vst.msk [vmem:[#allocation2 + $0x10] sm:$0xff] %vm2231_vm12, %v2188_v26  ;;  %v4409_v63 = vld [vmem:[%s4565_s28 + $0x84] sm:$0xff]  }
  0xd2   : > { %2377 = vrot.lane.b32.xlu0 %v4387_v62, %s4483_s9  ;;  %v2689_v35 = vsel %vm4604_vm5, %v2684_v17, %v2688_v6  ;;  %v2708_v42 = vrot.slane %v2707_v22, 4  ;;  %v627_v41 = vshll.u32 %v362_v14, 16  ;;  %v633_v36 = vshll.u32 %v363_v20, 16  ;;  %v2190_v45 = vpop.permute.xlu1 %2189  ;;  %v910_v62 = vld [vmem:[%s4565_s28 + $0x78] sm:$0xe]  ;;  %327 = vst.msk [vmem:[#allocation2 + $0x58] sm:$0xff] %vm315_vm7, %v4409_v63 }
  0xd3   : > { %v4120_v39 = vcombine.low %v2679_v1, %v2689_v35  ;;  %v2703_v40 = vsel %vm4604_vm5, %v2698_v27, %v2702_v15  ;;  %v3129_v43 = vsel %vm4558_vm2, %v3127_v29, %v3128_v23  ;;  %v626_v44 = vrot.slane %v624_v30, 4  ;;  %2235 = vst.msk [vmem:[#allocation2 + $0x18] sm:$0xff] %vm2231_vm12, %v2190_v45  ;;  %v911_v6 = vld [vmem:[%s4565_s28 + $0x7c] sm:$0xf]  ;;  %v912_v13 = vld [vmem:[%s4565_s28 + $0x80] sm:$0x1] }
  0xd4   : > { %v2713_v46 = vsel %vm4604_vm5, %v2708_v42, %v2712_v32  ;;  %v4200_v47 = vcombine.low %v3126_v28, %v3129_v43  ;;  %v629_v48 = vrot.slane %v627_v41, 5  ;;  %v5244_v49 = vrot.slane %v633_v36, 5  ;;  %v2366_v50 = vpop.permute.xlu0 %2365  ;;  %v913_v19 = vld [vmem:[%s4565_s28 + $0x84] sm:$0xe]  ;;  %v914_v1 = vld [vmem:[%s4565_s28 + $0x88] sm:$0xf] }
  0xd5   : > { %2379 = vrot.lane.b32.xlu1 %v4388_v18, %s4483_s9  ;;  %v4121_v51 = vcombine.low %v2703_v40, %v2713_v46  ;;  %v637_v52 = vshrl.u32 %v363_v20, 16  ;;  %v643_v54 = vshll.u32 %v364_v24, 16  ;;  %v4185_v55 = vrot.slane %v4155_v25, 9  ;;  %2412 = vst.msk [vmem:[#allocation2 + $0x10] sm:$0xff] %vm2409_vm13, %v2366_v50  ;;  %v915_v25 = vld [vmem:[%s4565_s28 + $0x8c] sm:$0x1] }
  0xd6   : > { %2922 = vrot.lane.b32.xlu0 %v4120_v39, %s4484_s17  ;;  %v630_v57 = vor.u32 %v629_v48, %v626_v44  ;;  %v3132_v58 = vrot.slane %v4156_v31, 5  ;;  %v3135_v59 = vrot.slane %v4157_v33, 5  ;;  %v648_v61 = vshrl.u32 %v365_v34, 16  ;;  %v2368_v7 = vpop.permute.xlu1 %2367  ;;  %v3902_v42 = vld [vmem:[%s4565_s28 + $0x84] sm:$0xf] }
  0xd7   : > { %v639_v2 = vrot.slane %v637_v52, 4  ;;  %v645_v3 = vrot.slane %v643_v54, 5  ;;  %v651_v4 = vshll.u32 %v365_v34, 16  ;;  %v657_v5 = vshll.u32 %v366_v37, 16  ;;  %2413 = vst.msk [vmem:[#allocation2 + $0x18] sm:$0xff] %vm2409_vm13, %v2368_v7 }
  0xd8   : > { %v631_v9 = vrot.slane %v630_v57, 4  ;;  %v3133_v10 = vsel %vm4558_vm2, %v4185_v55, %v3132_v58  ;;  %v3134_v11 = vrot.slane %v3132_v58, 4  ;;  %v650_v12 = vrot.slane %v648_v61, 4  ;;  %v2911_v32 = vpop.permute.xlu0 %2910  ;;  %v3903_v41 = vld [vmem:[%s4565_s28 + $0x88] sm:$0xf] }
  0xd9   : > { %2924 = vrot.lane.b32.xlu1 %v4121_v51, %s4484_s17  ;;  %v640_v15 = vor.u32 %v639_v2, %v5244_v49  ;;  %v653_v16 = vrot.slane %v651_v4, 5  ;;  %v659_v14 = vrot.slane %v657_v5, 5  ;;  %v661_v18 = vshrl.u32 %v366_v37, 16  ;;  %2957 = vst.msk [vmem:[#allocation2 + $0x10] sm:$0xff] %vm2954_vm14, %v2911_v32  ;;  %v3905_v52 = vld [vmem:[%s4565_s28 + $0x90] sm:$0xf] }
  0xda   : > { %3243 = vrot.lane.b32.xlu0 %v4200_v47, %s4485_s24  ;;  %v636_v60 = vsel %vm4604_vm5, %v631_v9, %v5244_v49  ;;  %v3136_v8 = vsel %vm4558_vm2, %v3134_v11, %v3135_v59  ;;  %v667_v20 = vshll.u32 %v367_v56, 16  ;;  %v3802_v21 = vrot.slane %v910_v62, 9  ;;  %v2913_v26 = vpop.permute.xlu1 %2912  ;;  %v3904_v47 = vld [vmem:[%s4565_s28 + $0x8c] sm:$0x1]  ;;  %v4390_v57 = vld [vmem:[%s4565_s28 + $0x84] sm:$0xff]  }
  0xdb   : > { %v641_v17 = vrot.slane %v640_v15, 4  ;;  %v4201_v22 = vcombine.low %v3133_v10, %v3136_v8  ;;  %v654_v23 = vor.u32 %v653_v16, %v650_v12  ;;  %v663_v24 = vrot.slane %v661_v18, 4  ;;  %2958 = vst.msk [vmem:[#allocation2 + $0x18] sm:$0xff] %vm2954_vm14, %v2913_v26  ;;  %v3906_v59 = vld [vmem:[%s4565_s28 + $0x94] sm:$0xf] }
  0xdc   : > { %v669_v27 = vrot.slane %v667_v20, 5  ;;  %v1051_v28 = vrot.slane %v911_v6, 5  ;;  %v1054_v29 = vrot.slane %v912_v13, 5  ;;  %v3803_v30 = vrot.slane %v913_v19, 9  ;;  %v3232_v36 = vpop.permute.xlu0 %3231  ;;  %v3907_v61 = vld [vmem:[%s4565_s28 + $0x98] sm:$0x1] }
  0xdd   : > { %v646_v31 = vsel %vm4604_vm5, %v641_v17, %v645_v3  ;;  %v655_v33 = vrot.slane %v654_v23, 4  ;;  %v664_v34 = vor.u32 %v663_v24, %v659_v14  ;;  %v1058_v35 = vrot.slane %v914_v1, 5  ;;  %3278 = vst.msk [vmem:[#allocation2 + $0x10] sm:$0xff] %vm3275_vm15, %v3232_v36  ;;  %v3966_v6 = vld [vmem:[%s4565_s28 + $0x84] sm:$0xe] }
  0xde   : > { %3245 = vrot.lane.b32.xlu0 %v4201_v22, %s4485_s24  ;;  %v3786_v37 = vcombine.low %v636_v60, %v646_v31  ;;  %v1052_v38 = vsel %vm4558_vm2, %v3802_v21, %v1051_v28  ;;  %v1053_v39 = vrot.slane %v1051_v28, 4  ;;  %v1061_v40 = vrot.slane %v915_v25, 5  ;;  %v3967_v7 = vld [vmem:[%s4565_s28 + $0x88] sm:$0xf]  ;;  %v3968_v13 = vld [vmem:[%s4565_s28 + $0x8c] sm:$0x1] }
  0xdf   : > { %v660_v43 = vsel %vm4604_vm5, %v655_v33, %v659_v14  ;;  %v665_v44 = vrot.slane %v664_v34, 4  ;;  %v1059_v45 = vsel %vm4558_vm2, %v3803_v30, %v1058_v35  ;;  %v1060_v46 = vrot.slane %v1058_v35, 4  ;;  %v3969_v19 = vld [vmem:[%s4565_s28 + $0x90] sm:$0xe]  ;;  %v3970_v21 = vld [vmem:[%s4565_s28 + $0x94] sm:$0xf] }
  0xe0   : > { %835 = vrot.lane.b32.xlu1 %v3786_v37, %s4481_s5  ;;  %v1055_v48 = vsel %vm4558_vm2, %v1053_v39, %v1054_v29  ;;  %v1671_v49 = vshrl.u32 %v3902_v42, 16  ;;  %v1674_v50 = vshll.u32 %v3902_v42, 16  ;;  %v1680_v51 = vshll.u32 %v3903_v41, 16  ;;  %v824_v62 = vpop.permute.xlu1 %823  ;;  %v3234_v63 = vpop.permute.xlu0 %3233  ;;  %v3971_v25 = vld [vmem:[%s4565_s28 + $0x98] sm:$0x1]  ;;  %v4391_v33 = vld [vmem:[%s4565_s28 + $0x90] sm:$0xff]  }
  0xe1   : > { %v670_v54 = vsel %vm4604_vm5, %v665_v44, %v669_v27  ;;  %v3818_v55 = vcombine.low %v1052_v38, %v1055_v48  ;;  %v1062_v56 = vsel %vm4558_vm2, %v1060_v46, %v1061_v40  ;;  %v1684_v58 = vshrl.u32 %v3903_v41, 16  ;;  %868 = vst.msk [vmem:[#allocation2 + $0x20] sm:$0xff] %vm863_vm8, %v824_v62  ;;  %v4094_v26 = vld [vmem:[%s4565_s28 + $0x90] sm:$0xf]  ;;  %v4095_v48 = vld [vmem:[%s4565_s28 + $0x94] sm:$0xf] }
  0xe2   : > { %v3787_v2 = vcombine.low %v660_v43, %v670_v54  ;;  %v3819_v3 = vcombine.low %v1059_v45, %v1062_v56  ;;  %v1673_v4 = vrot.slane %v1671_v49, 4  ;;  %v1676_v5 = vrot.slane %v1674_v50, 5  ;;  %3279 = vst.msk [vmem:[#allocation2 + $0x18] sm:$0xff] %vm3275_vm15, %v3234_v63  ;;  %v4097_v62 = vld [vmem:[%s4565_s28 + $0x9c] sm:$0xf] }
  0xe3   : > { %1159 = vrot.lane.b32.xlu0 %v3818_v55, %s4480_s4  ;;  %v1682_v9 = vrot.slane %v1680_v51, 5  ;;  %v1686_v10 = vrot.slane %v1684_v58, 4  ;;  %v1690_v11 = vshll.u32 %v3904_v47, 16  ;;  %v1695_v12 = vshrl.u32 %v3905_v52, 16  ;;  %v4096_v51 = vld [vmem:[%s4565_s28 + $0x98] sm:$0x1] }
  0xe4   : > { %837 = vrot.lane.b32.xlu1 %v3787_v2, %s4481_s5  ;;  %v1677_v15 = vor.u32 %v1676_v5, %v1673_v4  ;;  %v1698_v16 = vshll.u32 %v3905_v52, 16  ;;  %v1704_v14 = vshll.u32 %v3906_v59, 16  ;;  %v1708_v18 = vshrl.u32 %v3906_v59, 16  ;;  %v3294_v1 = vld [vmem:[#allocation2 + $0x10] sm:$0xff] }
  0xe5   : > { %v1687_v32 = vor.u32 %v1686_v10, %v1682_v9  ;;  %v1692_v60 = vrot.slane %v1690_v11, 5  ;;  %v1697_v8 = vrot.slane %v1695_v12, 4  ;;  %v1714_v20 = vshll.u32 %v3907_v61, 16  ;;  %4265 = vmatprep.mubr.bf16.mxu0 %v3294_v1  ;;  %v1148_v31 = vpop.permute.xlu0 %1147  ;;  %v4098_v63 = vld [vmem:[%s4565_s28 + $0xa0] sm:$0xf]  ;;  %v4394_v10 = vld [vmem:[%s4565_s28 + $0x90] sm:$0xff]  }
  0xe6   : > { %v1678_v17 = vrot.slane %v1677_v15, 4  ;;  %v1700_v22 = vrot.slane %v1698_v16, 5  ;;  %v1706_v23 = vrot.slane %v1704_v14, 5  ;;  %v1710_v24 = vrot.slane %v1708_v18, 4  ;;  %v826_v36 = vpop.permute.xlu1 %825  ;;  %1192 = vst.msk [vmem:[#allocation2 + $0x20] sm:$0xff] %vm1187_vm9, %v1148_v31  ;;  %v4395_v31 = vld [vmem:[%s4565_s28 + $0x9c] sm:$0xff]  }
  0xe7   : > { %1337 = vrot.lane.b32.xlu0 %v4390_v57, %s4478_s29  ;;  %v1688_v27 = vrot.slane %v1687_v32, 4  ;;  %v1716_v28 = vrot.slane %v1714_v20, 5  ;;  %v3994_v29 = vrot.slane %v3966_v6, 9  ;;  %v2095_v30 = vrot.slane %v3967_v7, 5  ;;  %869 = vst.msk [vmem:[#allocation2 + $0x28] sm:$0xff] %vm863_vm8, %v826_v36 }
  0xe8   : > { %1161 = vrot.lane.b32.xlu1 %v3819_v3, %s4480_s4  ;;  %v1683_v34 = vsel %vm4604_vm5, %v1678_v17, %v1682_v9  ;;  %v1701_v35 = vor.u32 %v1700_v22, %v1697_v8  ;;  %v1711_v42 = vor.u32 %v1710_v24, %v1706_v23  ;;  %v2098_v41 = vrot.slane %v3968_v13, 5  ;;  %v4099_v6 = vld [vmem:[%s4565_s28 + $0xa4] sm:$0x1]  ;;  %v4158_v7 = vld [vmem:[%s4565_s28 + $0x90] sm:$0xe] }
  0xe9   : > { %v1693_v37 = vsel %vm4604_vm5, %v1688_v27, %v1692_v60  ;;  %v2096_v38 = vsel %vm4558_vm2, %v3994_v29, %v2095_v30  ;;  %v2097_v39 = vrot.slane %v2095_v30, 4  ;;  %v3995_v40 = vrot.slane %v3969_v19, 9  ;;  %v3295_v43 = vld [vmem:[#allocation2 + $0x18] sm:$0xff]  ;;  %v1326_v55 = vpop.permute.xlu0 %1325  ;;  %v4159_v19 = vld [vmem:[%s4565_s28 + $0x94] sm:$0xf] }
  0xea   : > { %v3930_v44 = vcombine.low %v1683_v34, %v1693_v37  ;;  %v1702_v45 = vrot.slane %v1701_v35, 4  ;;  %v1712_v46 = vrot.slane %v1711_v42, 4  ;;  %v2102_v47 = vrot.slane %v3970_v21, 5  ;;  %4266 = vmatmul.mubr.bf16.gmra.mrb[4].mxu0 %v3295_v43  ;;  %v1150_v61 = vpop.permute.xlu1 %1149  ;;  %1370 = vst.msk [vmem:[#allocation2 + $0x20] sm:$0xff] %vm1365_vm10, %v1326_v55  ;;  %v4160_v1 = vld [vmem:[%s4565_s28 + $0x98] sm:$0x1] }
  0xeb   : > { %v2099_v49 = vsel %vm4558_vm2, %v2097_v39, %v2098_v41  ;;  %v2105_v50 = vrot.slane %v3971_v25, 5  ;;  %v2715_v52 = vshrl.u32 %v4094_v26, 16  ;;  %v2718_v54 = vshll.u32 %v4094_v26, 16  ;;  %1193 = vst.msk [vmem:[#allocation2 + $0x28] sm:$0xff] %vm1187_vm9, %v1150_v61  ;;  %v368_v26 = vld [vmem:[%s4565_s28 + $0x90] sm:$0xf] }
  0xec   : > { %1339 = vrot.lane.b32.xlu1 %v4391_v33, %s4478_s29  ;;  %1882 = vrot.lane.b32.xlu0 %v3930_v44, %s4482_s6  ;;  %v1707_v56 = vsel %vm4604_vm5, %v1702_v45, %v1706_v23  ;;  %v1717_v57 = vsel %vm4604_vm5, %v1712_v46, %v1716_v28  ;;  %v4010_v58 = vcombine.low %v2096_v38, %v2099_v49  ;;  %v2104_v59 = vrot.slane %v2102_v47, 4  ;;  %v369_v41 = vld [vmem:[%s4565_s28 + $0x94] sm:$0xf]  ;;  %v370_v39 = vld [vmem:[%s4565_s28 + $0x98] sm:$0x1] }
  0xed   : > { %v3931_v2 = vcombine.low %v1707_v56, %v1717_v57  ;;  %v2103_v3 = vsel %vm4558_vm2, %v3995_v40, %v2102_v47  ;;  %v2717_v4 = vrot.slane %v2715_v52, 4  ;;  %v2720_v5 = vrot.slane %v2718_v54, 5  ;;  %v4161_v44 = vld [vmem:[%s4565_s28 + $0x9c] sm:$0xe]  ;;  %v4162_v45 = vld [vmem:[%s4565_s28 + $0xa0] sm:$0xf] }
  0xee   : > { %v2106_v9 = vsel %vm4558_vm2, %v2104_v59, %v2105_v50  ;;  %v2724_v11 = vshll.u32 %v4095_v48, 16  ;;  %v2728_v12 = vshrl.u32 %v4095_v48, 16  ;;  %v2734_v13 = vshll.u32 %v4096_v51, 16  ;;  %v1328_v21 = vpop.permute.xlu1 %1327  ;;  %v1871_v17 = vpop.permute.xlu0 %1870  ;;  %v4163_v51 = vld [vmem:[%s4565_s28 + $0xa4] sm:$0x1]  ;;  %v4410_v57 = vld [vmem:[%s4565_s28 + $0x90] sm:$0xff]  }
  0xef   : > { %v4011_v15 = vcombine.low %v2103_v3, %v2106_v9  ;;  %v2721_v16 = vor.u32 %v2720_v5, %v2717_v4  ;;  %v2739_v14 = vshrl.u32 %v4097_v62, 16  ;;  %v2742_v18 = vshll.u32 %v4097_v62, 16  ;;  %1371 = vst.msk [vmem:[#allocation2 + $0x28] sm:$0xff] %vm1365_vm10, %v1328_v21  ;;  %v371_v5 = vld [vmem:[%s4565_s28 + $0x9c] sm:$0xf] }
  0xf0   : > { %1884 = vrot.lane.b32.xlu1 %v3931_v2, %s4482_s6  ;;  %2203 = vrot.lane.b32.xlu0 %v4010_v58, %s4479_s30  ;;  %v2726_v32 = vrot.slane %v2724_v11, 5  ;;  %v2730_v60 = vrot.slane %v2728_v12, 4  ;;  %v2736_v8 = vrot.slane %v2734_v13, 5  ;;  %v2748_v20 = vshll.u32 %v4098_v63, 16  ;;  %1915 = vst.msk [vmem:[#allocation2 + $0x20] sm:$0xff] %vm1910_vm11, %v1871_v17 }
  0xf1   : > { %v2722_v22 = vrot.slane %v2721_v16, 4  ;;  %v2741_v23 = vrot.slane %v2739_v14, 4  ;;  %v2744_v24 = vrot.slane %v2742_v18, 5  ;;  %v2752_v25 = vshrl.u32 %v4098_v63, 16  ;;  %328 = vst.msk [vmem:[#allocation2 + $0x60] sm:$0xff] %vm315_vm7, %v4410_v57 }
  0xf2   : > { %v2731_v27 = vor.u32 %v2730_v60, %v2726_v32  ;;  %v2750_v28 = vrot.slane %v2748_v20, 5  ;;  %v2758_v29 = vshll.u32 %v4099_v6, 16  ;;  %v4186_v30 = vrot.slane %v4158_v7, 9  ;;  %v1873_v43 = vpop.permute.xlu1 %1872  ;;  %v2192_v46 = vpop.permute.xlu0 %2191  ;;  %v372_v13 = vld [vmem:[%s4565_s28 + $0xa0] sm:$0xf] }
  0xf3   : > { %v2727_v33 = vsel %vm4604_vm5, %v2722_v22, %v2726_v32  ;;  %v2745_v34 = vor.u32 %v2744_v24, %v2741_v23  ;;  %v2754_v35 = vrot.slane %v2752_v25, 4  ;;  %v3139_v42 = vrot.slane %v4159_v19, 5  ;;  %1916 = vst.msk [vmem:[#allocation2 + $0x28] sm:$0xff] %vm1910_vm11, %v1873_v43  ;;  %v373_v19 = vld [vmem:[%s4565_s28 + $0xa4] sm:$0x1] }
  0xf4   : > { %2205 = vrot.lane.b32.xlu1 %v4011_v15, %s4479_s30  ;;  %2381 = vrot.lane.b32.xlu0 %v4394_v10, %s4483_s9  ;;  %v2732_v36 = vrot.slane %v2731_v27, 4  ;;  %v2760_v37 = vrot.slane %v2758_v29, 5  ;;  %v3142_v38 = vrot.slane %v4160_v1, 5  ;;  %v672_v40 = vshrl.u32 %v368_v26, 16  ;;  %2236 = vst.msk [vmem:[#allocation2 + $0x20] sm:$0xff] %vm2231_vm12, %v2192_v46  ;;  %v4411_v1 = vld [vmem:[%s4565_s28 + $0x9c] sm:$0xff]  }
  0xf5   : > { %v2746_v47 = vrot.slane %v2745_v34, 4  ;;  %v2755_v48 = vor.u32 %v2754_v35, %v2750_v28  ;;  %v3140_v49 = vsel %vm4558_vm2, %v4186_v30, %v3139_v42  ;;  %v3141_v50 = vrot.slane %v3139_v42, 4  ;;  %v916_v21 = vld [vmem:[%s4565_s28 + $0x90] sm:$0xe]  ;;  %v917_v25 = vld [vmem:[%s4565_s28 + $0x94] sm:$0xf] }
  0xf6   : > { %v2737_v52 = vsel %vm4604_vm5, %v2732_v36, %v2736_v8  ;;  %v674_v54 = vrot.slane %v672_v40, 4  ;;  %v675_v55 = vshll.u32 %v368_v26, 16  ;;  %v681_v56 = vshll.u32 %v369_v41, 16  ;;  %v2194_v6 = vpop.permute.xlu1 %2193  ;;  %v2370_v7 = vpop.permute.xlu0 %2369  ;;  %329 = vst.msk [vmem:[#allocation2 + $0x68] sm:$0xff] %vm315_vm7, %v4411_v1  ;;  %v919_v36 = vld [vmem:[%s4565_s28 + $0x9c] sm:$0xe] }
  0xf7   : > { %v4122_v58 = vcombine.low %v2727_v33, %v2737_v52  ;;  %v2751_v59 = vsel %vm4604_vm5, %v2746_v47, %v2750_v28  ;;  %v2756_v61 = vrot.slane %v2755_v48, 4  ;;  %v3143_v62 = vsel %vm4558_vm2, %v3141_v50, %v3142_v38  ;;  %2237 = vst.msk [vmem:[#allocation2 + $0x28] sm:$0xff] %vm2231_vm12, %v2194_v6  ;;  %v3908_v50 = vld [vmem:[%s4565_s28 + $0x9c] sm:$0xf] }
  0xf8   : > { %2383 = vrot.lane.b32.xlu1 %v4395_v31, %s4483_s9  ;;  %v4202_v63 = vcombine.low %v3140_v49, %v3143_v62  ;;  %v677_v2 = vrot.slane %v675_v55, 5  ;;  %v683_v3 = vrot.slane %v681_v56, 5  ;;  %v685_v4 = vshrl.u32 %v369_v41, 16  ;;  %2414 = vst.msk [vmem:[#allocation2 + $0x20] sm:$0xff] %vm2409_vm13, %v2370_v7  ;;  %v918_v31 = vld [vmem:[%s4565_s28 + $0x98] sm:$0x1] }
  0xf9   : > { %2926 = vrot.lane.b32.xlu0 %v4122_v58, %s4484_s17  ;;  %v2761_v9 = vsel %vm4604_vm5, %v2756_v61, %v2760_v37  ;;  %v691_v10 = vshll.u32 %v370_v39, 16  ;;  %v4187_v11 = vrot.slane %v4161_v44, 9  ;;  %v3146_v12 = vrot.slane %v4162_v45, 5  ;;  %v920_v37 = vld [vmem:[%s4565_s28 + $0xa0] sm:$0xf] }
  0xfa   : > { %v4123_v15 = vcombine.low %v2751_v59, %v2761_v9  ;;  %v678_v16 = vor.u32 %v677_v2, %v674_v54  ;;  %v687_v14 = vrot.slane %v685_v4, 4  ;;  %v3149_v18 = vrot.slane %v4163_v51, 5  ;;  %v2372_v26 = vpop.permute.xlu1 %2371  ;;  %v921_v44 = vld [vmem:[%s4565_s28 + $0xa4] sm:$0x1]  ;;  %v3909_v56 = vld [vmem:[%s4565_s28 + $0xa0] sm:$0xf] }
  0xfb   : > { %v693_v32 = vrot.slane %v691_v10, 5  ;;  %v3147_v60 = vsel %vm4558_vm2, %v4187_v11, %v3146_v12  ;;  %v3148_v8 = vrot.slane %v3146_v12, 4  ;;  %v696_v20 = vshrl.u32 %v371_v5, 16  ;;  %2415 = vst.msk [vmem:[#allocation2 + $0x28] sm:$0xff] %vm2409_vm13, %v2372_v26  ;;  %v2915_v33 = vpop.permute.xlu0 %2914  ;;  %v3910_v7 = vld [vmem:[%s4565_s28 + $0xa4] sm:$0x1] }
  0xfc   : > { %2928 = vrot.lane.b32.xlu1 %v4123_v15, %s4484_s17  ;;  %v679_v17 = vrot.slane %v678_v16, 4  ;;  %v688_v22 = vor.u32 %v687_v14, %v683_v3  ;;  %v699_v23 = vshll.u32 %v371_v5, 16  ;;  %v705_v24 = vshll.u32 %v372_v13, 16  ;;  %2959 = vst.msk [vmem:[#allocation2 + $0x20] sm:$0xff] %vm2954_vm14, %v2915_v33  ;;  %v3911_v11 = vld [vmem:[%s4565_s28 + $0xa8] sm:$0xf] }
  0xfd   : > { %3247 = vrot.lane.b32.xlu0 %v4202_v63, %s4485_s24  ;;  %v3150_v27 = vsel %vm4558_vm2, %v3148_v8, %v3149_v18  ;;  %v698_v28 = vrot.slane %v696_v20, 4  ;;  %v709_v29 = vshrl.u32 %v372_v13, 16  ;;  %v715_v30 = vshll.u32 %v373_v19, 16  ;;  %v4396_v16 = vld [vmem:[%s4565_s28 + $0x9c] sm:$0xff]   ;;  %v3912_v18 = vld [vmem:[%s4565_s28 + $0xac] sm:$0xf] }
  0xfe   : > { %v684_v34 = vsel %vm4604_vm5, %v679_v17, %v683_v3  ;;  %v689_v35 = vrot.slane %v688_v22, 4  ;;  %v4203_v42 = vcombine.low %v3147_v60, %v3150_v27  ;;  %v701_v41 = vrot.slane %v699_v23, 5  ;;  %v2917_v49 = vpop.permute.xlu1 %2916  ;;  %v3913_v19 = vld [vmem:[%s4565_s28 + $0xb0] sm:$0x1]  ;;  %v3972_v17 = vld [vmem:[%s4565_s28 + $0x9c] sm:$0xe] }
  0xff   : > { %v707_v38 = vrot.slane %v705_v24, 5  ;;  %v711_v39 = vrot.slane %v709_v29, 4  ;;  %v717_v40 = vrot.slane %v715_v30, 5  ;;  %v3804_v43 = vrot.slane %v916_v21, 9  ;;  %2960 = vst.msk [vmem:[#allocation2 + $0x28] sm:$0xff] %vm2954_vm14, %v2917_v49  ;;  %v3236_v57 = vpop.permute.xlu0 %3235 }
 0x100   : > { %v694_v45 = vsel %vm4604_vm5, %v689_v35, %v693_v32  ;;  %v702_v46 = vor.u32 %v701_v41, %v698_v28  ;;  %v1065_v47 = vrot.slane %v917_v25, 5  ;;  %v1068_v48 = vrot.slane %v918_v31, 5  ;;  %3280 = vst.msk [vmem:[#allocation2 + $0x20] sm:$0xff] %vm3275_vm15, %v3236_v57  ;;  %v3973_v22 = vld [vmem:[%s4565_s28 + $0xa0] sm:$0xf] }
 0x101   : > { %v3788_v51 = vcombine.low %v684_v34, %v694_v45  ;;  %3249 = vrot.lane.b32.xlu0 %v4203_v42, %s4485_s24  ;;  %v712_v52 = vor.u32 %v711_v39, %v707_v38  ;;  %v3805_v54 = vrot.slane %v919_v36, 9  ;;  %v1072_v55 = vrot.slane %v920_v37, 5  ;;  %v3974_v27 = vld [vmem:[%s4565_s28 + $0xa4] sm:$0x1]  ;;  %v3975_v33 = vld [vmem:[%s4565_s28 + $0xa8] sm:$0xe] }
 0x102   : > { %v703_v58 = vrot.slane %v702_v46, 4  ;;  %v1066_v59 = vsel %vm4558_vm2, %v3804_v43, %v1065_v47  ;;  %v1067_v61 = vrot.slane %v1065_v47, 4  ;;  %v1075_v62 = vrot.slane %v921_v44, 5  ;;  %v3976_v36 = vld [vmem:[%s4565_s28 + $0xac] sm:$0xf] }
 0x103   : > { %839 = vrot.lane.b32.xlu1 %v3788_v51, %s4481_s5  ;;  %v713_v63 = vrot.slane %v712_v52, 4  ;;  %v1073_v2 = vsel %vm4558_vm2, %v3805_v54, %v1072_v55  ;;  %v1074_v3 = vrot.slane %v1072_v55, 4  ;;  %v1719_v4 = vshrl.u32 %v3908_v50, 16  ;;  %v3238_v60 = vpop.permute.xlu0 %3237  ;;  %v5432_v37 = vld [vmem:[%s4565_s28 + $0xb0] sm:$0x1]  ;;  %v4397_v51 = vld [vmem:[%s4565_s28 + $0xa8] sm:$0xff]  }
 0x104   : > { %v708_v5 = vsel %vm4604_vm5, %v703_v58, %v707_v38  ;;  %v1069_v6 = vsel %vm4558_vm2, %v1067_v61, %v1068_v48  ;;  %v1722_v9 = vshll.u32 %v3908_v50, 16  ;;  %v1728_v10 = vshll.u32 %v3909_v56, 16  ;;  %v828_v32 = vpop.permute.xlu1 %827  ;;  %3281 = vst.msk [vmem:[#allocation2 + $0x28] sm:$0xff] %vm3275_vm15, %v3238_v60  ;;  %v4100_v39 = vld [vmem:[%s4565_s28 + $0xa8] sm:$0xf] }
 0x105   : > { %v718_v12 = vsel %vm4604_vm5, %v713_v63, %v717_v40  ;;  %v3820_v13 = vcombine.low %v1066_v59, %v1069_v6  ;;  %v1076_v15 = vsel %vm4558_vm2, %v1074_v3, %v1075_v62  ;;  %v1721_v14 = vrot.slane %v1719_v4, 4  ;;  %870 = vst.msk [vmem:[#allocation2 + $0x30] sm:$0xff] %vm863_vm8, %v828_v32  ;;  %v4104_v60 = vld [vmem:[%s4565_s28 + $0xb8] sm:$0xf] }
 0x106   : > { %v3789_v8 = vcombine.low %v708_v5, %v718_v12  ;;  %v3821_v20 = vcombine.low %v1073_v2, %v1076_v15  ;;  %v1724_v21 = vrot.slane %v1722_v9, 5  ;;  %v5420_v1 = vrot.slane %v1728_v10, 5  ;;  %v4101_v5 = vld [vmem:[%s4565_s28 + $0xac] sm:$0xf] }
 0x107   : > { %1163 = vrot.lane.b32.xlu0 %v3820_v13, %s4480_s4  ;;  %v1732_v23 = vshrl.u32 %v3909_v56, 16  ;;  %v1738_v24 = vshll.u32 %v3910_v7, 16  ;;  %v1743_v25 = vshrl.u32 %v3911_v11, 16  ;;  %v1746_v26 = vshll.u32 %v3911_v11, 16  ;;  %v3296_v38 = vld [vmem:[#allocation2 + $0x20] sm:$0xff] }
 0x108   : > { %841 = vrot.lane.b32.xlu1 %v3789_v8, %s4481_s5  ;;  %v1725_v28 = vor.u32 %v1724_v21, %v1721_v14  ;;  %v1752_v29 = vshll.u32 %v3912_v18, 16  ;;  %v1756_v30 = vshrl.u32 %v3912_v18, 16  ;;  %v1762_v31 = vshll.u32 %v3913_v19, 16  ;;  %4269 = vmatprep.mubr.bf16.mxu0 %v3296_v38  ;;  %v4102_v11 = vld [vmem:[%s4565_s28 + $0xb0] sm:$0x1] }
 0x109   : > { %v1734_v34 = vrot.slane %v1732_v23, 4  ;;  %v1740_v35 = vrot.slane %v1738_v24, 5  ;;  %v1745_v42 = vrot.slane %v1743_v25, 4  ;;  %v1748_v41 = vrot.slane %v1746_v26, 5  ;;  %v1152_v50 = vpop.permute.xlu0 %1151  ;;  %v4103_v13 = vld [vmem:[%s4565_s28 + $0xb4] sm:$0xf] }
 0x10a   : > { %v1726_v40 = vrot.slane %v1725_v28, 4  ;;  %v1754_v43 = vrot.slane %v1752_v29, 5  ;;  %v1758_v44 = vrot.slane %v1756_v30, 4  ;;  %v1764_v45 = vrot.slane %v1762_v31, 5  ;;  %v830_v57 = vpop.permute.xlu1 %829  ;;  %1194 = vst.msk [vmem:[#allocation2 + $0x30] sm:$0xff] %vm1187_vm9, %v1152_v50 }
 0x10b   : > { %1341 = vrot.lane.b32.xlu0 %v4396_v16, %s4478_s29  ;;  %v1735_v46 = vor.u32 %v1734_v34, %v5420_v1  ;;  %v1749_v47 = vor.u32 %v1748_v41, %v1745_v42  ;;  %v3996_v48 = vrot.slane %v3972_v17, 9  ;;  %v2109_v49 = vrot.slane %v3973_v22, 5  ;;  %871 = vst.msk [vmem:[#allocation2 + $0x38] sm:$0xff] %vm863_vm8, %v830_v57  ;;  %v3297_v63 = vld [vmem:[#allocation2 + $0x28] sm:$0xff]  ;;  %v4164_v26 = vld [vmem:[%s4565_s28 + $0xa8] sm:$0xe] }
 0x10c   : > { %1165 = vrot.lane.b32.xlu1 %v3821_v20, %s4480_s4  ;;  %v1731_v52 = vsel %vm4604_vm5, %v1726_v40, %v5420_v1  ;;  %v1759_v54 = vor.u32 %v1758_v44, %v1754_v43  ;;  %v2112_v55 = vrot.slane %v3974_v27, 5  ;;  %v3997_v56 = vrot.slane %v3975_v33, 9  ;;  %4270 = vmatmul.mubr.bf16.gmra.mrb[8].mxu0 %v3297_v63  ;;  %v4105_v17 = vld [vmem:[%s4565_s28 + $0xbc] sm:$0x1]  ;;  %v4165_v31 = vld [vmem:[%s4565_s28 + $0xac] sm:$0xf] }
 0x10d   : > { %v1736_v58 = vrot.slane %v1735_v46, 4  ;;  %v1750_v59 = vrot.slane %v1749_v47, 4  ;;  %v2110_v61 = vsel %vm4558_vm2, %v3996_v48, %v2109_v49  ;;  %v2111_v62 = vrot.slane %v2109_v49, 4  ;;  %v1330_v15 = vpop.permute.xlu0 %1329  ;;  %v4166_v33 = vld [vmem:[%s4565_s28 + $0xb0] sm:$0x1]  ;;  %v4401_v47 = vld [vmem:[%s4565_s28 + $0xb4] sm:$0xff]  }
 0x10e   : > { %v1760_v2 = vrot.slane %v1759_v54, 4  ;;  %v2116_v3 = vrot.slane %v3976_v36, 5  ;;  %v2119_v4 = vrot.slane %v5432_v37, 5  ;;  %v2763_v6 = vshrl.u32 %v4100_v39, 16  ;;  %v1154_v32 = vpop.permute.xlu1 %1153  ;;  %1372 = vst.msk [vmem:[#allocation2 + $0x30] sm:$0xff] %vm1365_vm10, %v1330_v15 }
 0x10f   : > { %v1741_v7 = vsel %vm4604_vm5, %v1736_v58, %v1740_v35  ;;  %v1755_v9 = vsel %vm4604_vm5, %v1750_v59, %v1754_v43  ;;  %v2113_v10 = vsel %vm4558_vm2, %v2111_v62, %v2112_v55  ;;  %v2766_v12 = vshll.u32 %v4100_v39, 16  ;;  %1195 = vst.msk [vmem:[#allocation2 + $0x38] sm:$0xff] %vm1187_vm9, %v1154_v32  ;;  %v4400_v35 = vld [vmem:[%s4565_s28 + $0xa8] sm:$0xff]   ;;  %v4168_v15 = vld [vmem:[%s4565_s28 + $0xb8] sm:$0xf] }
 0x110   : > { %1343 = vrot.lane.b32.xlu1 %v4397_v51, %s4478_s29  ;;  %v3932_v16 = vcombine.low %v1731_v52, %v1741_v7  ;;  %v1765_v14 = vsel %vm4604_vm5, %v1760_v2, %v1764_v45  ;;  %v4012_v18 = vcombine.low %v2110_v61, %v2113_v10  ;;  %v2117_v19 = vsel %vm4558_vm2, %v3997_v56, %v2116_v3  ;;  %v374_v38 = vld [vmem:[%s4565_s28 + $0xa8] sm:$0xf]  ;;  %v375_v46 = vld [vmem:[%s4565_s28 + $0xac] sm:$0xf]  ;;  %v376_v61 = vld [vmem:[%s4565_s28 + $0xb0] sm:$0x1] }
 0x111   : > { %v3933_v8 = vcombine.low %v1755_v9, %v1765_v14  ;;  %v2118_v20 = vrot.slane %v2116_v3, 4  ;;  %v2765_v21 = vrot.slane %v2763_v6, 4  ;;  %v2768_v1 = vrot.slane %v2766_v12, 5  ;;  %v4167_v2 = vld [vmem:[%s4565_s28 + $0xb4] sm:$0xe]  ;;  %v4412_v9 = vld [vmem:[%s4565_s28 + $0xa8] sm:$0xff]  }
 0x112   : > { %1886 = vrot.lane.b32.xlu0 %v3932_v16, %s4482_s6  ;;  %v2772_v22 = vshll.u32 %v4101_v5, 16  ;;  %v2776_v23 = vshrl.u32 %v4101_v5, 16  ;;  %v2782_v24 = vshll.u32 %v4102_v11, 16  ;;  %v2787_v25 = vshrl.u32 %v4103_v13, 16  ;;  %v1332_v37 = vpop.permute.xlu1 %1331  ;;  %v1875_v39 = vpop.permute.xlu0 %1874  ;;  %v4169_v32 = vld [vmem:[%s4565_s28 + $0xbc] sm:$0x1] }
 0x113   : > { %v2120_v27 = vsel %vm4558_vm2, %v2118_v20, %v2119_v4  ;;  %v2769_v28 = vor.u32 %v2768_v1, %v2765_v21  ;;  %v2790_v29 = vshll.u32 %v4103_v13, 16  ;;  %v2796_v30 = vshll.u32 %v4104_v60, 16  ;;  %1373 = vst.msk [vmem:[#allocation2 + $0x38] sm:$0xff] %vm1365_vm10, %v1332_v37 }
 0x114   : > { %1888 = vrot.lane.b32.xlu1 %v3933_v8, %s4482_s6  ;;  %v4013_v34 = vcombine.low %v2117_v19, %v2120_v27  ;;  %v2774_v42 = vrot.slane %v2772_v22, 5  ;;  %v2778_v41 = vrot.slane %v2776_v23, 4  ;;  %v2784_v36 = vrot.slane %v2782_v24, 5  ;;  %1917 = vst.msk [vmem:[#allocation2 + $0x30] sm:$0xff] %vm1910_vm11, %v1875_v39  ;;  %v924_v39 = vld [vmem:[%s4565_s28 + $0xb0] sm:$0x1] }
 0x115   : > { %v2770_v40 = vrot.slane %v2769_v28, 4  ;;  %v2789_v43 = vrot.slane %v2787_v25, 4  ;;  %v2792_v44 = vrot.slane %v2790_v29, 5  ;;  %v5474_v45 = vrot.slane %v2796_v30, 5  ;;  %330 = vst.msk [vmem:[#allocation2 + $0x70] sm:$0xff] %vm315_vm7, %v4412_v9  ;;  %v4413_v29 = vld [vmem:[%s4565_s28 + $0xb4] sm:$0xff]  }
 0x116   : > { %2207 = vrot.lane.b32.xlu0 %v4012_v18, %s4479_s30  ;;  %v2779_v48 = vor.u32 %v2778_v41, %v2774_v42  ;;  %v2800_v49 = vshrl.u32 %v4104_v60, 16  ;;  %v2806_v50 = vshll.u32 %v4105_v17, 16  ;;  %v4188_v51 = vrot.slane %v4164_v26, 9  ;;  %v1877_v63 = vpop.permute.xlu1 %1876  ;;  %v2196_v3 = vpop.permute.xlu0 %2195  ;;  %v377_v60 = vld [vmem:[%s4565_s28 + $0xb4] sm:$0xf]  ;;  %331 = vst.msk [vmem:[#allocation2 + $0x78] sm:$0xff] %vm315_vm7, %v4413_v29 }
 0x117   : > { %v2775_v52 = vsel %vm4604_vm5, %v2770_v40, %v2774_v42  ;;  %v2793_v54 = vor.u32 %v2792_v44, %v2789_v43  ;;  %v3153_v55 = vrot.slane %v4165_v31, 5  ;;  %v3156_v56 = vrot.slane %v4166_v33, 5  ;;  %1918 = vst.msk [vmem:[#allocation2 + $0x38] sm:$0xff] %vm1910_vm11, %v1877_v63  ;;  %v378_v17 = vld [vmem:[%s4565_s28 + $0xb8] sm:$0xf] }
 0x118   : > { %2209 = vrot.lane.b32.xlu1 %v4013_v34, %s4479_s30  ;;  %v2780_v57 = vrot.slane %v2779_v48, 4  ;;  %v2802_v58 = vrot.slane %v2800_v49, 4  ;;  %v2808_v59 = vrot.slane %v2806_v50, 5  ;;  %v720_v62 = vshrl.u32 %v374_v38, 16  ;;  %2238 = vst.msk [vmem:[#allocation2 + $0x30] sm:$0xff] %vm2231_vm12, %v2196_v3 }
 0x119   : > { %v2794_v4 = vrot.slane %v2793_v54, 4  ;;  %v5488_v5 = vsel %vm4558_vm2, %v4188_v51, %v3153_v55  ;;  %v3155_v6 = vrot.slane %v3153_v55, 4  ;;  %v723_v7 = vshll.u32 %v374_v38, 16  ;;  %v379_v28 = vld [vmem:[%s4565_s28 + $0xbc] sm:$0x1] }
 0x11a   : > { %2385 = vrot.lane.b32.xlu0 %v4400_v35, %s4483_s9  ;;  %v2785_v10 = vsel %vm4604_vm5, %v2780_v57, %v2784_v36  ;;  %v2803_v11 = vor.u32 %v2802_v58, %v5474_v45  ;;  %v722_v12 = vrot.slane %v720_v62, 4  ;;  %v729_v13 = vshll.u32 %v375_v46, 16  ;;  %v2198_v22 = vpop.permute.xlu1 %2197  ;;  %v2374_v23 = vpop.permute.xlu0 %2373  ;;  %v922_v35 = vld [vmem:[%s4565_s28 + $0xa8] sm:$0xe]  ;;  %v923_v38 = vld [vmem:[%s4565_s28 + $0xac] sm:$0xf] }
 0x11b   : > { %v4124_v16 = vcombine.low %v2775_v52, %v2785_v10  ;;  %v2799_v14 = vsel %vm4604_vm5, %v2794_v4, %v5474_v45  ;;  %v3157_v18 = vsel %vm4558_vm2, %v3155_v6, %v3156_v56  ;;  %v725_v19 = vrot.slane %v723_v7, 5  ;;  %2239 = vst.msk [vmem:[#allocation2 + $0x38] sm:$0xff] %vm2231_vm12, %v2198_v22  ;;  %v927_v54 = vld [vmem:[%s4565_s28 + $0xbc] sm:$0x1]  ;;  %v3915_v4 = vld [vmem:[%s4565_s28 + $0xb8] sm:$0xf] }
 0x11c   : > { %2387 = vrot.lane.b32.xlu1 %v4401_v47, %s4483_s9  ;;  %v2804_v8 = vrot.slane %v2803_v11, 4  ;;  %v4204_v20 = vcombine.low %v5488_v5, %v3157_v18  ;;  %v731_v21 = vrot.slane %v729_v13, 5  ;;  %v733_v1 = vshrl.u32 %v375_v46, 16  ;;  %2416 = vst.msk [vmem:[#allocation2 + $0x30] sm:$0xff] %vm2409_vm13, %v2374_v23  ;;  %v925_v46 = vld [vmem:[%s4565_s28 + $0xb4] sm:$0xe] }
 0x11d   : > { %v726_v24 = vor.u32 %v725_v19, %v722_v12  ;;  %v739_v25 = vshll.u32 %v376_v61, 16  ;;  %v4189_v26 = vrot.slane %v4167_v2, 9  ;;  %v3160_v27 = vrot.slane %v4168_v15, 5  ;;  %v926_v47 = vld [vmem:[%s4565_s28 + $0xb8] sm:$0xf] }
 0x11e   : > { %2930 = vrot.lane.b32.xlu0 %v4124_v16, %s4484_s17  ;;  %v2809_v30 = vsel %vm4604_vm5, %v2804_v8, %v2808_v59  ;;  %v735_v31 = vrot.slane %v733_v1, 4  ;;  %v3163_v33 = vrot.slane %v4169_v32, 5  ;;  %v744_v34 = vshrl.u32 %v377_v60, 16  ;;  %v2376_v48 = vpop.permute.xlu1 %2375  ;;  %v3914_v61 = vld [vmem:[%s4565_s28 + $0xb4] sm:$0xf] }
 0x11f   : > { %v4125_v42 = vcombine.low %v2799_v14, %v2809_v30  ;;  %v727_v41 = vrot.slane %v726_v24, 4  ;;  %v741_v36 = vrot.slane %v739_v25, 5  ;;  %v3161_v37 = vsel %vm4558_vm2, %v4189_v26, %v3160_v27  ;;  %2417 = vst.msk [vmem:[#allocation2 + $0x38] sm:$0xff] %vm2409_vm13, %v2376_v48  ;;  %v2919_v55 = vpop.permute.xlu0 %2918  ;;  %v3917_v8 = vld [vmem:[%s4565_s28 + $0xc0] sm:$0xf] }
 0x120   : > { %v736_v40 = vor.u32 %v735_v31, %v731_v21  ;;  %v3162_v43 = vrot.slane %v3160_v27, 4  ;;  %v746_v44 = vrot.slane %v744_v34, 4  ;;  %v747_v45 = vshll.u32 %v377_v60, 16  ;;  %2961 = vst.msk [vmem:[#allocation2 + $0x30] sm:$0xff] %vm2954_vm14, %v2919_v55  ;;  %v3916_v60 = vld [vmem:[%s4565_s28 + $0xbc] sm:$0x1] }
 0x121   : > { %2932 = vrot.lane.b32.xlu1 %v4125_v42, %s4484_s17  ;;  %v732_v49 = vsel %vm4604_vm5, %v727_v41, %v731_v21  ;;  %v753_v50 = vshll.u32 %v378_v17, 16  ;;  %v757_v51 = vshrl.u32 %v378_v17, 16  ;;  %v763_v52 = vshll.u32 %v379_v28, 16  ;;  %v3918_v22 = vld [vmem:[%s4565_s28 + $0xc4] sm:$0xf]  ;;  %v4402_v31 = vld [vmem:[%s4565_s28 + $0xb4] sm:$0xff]  }
 0x122   : > { %3251 = vrot.lane.b32.xlu0 %v4204_v20, %s4485_s24  ;;  %v737_v56 = vrot.slane %v736_v40, 4  ;;  %v3164_v57 = vsel %vm4558_vm2, %v3162_v43, %v3163_v33  ;;  %v749_v58 = vrot.slane %v747_v45, 5  ;;  %v3806_v59 = vrot.slane %v922_v35, 9  ;;  %v3919_v23 = vld [vmem:[%s4565_s28 + $0xc8] sm:$0x1] }
 0x123   : > { %v4205_v62 = vcombine.low %v3161_v37, %v3164_v57  ;;  %v755_v63 = vrot.slane %v753_v50, 5  ;;  %v759_v2 = vrot.slane %v757_v51, 4  ;;  %v765_v3 = vrot.slane %v763_v52, 5  ;;  %v3978_v37 = vld [vmem:[%s4565_s28 + $0xb4] sm:$0xe] }
 0x124   : > { %v742_v5 = vsel %vm4604_vm5, %v737_v56, %v741_v36  ;;  %v750_v6 = vor.u32 %v749_v58, %v746_v44  ;;  %v1079_v7 = vrot.slane %v923_v38, 5  ;;  %v1082_v9 = vrot.slane %v924_v39, 5  ;;  %v3979_v38 = vld [vmem:[%s4565_s28 + $0xb8] sm:$0xf]  ;;  %v3980_v45 = vld [vmem:[%s4565_s28 + $0xbc] sm:$0x1] }
 0x125   : > { %v3790_v11 = vcombine.low %v732_v49, %v742_v5  ;;  %v760_v12 = vor.u32 %v759_v2, %v755_v63  ;;  %v3807_v13 = vrot.slane %v925_v46, 9  ;;  %v1086_v15 = vrot.slane %v926_v47, 5  ;;  %v3981_v51 = vld [vmem:[%s4565_s28 + $0xc0] sm:$0xe] }
 0x126   : > { %3253 = vrot.lane.b32.xlu0 %v4205_v62, %s4485_s24  ;;  %v751_v14 = vrot.slane %v750_v6, 4  ;;  %v1080_v18 = vsel %vm4558_vm2, %v3806_v59, %v1079_v7  ;;  %v1081_v19 = vrot.slane %v1079_v7, 4  ;;  %v1089_v32 = vrot.slane %v927_v54, 5  ;;  %v3983_v6 = vld [vmem:[%s4565_s28 + $0xc8] sm:$0x1] }
 0x127   : > { %843 = vrot.lane.b32.xlu1 %v3790_v11, %s4481_s5  ;;  %v761_v20 = vrot.slane %v760_v12, 4  ;;  %v1087_v21 = vsel %vm4558_vm2, %v3807_v13, %v1086_v15  ;;  %v1088_v1 = vrot.slane %v1086_v15, 4  ;;  %v1767_v17 = vshrl.u32 %v3914_v61, 16  ;;  %v4106_v7 = vld [vmem:[%s4565_s28 + $0xc0] sm:$0xf] }
 0x128   : > { %v756_v24 = vsel %vm4604_vm5, %v751_v14, %v755_v63  ;;  %v1083_v25 = vsel %vm4558_vm2, %v1081_v19, %v1082_v9  ;;  %v1770_v26 = vshll.u32 %v3914_v61, 16  ;;  %v1776_v27 = vshll.u32 %v3915_v4, 16  ;;  %v3982_v63 = vld [vmem:[%s4565_s28 + $0xc4] sm:$0xf] }
 0x129   : > { %v766_v28 = vsel %vm4604_vm5, %v761_v20, %v765_v3  ;;  %v3822_v29 = vcombine.low %v1080_v18, %v1083_v25  ;;  %v1090_v30 = vsel %vm4558_vm2, %v1088_v1, %v1089_v32  ;;  %v1769_v33 = vrot.slane %v1767_v17, 4  ;;  %v4403_v9 = vld [vmem:[%s4565_s28 + $0xc0] sm:$0xff]   ;;  %v4108_v25 = vld [vmem:[%s4565_s28 + $0xc8] sm:$0x1] }
 0x12a   : > { %v2921_v10 = vpop.permute.xlu1 %2920  ;;  %v3791_v35 = vcombine.low %v756_v24, %v766_v28  ;;  %v3823_v42 = vcombine.low %v1087_v21, %v1090_v30  ;;  %v1772_v41 = vrot.slane %v1770_v26, 5  ;;  %v5558_v36 = vrot.slane %v1776_v27, 5  ;;  %v4107_v1 = vld [vmem:[%s4565_s28 + $0xc4] sm:$0xf]  ;;  %v4109_v27 = vld [vmem:[%s4565_s28 + $0xcc] sm:$0xf] }
 0x12b   : > { %2962 = vst.msk [vmem:[#allocation2 + $0x38] sm:$0xff] %vm2954_vm14, %v2921_v10  ;;  %1167 = vrot.lane.b32.xlu0 %v3822_v29, %s4480_s4  ;;  %v1780_v39 = vshrl.u32 %v3915_v4, 16  ;;  %v1786_v40 = vshll.u32 %v3916_v60, 16  ;;  %v1791_v43 = vshrl.u32 %v3917_v8, 16  ;;  %v1794_v44 = vshll.u32 %v3917_v8, 16 }
 0x12c   : > { %v3240_v16 = vpop.permute.xlu0 %3239  ;;  %845 = vrot.lane.b32.xlu1 %v3791_v35, %s4481_s5  ;;  %v1773_v46 = vor.u32 %v1772_v41, %v1769_v33  ;;  %v1800_v47 = vshll.u32 %v3918_v22, 16  ;;  %v1804_v48 = vshrl.u32 %v3918_v22, 16  ;;  %v1810_v49 = vshll.u32 %v3919_v23, 16 }
 0x12d   : > { %3282 = vst.msk [vmem:[#allocation2 + $0x30] sm:$0xff] %vm3275_vm15, %v3240_v16  ;;  %v1782_v52 = vrot.slane %v1780_v39, 4  ;;  %v1788_v54 = vrot.slane %v1786_v40, 5  ;;  %v1793_v55 = vrot.slane %v1791_v43, 4  ;;  %v1796_v56 = vrot.slane %v1794_v44, 5 }
 0x12e   : > { %v1774_v58 = vrot.slane %v1773_v46, 4  ;;  %v1802_v59 = vrot.slane %v1800_v47, 5  ;;  %v1806_v61 = vrot.slane %v1804_v48, 4  ;;  %v1812_v62 = vrot.slane %v1810_v49, 5  ;;  %v4111_v46 = vld [vmem:[%s4565_s28 + $0xd4] sm:$0x1] }
 0x12f   : > { %v832_v50 = vpop.permute.xlu1 %831  ;;  %1345 = vrot.lane.b32.xlu0 %v4402_v31, %s4478_s29  ;;  %v1783_v2 = vor.u32 %v1782_v52, %v5558_v36  ;;  %v1797_v3 = vor.u32 %v1796_v56, %v1793_v55  ;;  %v3998_v4 = vrot.slane %v3978_v37, 9  ;;  %v2123_v5 = vrot.slane %v3979_v38, 5  ;;  %v4170_v49 = vld [vmem:[%s4565_s28 + $0xc0] sm:$0xe]  ;;  %v4171_v55 = vld [vmem:[%s4565_s28 + $0xc4] sm:$0xf] }
 0x130   : > { %v3242_v34 = vpop.permute.xlu0 %3241  ;;  %872 = vst.msk [vmem:[#allocation2 + $0x40] sm:$0xff] %vm863_vm8, %v832_v50  ;;  %1169 = vrot.lane.b32.xlu1 %v3823_v42, %s4480_s4  ;;  %v1779_v10 = vsel %vm4604_vm5, %v1774_v58, %v5558_v36  ;;  %v1807_v11 = vor.u32 %v1806_v61, %v1802_v59  ;;  %v2126_v12 = vrot.slane %v3980_v45, 5  ;;  %v3999_v13 = vrot.slane %v3981_v51, 9  ;;  %v4172_v56 = vld [vmem:[%s4565_s28 + $0xc8] sm:$0x1] }
 0x131   : > { %3283 = vst.msk [vmem:[#allocation2 + $0x38] sm:$0xff] %vm3275_vm15, %v3242_v34  ;;  %v1784_v14 = vrot.slane %v1783_v2, 4  ;;  %v1798_v18 = vrot.slane %v1797_v3, 4  ;;  %v2124_v19 = vsel %vm4558_vm2, %v3998_v4, %v2123_v5  ;;  %v2125_v32 = vrot.slane %v2123_v5, 4  ;;  %v4110_v34 = vld [vmem:[%s4565_s28 + $0xd0] sm:$0xf] }
 0x132   : > { %v1808_v8 = vrot.slane %v1807_v11, 4  ;;  %v2130_v20 = vrot.slane %v3982_v63, 5  ;;  %v2133_v21 = vrot.slane %v3983_v6, 5  ;;  %v2811_v17 = vshrl.u32 %v4106_v7, 16  ;;  %v4406_v63 = vld [vmem:[%s4565_s28 + $0xc0] sm:$0xff]  }
 0x133   : > { %v834_v15 = vpop.permute.xlu1 %833  ;;  %v1789_v22 = vsel %vm4604_vm5, %v1784_v14, %v1788_v54  ;;  %v1803_v23 = vsel %vm4604_vm5, %v1798_v18, %v1802_v59  ;;  %v2127_v24 = vsel %vm4558_vm2, %v2125_v32, %v2126_v12  ;;  %v2814_v26 = vshll.u32 %v4106_v7, 16  ;;  %v4174_v6 = vld [vmem:[%s4565_s28 + $0xd0] sm:$0xf] }
 0x134   : > { %v3298_v57 = vld [vmem:[#allocation2 + $0x30] sm:$0xff]  ;;  %v1156_v16 = vpop.permute.xlu0 %1155  ;;  %873 = vst.msk [vmem:[#allocation2 + $0x48] sm:$0xff] %vm863_vm8, %v834_v15  ;;  %1347 = vrot.lane.b32.xlu1 %v4403_v9, %s4478_s29  ;;  %v3934_v28 = vcombine.low %v1779_v10, %v1789_v22  ;;  %v1813_v29 = vsel %vm4604_vm5, %v1808_v8, %v1812_v62  ;;  %v4014_v30 = vcombine.low %v2124_v19, %v2127_v24  ;;  %v2132_v41 = vrot.slane %v2130_v20, 4  ;;  %v4173_v62 = vld [vmem:[%s4565_s28 + $0xcc] sm:$0xe] }
 0x135   : > { %4273 = vmatprep.mubr.bf16.mxu0 %v3298_v57  ;;  %1196 = vst.msk [vmem:[#allocation2 + $0x40] sm:$0xff] %vm1187_vm9, %v1156_v16  ;;  %v2131_v31 = vsel %vm4558_vm2, %v3999_v13, %v2130_v20  ;;  %v3935_v42 = vcombine.low %v1803_v23, %v1813_v29  ;;  %v2813_v36 = vrot.slane %v2811_v17, 4  ;;  %v2816_v37 = vrot.slane %v2814_v26, 5  ;;  %v4175_v13 = vld [vmem:[%s4565_s28 + $0xd4] sm:$0x1]  ;;  %v4407_v15 = vld [vmem:[%s4565_s28 + $0xcc] sm:$0xff]  }
 0x136   : > { %1890 = vrot.lane.b32.xlu0 %v3934_v28, %s4482_s6  ;;  %v2820_v38 = vshll.u32 %v4107_v1, 16  ;;  %v2824_v39 = vshrl.u32 %v4107_v1, 16  ;;  %v2830_v40 = vshll.u32 %v4108_v25, 16  ;;  %v2835_v43 = vshrl.u32 %v4109_v27, 16 }
 0x137   : > { %v1158_v33 = vpop.permute.xlu1 %1157  ;;  %v2134_v44 = vsel %vm4558_vm2, %v2132_v41, %v2133_v21  ;;  %v2817_v45 = vor.u32 %v2816_v37, %v2813_v36  ;;  %v2838_v47 = vshll.u32 %v4109_v27, 16  ;;  %v2844_v48 = vshll.u32 %v4110_v34, 16 }
 0x138   : > { %v3299_v60 = vld [vmem:[#allocation2 + $0x38] sm:$0xff]  ;;  %v1334_v35 = vpop.permute.xlu0 %1333  ;;  %1197 = vst.msk [vmem:[#allocation2 + $0x48] sm:$0xff] %vm1187_vm9, %v1158_v33  ;;  %1892 = vrot.lane.b32.xlu1 %v3935_v42, %s4482_s6  ;;  %v4015_v50 = vcombine.low %v2131_v31, %v2134_v44  ;;  %v2822_v51 = vrot.slane %v2820_v38, 5  ;;  %v2826_v52 = vrot.slane %v2824_v39, 4  ;;  %v2832_v58 = vrot.slane %v2830_v40, 5  ;;  %s4218_s6 = sshll.u32 %s4529_s16, 5 }
 0x139   : > { %4274 = vmatmul.mubr.bf16.gmra.mrb[12].mxu0 %v3299_v60  ;;  %1374 = vst.msk [vmem:[#allocation2 + $0x40] sm:$0xff] %vm1365_vm10, %v1334_v35  ;;  %v2818_v57 = vrot.slane %v2817_v45, 4  ;;  %v2837_v59 = vrot.slane %v2835_v43, 4  ;;  %v2840_v61 = vrot.slane %v2838_v47, 5  ;;  %v2846_v3 = vrot.slane %v2844_v48, 5  ;;  %s5905_s26 = scalar_lea.hbm %s5953_s3, %s4218_s6  ;;  %s4487_s16 = smov [#allocation3]  }
 0x13a   : > { %2211 = vrot.lane.b32.xlu0 %v4014_v30, %s4479_s30  ;;  %v2827_v2 = vor.u32 %v2826_v52, %v2822_v51  ;;  %v2848_v4 = vshrl.u32 %v4110_v34, 16  ;;  %v2854_v5 = vshll.u32 %v4111_v46, 16  ;;  %v4190_v10 = vrot.slane %v4170_v49, 9  ;;  %s4418_s8 = sshll.u32 %s4487_s16, 4  ;;  %s4419_s8 = int_to_ptr.vmem [resolvable:$false] %s4418_s8 }
 0x13b   : > { %v1336_v54 = vpop.permute.xlu1 %1335  ;;  %v2841_v9 = vor.u32 %v2840_v61, %v2837_v59  ;;  %v3167_v11 = vrot.slane %v4171_v55, 5  ;;  %v3170_v12 = vrot.slane %v4172_v56, 5  ;;  %v2823_v16 = vsel %vm4604_vm5, %v2818_v57, %v2822_v51  ;;  %s4420_s10 = scalar_lea.vmem %s4419_s8, 64 }
 0x13c   : > { %1375 = vst.msk [vmem:[#allocation2 + $0x48] sm:$0xff] %vm1365_vm10, %v1336_v54  ;;  %v1879_v7 = vpop.permute.xlu0 %1878  ;;  %2213 = vrot.lane.b32.xlu1 %v4015_v50, %s4479_s30  ;;  %v2828_v14 = vrot.slane %v2827_v2, 4  ;;  %v2850_v18 = vrot.slane %v2848_v4, 4  ;;  %v2856_v32 = vrot.slane %v2854_v5, 5  ;;  %v3174_v8 = vrot.slane %v4174_v6, 5  ;;  %s161_s30 = sand.u32 1, %s4468_s13  }
 0x13d   : > { %1919 = vst.msk [vmem:[#allocation2 + $0x40] sm:$0xff] %vm1910_vm11, %v1879_v7  ;;  %v2842_v19 = vrot.slane %v2841_v9, 4  ;;  %v3169_v60 = vrot.slane %v3167_v11, 4  ;;  %v4191_v17 = vrot.slane %v4173_v62, 9  ;;  %v3177_v22 = vrot.slane %v4175_v13, 5  ;;  %s3758_s4 = sshll.u32 %s161_s30, 1 }
 0x13e   : > { %2389 = vrot.lane.b32.xlu0 %v4406_v63, %s4483_s9  ;;  %v2833_v21 = vsel %vm4604_vm5, %v2828_v14, %v2832_v58  ;;  %v2851_v1 = vor.u32 %v2850_v18, %v2846_v3  ;;  %v3168_v25 = vsel %vm4558_vm2, %v4190_v10, %v3167_v11  ;;  %v3176_v29 = vrot.slane %v3174_v8, 4  ;;  %s5807_s5 = scalar_lea.vmem [#allocation3], %s3758_s4  ;;  %s3682_s27 = scalar_lea.sflag [#allocation4], %s161_s30 }
 0x13f   : > { %v1881_v20 = vpop.permute.xlu1 %1880  ;;  %v4126_v24 = vcombine.low %v2823_v16, %v2833_v21  ;;  %v3171_v26 = vsel %vm4558_vm2, %v3169_v60, %v3170_v12  ;;  %v2847_v27 = vsel %vm4604_vm5, %v2842_v19, %v2846_v3  ;;  %v3175_v34 = vsel %vm4558_vm2, %v4191_v17, %v3174_v8 }
 0x140   : > { %1920 = vst.msk [vmem:[#allocation2 + $0x48] sm:$0xff] %vm1910_vm11, %v1881_v20  ;;  %v2200_v23 = vpop.permute.xlu0 %2199  ;;  %2391 = vrot.lane.b32.xlu1 %v4407_v15, %s4483_s9  ;;  %v2852_v28 = vrot.slane %v2851_v1, 4  ;;  %v4206_v33 = vcombine.low %v3168_v25, %v3171_v26  ;;  %v3178_v35 = vsel %vm4558_vm2, %v3176_v29, %v3177_v22  ;;  %s3695_s9 = sshll.u32 %s5807_s5, 4  ;;  %s5907_s9 = int_to_ptr.vmem [resolvable:$true] %s3695_s9 }
 0x141   : > { %2240 = vst.msk [vmem:[#allocation2 + $0x40] sm:$0xff] %vm2231_vm12, %v2200_v23  ;;  %v4207_v36 = vcombine.low %v3175_v34, %v3178_v35  ;;  %s4414_s7 = scalar_lea.vmem %s5907_s9, 32  ;;  %p4421_p0 = scmp.lt.s32.totalorder %s5907_s9, %s4419_s8 }
 0x142   : > { %2934 = vrot.lane.b32.xlu0 %v4126_v24, %s4484_s17  ;;  %v2857_v31 = vsel %vm4604_vm5, %v2852_v28, %v2856_v32  ;;  %p4415_p11 = scmp.ne.s32.totalorder %s5907_s9, %s4414_s7  ;;  %p4422_p1 = scmp.lt.s32.totalorder %s4420_s10, %s4414_s7 }
 0x143   : > { %v2202_v30 = vpop.permute.xlu1 %2201  ;;  %v4127_v41 = vcombine.low %v2847_v27, %v2857_v31 }
 0x144   : > { %2241 = vst.msk [vmem:[#allocation2 + $0x48] sm:$0xff] %vm2231_vm12, %v2202_v30  ;;  %v2378_v42 = vpop.permute.xlu0 %2377  ;;  %p4416_p12 = pnand %p4415_p11, %p4546_p5  ;;  %p4423_p2 = por %p4422_p1, %p4421_p0 }
 0x145   : > { %2418 = vst.msk [vmem:[#allocation2 + $0x40] sm:$0xff] %vm2409_vm13, %v2378_v42  ;;  %2936 = vrot.lane.b32.xlu1 %v4127_v41, %s4484_s17 }
 0x146   : > { %3255 = vrot.lane.b32.xlu0 %v4206_v33, %s4485_s24  ;;  %p4417_p13 = pneg %p4416_p12 }
 0x147   : > { %v2380_v37 = vpop.permute.xlu1 %2379 }
 0x148   : > { %2419 = vst.msk [vmem:[#allocation2 + $0x48] sm:$0xff] %vm2409_vm13, %v2380_v37  ;;  %v2923_v53 = vpop.permute.xlu0 %2922  ;;  %p4424_p3 = pnand %p4423_p2, %p4417_p13 }
 0x149   : > { %2963 = vst.msk [vmem:[#allocation2 + $0x40] sm:$0xff] %vm2954_vm14, %v2923_v53  ;;  %3257 = vrot.lane.b32.xlu1 %v4207_v36, %s4485_s24 }
 0x14b   : > { %v2925_v0 = vpop.permute.xlu1 %2924 }
 0x14c   : > { %2964 = vst.msk [vmem:[#allocation2 + $0x48] sm:$0xff] %vm2954_vm14, %v2925_v0  ;;  %v3244_v38 = vpop.permute.xlu0 %3243 }
 0x14d   : > { %3284 = vst.msk [vmem:[#allocation2 + $0x40] sm:$0xff] %vm3275_vm15, %v3244_v38 }
 0x150   : > { %v3246_v39 = vpop.permute.xlu0 %3245 }
 0x151   : > { %3285 = vst.msk [vmem:[#allocation2 + $0x48] sm:$0xff] %vm3275_vm15, %v3246_v39 }
 0x152   : > { %v836_v40 = vpop.permute.xlu1 %835 }
 0x153   : > { %874 = vst.msk [vmem:[#allocation2 + $0x50] sm:$0xff] %vm863_vm8, %v836_v40 }
 0x154   : > { %v3300_v43 = vld [vmem:[#allocation2 + $0x40] sm:$0xff] }
 0x155   : > { %4277 = vmatprep.mubr.bf16.mxu1 %v3300_v43  ;;  %v1160_v44 = vpop.permute.xlu0 %1159 }
 0x156   : > { %v838_v45 = vpop.permute.xlu1 %837  ;;  %1198 = vst.msk [vmem:[#allocation2 + $0x50] sm:$0xff] %vm1187_vm9, %v1160_v44 }
 0x157   : > { %875 = vst.msk [vmem:[#allocation2 + $0x58] sm:$0xff] %vm863_vm8, %v838_v45 }
 0x158   : > { %v3301_v46 = vld [vmem:[#allocation2 + $0x48] sm:$0xff] }
 0x159   : > { %4278 = vmatmul.mubr.bf16.vlgmr.msra.gmra.mrb[0].mxu1 %v3301_v46  ;;  %v1338_v47 = vpop.permute.xlu0 %1337 }
 0x15a   : > { %v1162_v48 = vpop.permute.xlu1 %1161  ;;  %1376 = vst.msk [vmem:[#allocation2 + $0x50] sm:$0xff] %vm1365_vm10, %v1338_v47 }
 0x15b   : > { %1199 = vst.msk [vmem:[#allocation2 + $0x58] sm:$0xff] %vm1187_vm9, %v1162_v48 }
 0x15e   : > { %v1340_v49 = vpop.permute.xlu1 %1339  ;;  %v1883_v50 = vpop.permute.xlu0 %1882 }
 0x15f   : > { %1377 = vst.msk [vmem:[#allocation2 + $0x58] sm:$0xff] %vm1365_vm10, %v1340_v49 }
 0x160   : > { %1921 = vst.msk [vmem:[#allocation2 + $0x50] sm:$0xff] %vm1910_vm11, %v1883_v50  ;;  %v5698_v50 = vld [vmem:[%s5952_s2] ss:$0 sm:$0xff] }
 0x162   : > { %v1885_v51 = vpop.permute.xlu1 %1884  ;;  %v2204_v52 = vpop.permute.xlu0 %2203 }
 0x163   : > { %1922 = vst.msk [vmem:[#allocation2 + $0x58] sm:$0xff] %vm1910_vm11, %v1885_v51 }
 0x164   : > { %2242 = vst.msk [vmem:[#allocation2 + $0x50] sm:$0xff] %vm2231_vm12, %v2204_v52 }
 0x166   : > { %v2206_v54 = vpop.permute.xlu1 %2205  ;;  %v2382_v55 = vpop.permute.xlu0 %2381 }
 0x167   : > { %2243 = vst.msk [vmem:[#allocation2 + $0x58] sm:$0xff] %vm2231_vm12, %v2206_v54 }
 0x168   : > { %2420 = vst.msk [vmem:[#allocation2 + $0x50] sm:$0xff] %vm2409_vm13, %v2382_v55 }
 0x16a   : > { %v2384_v56 = vpop.permute.xlu1 %2383 }
 0x16b   : > { %2421 = vst.msk [vmem:[#allocation2 + $0x58] sm:$0xff] %vm2409_vm13, %v2384_v56  ;;  %v2927_v57 = vpop.permute.xlu0 %2926 }
 0x16c   : > { %2965 = vst.msk [vmem:[#allocation2 + $0x50] sm:$0xff] %vm2954_vm14, %v2927_v57 }
 0x16e   : > { %v2929_v58 = vpop.permute.xlu1 %2928 }
 0x16f   : > { %2966 = vst.msk [vmem:[#allocation2 + $0x58] sm:$0xff] %vm2954_vm14, %v2929_v58  ;;  %v3248_v59 = vpop.permute.xlu0 %3247 }
 0x170   : > { %3286 = vst.msk [vmem:[#allocation2 + $0x50] sm:$0xff] %vm3275_vm15, %v3248_v59 }
 0x173   : > { %v3250_v61 = vpop.permute.xlu0 %3249 }
 0x174   : > { %3287 = vst.msk [vmem:[#allocation2 + $0x58] sm:$0xff] %vm3275_vm15, %v3250_v61 }
 0x175   : > { %v840_v62 = vpop.permute.xlu1 %839 }
 0x176   : > { %876 = vst.msk [vmem:[#allocation2 + $0x60] sm:$0xff] %vm863_vm8, %v840_v62 }
 0x177   : > { %v3302_v63 = vld [vmem:[#allocation2 + $0x50] sm:$0xff] }
 0x178   : > { %4281 = vmatprep.mubr.bf16.mxu1 %v3302_v63 }
 0x179   : > { %v1164_v2 = vpop.permute.xlu0 %1163 }
 0x17a   : > { %v842_v3 = vpop.permute.xlu1 %841  ;;  %1200 = vst.msk [vmem:[#allocation2 + $0x60] sm:$0xff] %vm1187_vm9, %v1164_v2 }
 0x17b   : > { %877 = vst.msk [vmem:[#allocation2 + $0x68] sm:$0xff] %vm863_vm8, %v842_v3  ;;  %v3303_v4 = vld [vmem:[#allocation2 + $0x58] sm:$0xff] }
 0x17c   : > { %4282 = vmatmul.mubr.bf16.gmra.mrb[4].mxu1 %v3303_v4 }
 0x17d   : > { %v1342_v5 = vpop.permute.xlu0 %1341 }
 0x17e   : > { %v1166_v6 = vpop.permute.xlu1 %1165  ;;  %1378 = vst.msk [vmem:[#allocation2 + $0x60] sm:$0xff] %vm1365_vm10, %v1342_v5 }
 0x17f   : > { %1201 = vst.msk [vmem:[#allocation2 + $0x68] sm:$0xff] %vm1187_vm9, %v1166_v6 }
 0x182   : > { %v1344_v7 = vpop.permute.xlu1 %1343 }
 0x183   : > { %1379 = vst.msk [vmem:[#allocation2 + $0x68] sm:$0xff] %vm1365_vm10, %v1344_v7 }
 0x184   : > { %v1887_v9 = vpop.permute.xlu0 %1886 }
 0x185   : > { %1923 = vst.msk [vmem:[#allocation2 + $0x60] sm:$0xff] %vm1910_vm11, %v1887_v9 }
 0x186   : > { %v1889_v10 = vpop.permute.xlu1 %1888 }
 0x187   : > { %1924 = vst.msk [vmem:[#allocation2 + $0x68] sm:$0xff] %vm1910_vm11, %v1889_v10 }
 0x188   : > { %v2208_v11 = vpop.permute.xlu0 %2207 }
 0x189   : > { %2244 = vst.msk [vmem:[#allocation2 + $0x60] sm:$0xff] %vm2231_vm12, %v2208_v11 }
 0x18a   : > { %v2210_v12 = vpop.permute.xlu1 %2209 }
 0x18b   : > { %2245 = vst.msk [vmem:[#allocation2 + $0x68] sm:$0xff] %vm2231_vm12, %v2210_v12 }
 0x18c   : > { %v2386_v13 = vpop.permute.xlu0 %2385 }
 0x18d   : > { %2422 = vst.msk [vmem:[#allocation2 + $0x60] sm:$0xff] %vm2409_vm13, %v2386_v13 }
 0x18e   : > { %v2388_v15 = vpop.permute.xlu1 %2387 }
 0x18f   : > { %2423 = vst.msk [vmem:[#allocation2 + $0x68] sm:$0xff] %vm2409_vm13, %v2388_v15 }
 0x190   : > { %v2931_v16 = vpop.permute.xlu0 %2930 }
 0x191   : > { %2967 = vst.msk [vmem:[#allocation2 + $0x60] sm:$0xff] %vm2954_vm14, %v2931_v16 }
 0x193   : > { %v2933_v14 = vpop.permute.xlu1 %2932 }
 0x194   : > { %2968 = vst.msk [vmem:[#allocation2 + $0x68] sm:$0xff] %vm2954_vm14, %v2933_v14  ;;  %v3252_v18 = vpop.permute.xlu0 %3251 }
 0x195   : > { %3288 = vst.msk [vmem:[#allocation2 + $0x60] sm:$0xff] %vm3275_vm15, %v3252_v18 }
 0x198   : > { %v3254_v19 = vpop.permute.xlu0 %3253 }
 0x199   : > { %v844_v32 = vpop.permute.xlu1 %843  ;;  %3289 = vst.msk [vmem:[#allocation2 + $0x68] sm:$0xff] %vm3275_vm15, %v3254_v19 }
 0x19a   : > { %878 = vst.msk [vmem:[#allocation2 + $0x70] sm:$0xff] %vm863_vm8, %v844_v32 }
 0x19c   : > { %v3304_v60 = vld [vmem:[#allocation2 + $0x60] sm:$0xff]  ;;  %v4263_v21 = vpop.f32.mrb[0].mxu0 }
 0x19d   : > { %v1168_v8 = vpop.permute.xlu0 %1167  ;;  %4285 = vmatprep.mubr.bf16.mxu1 %v3304_v60  ;;  %v3413_v17 = vpop.f32.mrb[1].mxu0  ;;  %v5709_v55 = vadd.f32 %v4263_v21, %v5698_v50 }
 0x19e   : > { %v846_v20 = vpop.permute.xlu1 %845  ;;  %1202 = vst.msk [vmem:[#allocation2 + $0x70] sm:$0xff] %vm1187_vm9, %v1168_v8  ;;  %v4264_v23 = vpop.f32.mrb[2].mxu0  ;;  %v5704_v52 = vadd.f32 %v5698_v50, %v3413_v17 }
 0x19f   : > { %879 = vst.msk [vmem:[#allocation2 + $0x78] sm:$0xff] %vm863_vm8, %v846_v20  ;;  %v3416_v25 = vpop.f32.mrb[3].mxu0  ;;  %v5713_v61 = vadd.f32 %v4264_v23, %v5698_v50 }
 0x1a0   : > { %v3305_v1 = vld [vmem:[#allocation2 + $0x68] sm:$0xff]  ;;  %v5701_v51 = vadd.f32 %v5698_v50, %v3416_v25 }
 0x1a1   : > { %v1346_v22 = vpop.permute.xlu0 %1345  ;;  %4286 = vmatmul.mubr.bf16.gmra.mrb[8].mxu1 %v3305_v1 }
 0x1a2   : > { %v1170_v24 = vpop.permute.xlu1 %1169  ;;  %1380 = vst.msk [vmem:[#allocation2 + $0x70] sm:$0xff] %vm1365_vm10, %v1346_v22  ;;  %v3540_v54 = vadd.f32 %v5701_v51, %v5704_v52 }
 0x1a3   : > { %1203 = vst.msk [vmem:[#allocation2 + $0x78] sm:$0xff] %vm1187_vm9, %v1170_v24 }
 0x1a4   : > { %v3541_v57 = vadd.f32 %v3540_v54, %v5709_v55 }
 0x1a6   : > { %v1348_v26 = vpop.permute.xlu1 %1347  ;;  %v3542_v2 = vadd.f32 %v3541_v57, %v5713_v61 }
 0x1a7   : > { %1381 = vst.msk [vmem:[#allocation2 + $0x78] sm:$0xff] %vm1365_vm10, %v1348_v26 }
 0x1a8   : > { %v1891_v27 = vpop.permute.xlu0 %1890 }
 0x1a9   : > { %1925 = vst.msk [vmem:[#allocation2 + $0x70] sm:$0xff] %vm1910_vm11, %v1891_v27 }
 0x1aa   : > { %v1893_v28 = vpop.permute.xlu1 %1892 }
 0x1ab   : > { %1926 = vst.msk [vmem:[#allocation2 + $0x78] sm:$0xff] %vm1910_vm11, %v1893_v28 }
 0x1ac   : > { %v2212_v29 = vpop.permute.xlu0 %2211 }
 0x1ad   : > { %2246 = vst.msk [vmem:[#allocation2 + $0x70] sm:$0xff] %vm2231_vm12, %v2212_v29 }
 0x1ae   : > { %v2214_v30 = vpop.permute.xlu1 %2213 }
 0x1af   : > { %2247 = vst.msk [vmem:[#allocation2 + $0x78] sm:$0xff] %vm2231_vm12, %v2214_v30 }
 0x1b0   : > { %v2390_v31 = vpop.permute.xlu0 %2389 }
 0x1b1   : > { %2424 = vst.msk [vmem:[#allocation2 + $0x70] sm:$0xff] %vm2409_vm13, %v2390_v31 }
 0x1b2   : > { %v2392_v33 = vpop.permute.xlu1 %2391 }
 0x1b3   : > { %2425 = vst.msk [vmem:[#allocation2 + $0x78] sm:$0xff] %vm2409_vm13, %v2392_v33 }
 0x1b4   : > { %v2935_v34 = vpop.permute.xlu0 %2934 }
 0x1b5   : > { %2969 = vst.msk [vmem:[#allocation2 + $0x70] sm:$0xff] %vm2954_vm14, %v2935_v34 }
 0x1b7   : > { %v2937_v35 = vpop.permute.xlu1 %2936 }
 0x1b8   : > { %2970 = vst.msk [vmem:[#allocation2 + $0x78] sm:$0xff] %vm2954_vm14, %v2937_v35  ;;  %v3256_v42 = vpop.permute.xlu0 %3255 }
 0x1b9   : > { %3290 = vst.msk [vmem:[#allocation2 + $0x70] sm:$0xff] %vm3275_vm15, %v3256_v42 }
 0x1bb   : > { %v3258_v41 = vpop.permute.xlu1 %3257 }
 0x1bc   : > { %3291 = vst.msk [vmem:[#allocation2 + $0x78] sm:$0xff] %vm3275_vm15, %v3258_v41 }
 0x1bd   : > { %v4267_v36 = vpop.f32.mrb[4].mxu0 }
 0x1be   : > { %v3429_v37 = vpop.f32.mrb[5].mxu0  ;;  %v5725_v6 = vadd.f32 %v4267_v36, %v5698_v50 }
 0x1bf   : > { %v4268_v53 = vpop.f32.mrb[6].mxu0  ;;  %v5716_v62 = vadd.f32 %v5698_v50, %v3429_v37 }
 0x1c0   : > { %v3306_v0 = vld [vmem:[#allocation2 + $0x70] sm:$0xff]  ;;  %v3432_v38 = vpop.f32.mrb[7].mxu0  ;;  %v5729_v9 = vadd.f32 %v4268_v53, %v5698_v50 }
 0x1c1   : > { %4289 = vmatprep.mubr.bf16.mxu1 %v3306_v0  ;;  %v3543_v3 = vadd.f32 %v3542_v2, %v5716_v62  ;;  %v5721_v4 = vadd.f32 %v5698_v50, %v3432_v38 }
 0x1c3   : > { %v3307_v39 = vld [vmem:[#allocation2 + $0x78] sm:$0xff]  ;;  %v3544_v5 = vadd.f32 %v3543_v3, %v5721_v4 }
 0x1c4   : > { %4290 = vmatmul.mubr.bf16.gmra.mrb[12].mxu1 %v3307_v39 }
 0x1c5   : > { %v3545_v7 = vadd.f32 %v3544_v5, %v5725_v6 }
 0x1c7   : > { %v3546_v11 = vadd.f32 %v3545_v7, %v5729_v9 }
 0x1df   : > { %v4271_v40 = vpop.f32.mrb[8].mxu0 }
 0x1e0   : > { %v3445_v43 = vpop.f32.mrb[9].mxu0  ;;  %v5741_v16 = vadd.f32 %v4271_v40, %v5698_v50 }
 0x1e1   : > { %v4272_v44 = vpop.f32.mrb[10].mxu0  ;;  %v5732_v10 = vadd.f32 %v5698_v50, %v3445_v43 }
 0x1e2   : > { %v3448_v45 = vpop.f32.mrb[11].mxu0  ;;  %v5745_v18 = vadd.f32 %v4272_v44, %v5698_v50 }
 0x1e3   : > { %v3547_v12 = vadd.f32 %v3546_v11, %v5732_v10  ;;  %v5737_v13 = vadd.f32 %v5698_v50, %v3448_v45 }
 0x1e5   : > { %v3548_v15 = vadd.f32 %v3547_v12, %v5737_v13 }
 0x1e7   : > { %v3549_v14 = vadd.f32 %v3548_v15, %v5741_v16 }
 0x1e9   : > { %v3550_v32 = vadd.f32 %v3549_v14, %v5745_v18 }
 0x20c   : > { %v4275_v46 = vpop.f32.mrb[12].mxu0 }
 0x20d   : > { %v3461_v47 = vpop.f32.mrb[13].mxu0  ;;  %v5757_v23 = vadd.f32 %v4275_v46, %v5698_v50 }
 0x20e   : > { %v4276_v48 = vpop.f32.mrb[14].mxu0  ;;  %v5748_v19 = vadd.f32 %v5698_v50, %v3461_v47 }
 0x20f   : > { %v3464_v49 = vpop.f32.mrb[15].mxu0  ;;  %v5761_v25 = vadd.f32 %v4276_v48, %v5698_v50 }
 0x210   : > { %v3551_v60 = vadd.f32 %v3550_v32, %v5748_v19  ;;  %v5753_v8 = vadd.f32 %v5698_v50, %v3464_v49 }
 0x212   : > { %v3552_v17 = vadd.f32 %v3551_v60, %v5753_v8 }
 0x214   : > { %v3553_v24 = vadd.f32 %v3552_v17, %v5757_v23 }
 0x216   : > { %v3554_v27 = vadd.f32 %v3553_v24, %v5761_v25 }
 0x22c   : > { %v4279_v56 = vpop.f32.mrb[0].mxu1 }
 0x22d   : > { %v3477_v58 = vpop.f32.mrb[1].mxu1  ;;  %v5773_v31 = vadd.f32 %v4279_v56, %v5698_v50 }
 0x22e   : > { %v4280_v59 = vpop.f32.mrb[2].mxu1  ;;  %v5764_v26 = vadd.f32 %v5698_v50, %v3477_v58 }
 0x22f   : > { %v3480_v63 = vpop.f32.mrb[3].mxu1  ;;  %v5777_v34 = vadd.f32 %v4280_v59, %v5698_v50 }
 0x230   : > { %v3555_v28 = vadd.f32 %v3554_v27, %v5764_v26  ;;  %v5769_v29 = vadd.f32 %v5698_v50, %v3480_v63 }
 0x232   : > { %v3556_v30 = vadd.f32 %v3555_v28, %v5769_v29 }
 0x234   : > { %v3557_v33 = vadd.f32 %v3556_v30, %v5773_v31 }
 0x236   : > { %v3558_v42 = vadd.f32 %v3557_v33, %v5777_v34 }
 0x24f   : > { %v4283_v20 = vpop.f32.mrb[4].mxu1 }
 0x250   : > { %v3493_v21 = vpop.f32.mrb[5].mxu1  ;;  %v5789_v53 = vadd.f32 %v4283_v20, %v5698_v50 }
 0x251   : > { %v4284_v1 = vpop.f32.mrb[6].mxu1  ;;  %v5780_v35 = vadd.f32 %v5698_v50, %v3493_v21 }
 0x252   : > { %v3496_v22 = vpop.f32.mrb[7].mxu1  ;;  %v5793_v38 = vadd.f32 %v4284_v1, %v5698_v50 }
 0x253   : > { %v3559_v41 = vadd.f32 %v3558_v42, %v5780_v35  ;;  %v5785_v36 = vadd.f32 %v5698_v50, %v3496_v22 }
 0x255   : > { %v3560_v37 = vadd.f32 %v3559_v41, %v5785_v36 }
 0x257   : > { %v3561_v0 = vadd.f32 %v3560_v37, %v5789_v53 }
 0x259   : > { %v3562_v44 = vadd.f32 %v3561_v0, %v5793_v38 }
 0x274   : > { %v4287_v39 = vpop.f32.mrb[8].mxu1 }
 0x275   : > { %v3509_v40 = vpop.f32.mrb[9].mxu1  ;;  %v3518_v49 = vadd.f32 %v4287_v39, %v5698_v50 }
 0x276   : > { %v3510_v43 = vadd.f32 %v5698_v50, %v3509_v40  ;;  %v4288_v45 = vpop.f32.mrb[10].mxu1 }
 0x277   : > { %v3512_v46 = vpop.f32.mrb[11].mxu1  ;;  %v3521_v56 = vadd.f32 %v4288_v45, %v5698_v50 }
 0x278   : > { %v3563_v47 = vadd.f32 %v3562_v44, %v3510_v43  ;;  %v3513_v48 = vadd.f32 %v5698_v50, %v3512_v46 }
 0x27a   : > { %v3564_v54 = vadd.f32 %v3563_v47, %v3513_v48 }
 0x27c   : > { %v3565_v57 = vadd.f32 %v3564_v54, %v3518_v49 }
 0x27e   : > { %v3566_v58 = vadd.f32 %v3565_v57, %v3521_v56 }
 0x297   : > { %v4291_v59 = vpop.f32.mrb[12].mxu1 }
 0x298   : > { %v3525_v63 = vpop.f32.mrb[13].mxu1  ;;  %v3534_v12 = vadd.f32 %v4291_v59, %v5698_v50 }
 0x299   : > { %v3526_v2 = vadd.f32 %v5698_v50, %v3525_v63  ;;  %v4292_v3 = vpop.f32.mrb[14].mxu1 }
 0x29a   : > { %v3528_v5 = vpop.f32.mrb[15].mxu1  ;;  %v3537_v14 = vadd.f32 %v4292_v3, %v5698_v50 }
 0x29b   : > { %v3567_v7 = vadd.f32 %v3566_v58, %v3526_v2  ;;  %v3529_v11 = vadd.f32 %v5698_v50, %v3528_v5 }
 0x29d   : > { %v3568_v15 = vadd.f32 %v3567_v7, %v3529_v11 }
 0x29f   : > { %v3569_v32 = vadd.f32 %v3568_v15, %v3534_v12 }
 0x2a1   : > { %v3570_v60 = vadd.f32 %v3569_v32, %v3537_v14 }
 0x2a3   : > { %v3571_v20 = vrot.slane %v3570_v60, 4 }
 0x2a5   : > { %v3572_v21 = vadd.f32 %v3571_v20, %v3570_v60 }
 0x2a7   : > { %v3573_v1 = vrot.slane %v3572_v21, 2 }
 0x2a9   : > { %v3574_v17 = vadd.f32 %v3573_v1, %v3572_v21 }
 0x2ab   : > { %v3575_v22 = vrot.slane %v3574_v17, 1 }
 0x2ad   : > { %v3576_v24 = vadd.f32 %v3575_v22, %v3574_v17 }
 0x2af   : > { %3679 = vst [vmem:[%s5807_s5] sm:$0x1] %v3576_v24  ;;  %v5810_v27 = vmul.f32 0.00390625, %v3576_v24 }
 0x2b1   : > { %v5813_v28 = vsub.f32 %v3510_v43, %v5810_v27  ;;  %v5816_v50 = vsub.f32 %v3513_v48, %v5810_v27  ;;  %v5819_v30 = vsub.f32 %v3518_v49, %v5810_v27  ;;  %v5822_v33 = vsub.f32 %v3521_v56, %v5810_v27 }
 0x2b2   : > { %v5825_v42 = vsub.f32 %v3526_v2, %v5810_v27  ;;  %v5828_v41 = vsub.f32 %v3529_v11, %v5810_v27  ;;  %v5831_v37 = vsub.f32 %v3534_v12, %v5810_v27  ;;  %v5834_v0 = vsub.f32 %v3537_v14, %v5810_v27 }
 0x2b3   : > { %v3578_v39 = vsub.f32 %v5704_v52, %v5810_v27  ;;  %v3579_v40 = vsub.f32 %v5701_v51, %v5810_v27  ;;  %v3580_v43 = vsub.f32 %v5709_v55, %v5810_v27  ;;  %v3581_v46 = vsub.f32 %v5713_v61, %v5810_v27 }
 0x2b4   : > { %v3582_v47 = vsub.f32 %v5716_v62, %v5810_v27  ;;  %v3583_v54 = vsub.f32 %v5721_v4, %v5810_v27  ;;  %v3584_v51 = vsub.f32 %v5725_v6, %v5810_v27  ;;  %v3585_v58 = vsub.f32 %v5729_v9, %v5810_v27 }
 0x2b5   : > { %v3610_v44 = vmul.f32 %v3578_v39, %v3578_v39  ;;  %v3611_v45 = vmul.f32 %v3579_v40, %v3579_v40  ;;  %v3612_v48 = vmul.f32 %v3580_v43, %v3580_v43  ;;  %v3613_v52 = vmul.f32 %v3581_v46, %v3581_v46 }
 0x2b6   : > { %v3614_v57 = vmul.f32 %v3582_v47, %v3582_v47  ;;  %v3615_v59 = vmul.f32 %v3583_v54, %v3583_v54  ;;  %v3586_v62 = vsub.f32 %v5732_v10, %v5810_v27  ;;  %v3616_v63 = vmul.f32 %v3584_v51, %v3584_v51 }
 0x2b7   : > { %v3642_v49 = vadd.f32 %v3611_v45, %v3610_v44  ;;  %v3587_v4 = vsub.f32 %v5737_v13, %v5810_v27  ;;  %v3617_v3 = vmul.f32 %v3585_v58, %v3585_v58  ;;  %v3588_v6 = vsub.f32 %v5741_v16, %v5810_v27 }
 0x2b8   : > { %v3618_v7 = vmul.f32 %v3586_v62, %v3586_v62  ;;  %v3589_v9 = vsub.f32 %v5745_v18, %v5810_v27  ;;  %v3590_v10 = vsub.f32 %v5748_v19, %v5810_v27  ;;  %v3591_v13 = vsub.f32 %v5753_v8, %v5810_v27 }
 0x2b9   : > { %v3643_v56 = vadd.f32 %v3642_v49, %v3612_v48  ;;  %v3619_v12 = vmul.f32 %v3587_v4, %v3587_v4  ;;  %v3620_v14 = vmul.f32 %v3588_v6, %v3588_v6  ;;  %v3592_v16 = vsub.f32 %v5757_v23, %v5810_v27 }
 0x2ba   : > { %v3621_v60 = vmul.f32 %v3589_v9, %v3589_v9  ;;  %v3622_v21 = vmul.f32 %v3590_v10, %v3590_v10  ;;  %v3593_v18 = vsub.f32 %v5761_v25, %v5810_v27  ;;  %v3623_v17 = vmul.f32 %v3591_v13, %v3591_v13 }
 0x2bb   : > { %v3644_v55 = vadd.f32 %v3643_v56, %v3613_v52  ;;  %v3594_v19 = vsub.f32 %v5764_v26, %v5810_v27  ;;  %v3624_v24 = vmul.f32 %v3592_v16, %v3592_v16  ;;  %v3595_v8 = vsub.f32 %v5769_v29, %v5810_v27 }
 0x2bc   : > { %v3625_v40 = vmul.f32 %v3593_v18, %v3593_v18  ;;  %v3596_v23 = vsub.f32 %v5773_v31, %v5810_v27  ;;  %v3597_v25 = vsub.f32 %v5777_v34, %v5810_v27  ;;  %v3598_v26 = vsub.f32 %v5780_v35, %v5810_v27 }
 0x2bd   : > { %v3645_v61 = vadd.f32 %v3644_v55, %v3614_v57  ;;  %v3626_v44 = vmul.f32 %v3594_v19, %v3594_v19  ;;  %v3627_v46 = vmul.f32 %v3595_v8, %v3595_v8  ;;  %v3599_v29 = vsub.f32 %v5785_v36, %v5810_v27 }
 0x2be   : > { %v3628_v48 = vmul.f32 %v3596_v23, %v3596_v23  ;;  %v3629_v54 = vmul.f32 %v3597_v25, %v3597_v25  ;;  %v3600_v31 = vsub.f32 %v5789_v53, %v5810_v27  ;;  %v3630_v56 = vmul.f32 %v3598_v26, %v3598_v26 }
 0x2bf   : > { %v3646_v2 = vadd.f32 %v3645_v61, %v3615_v59  ;;  %v3601_v34 = vsub.f32 %v5793_v38, %v5810_v27  ;;  %v3631_v57 = vmul.f32 %v3599_v29, %v3599_v29  ;;  %v3634_v62 = vmul.f32 %v5813_v28, %v5813_v28 }
 0x2c0   : > { %v3632_v58 = vmul.f32 %v3600_v31, %v3600_v31  ;;  %v3636_v53 = vmul.f32 %v5819_v30, %v5819_v30  ;;  %v3637_v38 = vmul.f32 %v5822_v33, %v5822_v33  ;;  %v3639_v28 = vmul.f32 %v5828_v41, %v5828_v41 }
 0x2c1   : > { %v3647_v5 = vadd.f32 %v3646_v2, %v3616_v63  ;;  %v3633_v35 = vmul.f32 %v3601_v34, %v3601_v34  ;;  %v3635_v63 = vmul.f32 %v5816_v50, %v5816_v50  ;;  %v3640_v50 = vmul.f32 %v5831_v37, %v5831_v37 }
 0x2c3   : > { %v3648_v11 = vadd.f32 %v3647_v5, %v3617_v3  ;;  %v3638_v3 = vmul.f32 %v5825_v42, %v5825_v42 }
 0x2c5   : > { %v3649_v15 = vadd.f32 %v3648_v11, %v3618_v7  ;;  %v3641_v7 = vmul.f32 %v5834_v0, %v5834_v0 }
 0x2c7   : > { %v3650_v32 = vadd.f32 %v3649_v15, %v3619_v12 }
 0x2c9   : > { %v3651_v20 = vadd.f32 %v3650_v32, %v3620_v14 }
 0x2cb   : > { %v3652_v1 = vadd.f32 %v3651_v20, %v3621_v60 }
 0x2cd   : > { %v3653_v22 = vadd.f32 %v3652_v1, %v3622_v21 }
 0x2cf   : > { %v3654_v39 = vadd.f32 %v3653_v22, %v3623_v17 }
 0x2d1   : > { %v3655_v43 = vadd.f32 %v3654_v39, %v3624_v24 }
 0x2d3   : > { %v3656_v45 = vadd.f32 %v3655_v43, %v3625_v40 }
 0x2d5   : > { %v3657_v47 = vadd.f32 %v3656_v45, %v3626_v44 }
 0x2d7   : > { %v3658_v49 = vadd.f32 %v3657_v47, %v3627_v46 }
 0x2d9   : > { %v3659_v52 = vadd.f32 %v3658_v49, %v3628_v48 }
 0x2db   : > { %v3660_v51 = vadd.f32 %v3659_v52, %v3629_v54 }
 0x2dd   : > { %v3661_v55 = vadd.f32 %v3660_v51, %v3630_v56 }
 0x2df   : > { %v3662_v59 = vadd.f32 %v3661_v55, %v3631_v57 }
 0x2e1   : > { %v3663_v61 = vadd.f32 %v3662_v59, %v3632_v58 }
 0x2e3   : > { %v3664_v36 = vadd.f32 %v3663_v61, %v3633_v35 }
 0x2e5   : > { %v3665_v2 = vadd.f32 %v3664_v36, %v3634_v62 }
 0x2e7   : > { %v3666_v4 = vadd.f32 %v3665_v2, %v3635_v63 }
 0x2e9   : > { %v3667_v27 = vadd.f32 %v3666_v4, %v3636_v53 }
 0x2eb   : > { %v3668_v5 = vadd.f32 %v3667_v27, %v3637_v38 }
 0x2ed   : > { %v3669_v6 = vadd.f32 %v3668_v5, %v3638_v3 }
 0x2ef   : > { %v3670_v30 = vadd.f32 %v3669_v6, %v3639_v28 }
 0x2f1   : > { %v3671_v33 = vadd.f32 %v3670_v30, %v3640_v50 }
 0x2f3   : > { %v3672_v11 = vadd.f32 %v3671_v33, %v3641_v7 }
 0x2f5   : > { %v3673_v9 = vrot.slane %v3672_v11, 4 }
 0x2f7   : > { %v3674_v12 = vadd.f32 %v3673_v9, %v3672_v11 }
 0x2f9   : > { %v3675_v42 = vrot.slane %v3674_v12, 2 }
 0x2fb   : > { %v3676_v15 = vadd.f32 %v3675_v42, %v3674_v12 }
 0x2fd   : > { %v3677_v41 = vrot.slane %v3676_v15, 1 }
 0x2ff   : > { %v3678_v10 = vadd.f32 %v3677_v41, %v3676_v15 }
 0x301   : > { %3680 = vst [vmem:[%s5807_s5 + $0x1] sm:$0x1] %v3678_v10 }
 0x302   : > { %4427 = shalt.err (!%p4424_p3)
}
 0x303   : > { %s4428_s11 = scalar_lea.hbm %s5905_s26, 32  ;;  %s4432_s25 = scalar_lea.hbm %s5953_s3, 64 }
 0x304   : > { %p4429_p4 = scmp.ne.s32.totalorder %s5905_s26, %s4428_s11  ;;  %p4433_p9 = scmp.lt.u32.totalorder %s5905_s26, %s5953_s3 }
 0x305   : > { %p4434_p10 = scmp.lt.u32.totalorder %s4432_s25, %s4428_s11  ;;  %p4436_p12 = scmp.lt.u32.totalorder %s4428_s11, %s5905_s26 }
 0x306   : > { %p4430_p7 = pnand %p4429_p4, %p4546_p5 }
 0x307   : > { %p4435_p11 = por %p4434_p10, %p4433_p9 }
 0x308   : > { %p4431_p8 = pneg %p4430_p7 }
 0x309   : > { %p4437_p13 = por %p4436_p12, %p4435_p11 }
 0x30b   : > { %p4438_p0 = pnand %p4437_p13, %p4431_p8 }
 0x30d   : > { %4441 = shalt.err (!%p4438_p0)
}
 0x30e   : > { %4310 = dma.vmem_to_hbm [thread:$0]  (%p4546_p5), %s5907_s9, 32, %s5905_s26, %s3682_s27  }
 0x30f PF: > { %p4316_p1 = scmp.ge.s32.totalorder %s4476_s15, 2  ;;  %s3707_s30 = sand.u32 1, %s4464_s12  }
 0x310   : > { %s3708_s4 = scalar_lea.sflag [#allocation4], %s3707_s30 }
 0x311   : > { %p4313_p2 = pnand %p4316_p1, %p4550_p6 }
 0x313   : > { %4459 = dma.done.wait (!%p4313_p2), %s3708_s4, 32  }
 0x314   : > { %4461 = vsyncadd (!%p4313_p2), %s3708_s4, 4294967264  ;;  %p13_p3 = scmp.ge.s32.totalorder %s4533_s18, 4   ;;  %s5960_s12 = smov %s4468_s13 }
 0x315   : > { %s5961_s13 = smov %s4472_s14  ;;  %s5962_s14 = smov %s4544_s21 }
 0x316   : > { %s5963_s15 = smov %s4533_s18  ;;  %15 = sbr.rel (!%p13_p3) target bundleno = 3 (0x3), region = 69 }
 0x31d   :  { %3713 = vsyncpa [#allocation4], 1 }
 0x31e   :  { %3715 = vsyncpa [#allocation4 + $0x1], 1 }

</bundles_post_ra>
